<compile_context>
chip_gen: v7x
topology: tpu7x:2x2x1
jax: 0.10.0
libtpu: 0.0.40
codegen_flags: <defaults>
</compile_context>

<pallas_src>
import functools

import jax
import jax.numpy as jnp
from jax.experimental import pallas as pl
from jax.experimental.pallas import tpu as pltpu

# ----------------------------- configuration --------------------------------
B = 2            # batch
IN_C = 8         # in_channel
MID_C = 16       # middle_channel
OUT_C = 32       # out_channel (feature size fed to NNUE)
NUM_BLOCKS = 1   # num_blocks per res_conv group
NNUE_H = 32      # NNUE hidden width (assumed)
NNUE_OUT = 3     # NNUE output width (assumed)
CLAMP_LO, CLAMP_HI = -1.0, 127.0 / 128.0

ROT_I = [0, 2, 1, -1, 2, 0, -1, 1]
INDEX = [[0, 4, 0, 4], [0, 4, 0, 4], [0, 4, 2, 6], [0, 4, 2, 6],
         [2, 6, 2, 6], [2, 6, 2, 6], [2, 6, 0, 4], [2, 6, 0, 4]]
TAPS = ((0, 0), (0, 1), (1, 0), (1, 1))   # (kh, kw) row-major == torch Conv2d layout

# ------------------------- packed-parameter layout ---------------------------
# One bf16 weight slab (all matmul operands) + one f32 bias/BN slab, sliced with
# static offsets inside the kernel (3 input DMAs total instead of ~25).
_W_SEGS = (
    ("w1", 4 * IN_C, MID_C), ("w2", 4 * MID_C, MID_C), ("w3", 4 * MID_C, MID_C),
    ("rwa", 3 * NUM_BLOCKS * MID_C, MID_C), ("rwb", 3 * NUM_BLOCKS * MID_C, MID_C),
    ("wf", MID_C, OUT_C),
    ("nw1", OUT_C, NNUE_H), ("nw2", NNUE_H, NNUE_H), ("nw3", NNUE_H, NNUE_OUT),
)
# Bias/BN slab: every LOGICAL row gets its own 8-row-aligned physical slot
# (perf feedback: sublane-aligned bias reads).  15 rows -> 120 x 32 f32 = 15 KiB.
_B_SEGS = (
    ("b1", 1, MID_C), ("b2", 1, MID_C), ("b3", 1, MID_C),
    ("bns", 1, MID_C), ("bnb", 1, MID_C),
    ("rba", 3 * NUM_BLOCKS, MID_C), ("rbb", 3 * NUM_BLOCKS, MID_C),
    ("bf", 1, OUT_C), ("nb1", 1, NNUE_H), ("nb2", 1, NNUE_H), ("nb3", 1, NNUE_OUT),
)
_B_ROW_STRIDE = 8
_PAD_W = max(c for *_, c in _W_SEGS + _B_SEGS)          # 32 lanes


def _w_offsets():
    table, off = {}, 0
    for name, rows, cols in _W_SEGS:
        table[name] = (off, rows, cols)
        off += rows                       # all offsets are multiples of 16 (bf16 tile)
    return table, off


def _b_offsets():
    table, off = {}, 0
    for name, rows, cols in _B_SEGS:
        table[name] = (off, rows, cols)
        off += rows * _B_ROW_STRIDE       # every logical row lands 8-row aligned
    return table, off


_W_OFF, _W_ROWS = _w_offsets()
_B_OFF, _B_ROWS = _b_offsets()


def _wseg(w, name, row_off=0, rows=None):
    off, seg_rows, cols = _W_OFF[name]
    rows = seg_rows if rows is None else rows
    return w[off + row_off:off + row_off + rows, :cols]


def _bseg(bs, name, row=0):
    off, _, cols = _B_OFF[name]
    start = off + row * _B_ROW_STRIDE     # 8-row aligned single-row read
    return bs[start:start + 1, :cols]


# ------------------------------ math helpers --------------------------------
def _dot(a, w):
    # Matmul operands follow the weight slab's dtype (bf16 in the kernel,
    # f32 for the unquantized reference); accumulate in f32 either way.
    return jnp.dot(a.astype(w.dtype), w, preferred_element_type=jnp.float32)


def _mish(x, approx):
    # mish(x) = x * tanh(softplus(x)) with a single transcendental:
    #   t = exp(-|x|);  tanh(softplus(x)) = (1+2t)/(1+2t+2t^2)   for x >= 0
    #                                     = (t^2+2t)/(t^2+2t+2)  for x <  0
    t = jnp.exp(-jnp.abs(x))
    pos = x >= 0
    num = jnp.where(pos, 1.0 + 2.0 * t, t * (t + 2.0))
    den = num + jnp.where(pos, 2.0 * t * t, 2.0)
    if approx:
        return x * num * pl.reciprocal(den, approx=True)   # EUP slot, not a VALU divide
    return x * num / den


def _ladder_conv(h, s, n, w, wname, bias):
    """2x2 valid conv on an s x s board stored as rows (pos*n + nn, cin).

    Perf feedback #3: instead of lane-concatenating the 4 taps and doing one
    (rows, 4*cin) x (4*cin, cout) dot, do 4 per-tap dots against (cin, cout)
    slices of the packed weight and accumulate in f32 -- no lane relayout,
    four extra (tiny) MXU pushes are free.  All row slices are n-aligned.
    """
    so = s - 1
    cin = _W_OFF[wname][1] // 4
    acc = None
    for t, (di, dj) in enumerate(TAPS):
        pieces = [h[((i + di) * s + dj) * n:((i + di) * s + dj + so) * n, :]
                  for i in range(so)]
        tap = pieces[0] if so == 1 else jnp.concatenate(pieces, axis=0)
        contrib = _dot(tap, _wseg(w, wname, t * cin, cin))
        acc = contrib if acc is None else acc + contrib
    return acc + bias


def _res_stack(h, w, bs, start, count, approx):
    # ResConv1Block(x) = x + W_b @ mish(W_a @ x)   (1x1 convs)
    for r in range(start, start + count):
        wa = _wseg(w, "rwa", r * MID_C, MID_C)
        wb = _wseg(w, "rwb", r * MID_C, MID_C)
        y = _mish(_dot(h, wa) + _bseg(bs, "rba", r), approx)
        h = h + _dot(y, wb) + _bseg(bs, "rbb", r)
    return h


def _forward(g1, w, bs, *, n, b, approx):
    """g1: stage-1 tap-gathered input (9*n, 4*IN_C); w/bs: packed slabs."""
    # shared BatchNorm scale/shift, read once (used by stages 1 and 2)
    bn_s = _bseg(bs, "bns")
    bn_b = _bseg(bs, "bnb")

    # --- Mapping.forward -----------------------------------------------------
    # stage 1: ladder_conv_1 (taps pre-gathered in XLA) -> BN -> mish -> res_conv_1 -> mish
    h = _dot(g1, _wseg(w, "w1")) + _bseg(bs, "b1")          # (9n, MID_C)
    h = _mish(h * bn_s + bn_b, approx)
    h = _res_stack(h, w, bs, 0, NUM_BLOCKS, approx)
    h = _mish(h, approx)
    # stage 2: ladder_conv_2 -> BN (shared) -> mish -> res_conv_2 -> mish
    h = _ladder_conv(h, 3, n, w, "w2", _bseg(bs, "b2"))     # (4n, MID_C)
    h = _mish(h * bn_s + bn_b, approx)
    h = _res_stack(h, w, bs, NUM_BLOCKS, NUM_BLOCKS, approx)
    h = _mish(h, approx)
    # stage 3: ladder_conv_3 -> mish (no BN) -> res_conv_3 -> mish
    h = _ladder_conv(h, 2, n, w, "w3", _bseg(bs, "b3"))     # (n, MID_C)
    h = _mish(h, approx)
    h = _res_stack(h, w, bs, 2 * NUM_BLOCKS, NUM_BLOCKS, approx)
    h = _mish(h, approx)
    # final_conv (1x1) -> clamp.  Rows are now nn = patch*B + batch.
    f = _dot(h, _wseg(w, "wf")) + _bseg(bs, "bf")           # (n, OUT_C)
    f = jnp.clip(f, CLAMP_LO, CLAMP_HI)

    # --- assumed NNUE head ---------------------------------------------------
    # sum over the 8 rotated patches -> (B, OUT_C): 3 halving slice-adds
    rows = 8 * b
    while rows > b:
        rows //= 2
        f = f[:rows, :] + f[rows:2 * rows, :]
    z = jnp.clip(_dot(f, _wseg(w, "nw1")) + _bseg(bs, "nb1"), 0.0, 1.0)
    z = jnp.clip(_dot(z, _wseg(w, "nw2")) + _bseg(bs, "nb2"), 0.0, 1.0)
    return _dot(z, _wseg(w, "nw3")) + _bseg(bs, "nb3")


# ------------------------------ Pallas kernel --------------------------------
def _kernel(g1_ref, w_ref, b_ref, o_ref, *, n, b):
    o_ref[...] = _forward(g1_ref[...], w_ref[...], b_ref[...], n=n, b=b, approx=True)


def ladder_conv_nnue_pallas(g1, wslab, bslab):
    """g1: (9*n, 4*IN_C) f32, wslab: bf16 weight slab, bslab: f32 bias/BN slab."""
    n = g1.shape[0] // 9
    b = n // 8
    # Whole problem (<0.5 MiB lane-padded working set at B=2) fits one program;
    # a grid would only add per-step overhead here (see scaling note at top).
    return pl.pallas_call(
        functools.partial(_kernel, n=n, b=b),
        out_shape=jax.ShapeDtypeStruct((b, NNUE_OUT), jnp.float32),
        in_specs=[pl.BlockSpec(memory_space=pltpu.MemorySpace.VMEM)] * 3,
        out_specs=pl.BlockSpec(memory_space=pltpu.MemorySpace.VMEM),
        compiler_params=pltpu.CompilerParams(
            # honest budget: real working set is well under 1 MiB on every chip
            vmem_limit_bytes=4 * 1024 * 1024),
    )(g1, wslab, bslab)


# ------------------------------ JAX glue -------------------------------------
def _build_stage1_gather(x):
    """Slice + rot90 the 8 sub-boards and pre-gather the 4 stage-1 conv taps in
    XLA (outside the kernel).  Returns g1 (9*n, 4*IN_C) with
    row = (3*i + j) * n + (patch * B + batch)."""
    pats = []
    for p in range(8):
        r0, r1, c0, c1 = INDEX[p]
        sub = x[:, :, r0:r1, c0:c1]                   # (B, C, 4, 4)  NCHW
        sub = jnp.rot90(sub, ROT_I[p], axes=(2, 3))   # matches torch.rot90
        pats.append(sub)
    xp = jnp.stack(pats, axis=0)                      # (8, B, C, 4, 4)
    xp = jnp.transpose(xp, (3, 4, 0, 1, 2))           # (4, 4, 8, B, C)
    taps = [xp[di:di + 3, dj:dj + 3] for di, dj in TAPS]
    g1 = jnp.concatenate(taps, axis=-1)               # (3, 3, 8, B, 4*C)
    n = 8 * x.shape[0]
    return g1.reshape(9 * n, 4 * x.shape[1]).astype(jnp.float32)


@jax.jit
def forward(x, wslab, bslab):
    # One jitted program: patch build + stage-1 tap gather + Pallas kernel.
    return ladder_conv_nnue_pallas(_build_stage1_gather(x), wslab, bslab)


def pack_params(p, w_dtype=jnp.bfloat16):
    """Pack ~20 small parameters into 1 weight slab + 1 bias/BN slab.
    Call ONCE at init (perf feedback #1), not per forward call."""
    def padw(a):
        return jnp.pad(a, ((0, 0), (0, _PAD_W - a.shape[1])))

    wslab = jnp.concatenate([padw(p[name]) for name, _, _ in _W_SEGS], axis=0)
    wslab = wslab.astype(w_dtype)                                  # (_W_ROWS, 32)

    brows = []
    for name, rows, _ in _B_SEGS:
        seg = padw(p[name].astype(jnp.float32))                    # (rows, 32)
        seg = jnp.pad(seg[:, None, :], ((0, 0), (0, _B_ROW_STRIDE - 1), (0, 0)))
        brows.append(seg.reshape(rows * _B_ROW_STRIDE, _PAD_W))    # 8-row slots
    bslab = jnp.concatenate(brows, axis=0)                         # (_B_ROWS, 32)
    return wslab, bslab


def init_params(key):
    keys = iter(jax.random.split(key, 32))

    def nrm(shape, scale=0.3):
        return scale * jax.random.normal(next(keys), shape, jnp.float32)

    def ladder_w(cin, cout):
        # torch Conv2d layout (cout, cin, 2, 2) -> (4*cin, cout), taps row-major
        w = nrm((cout, cin, 2, 2))
        return jnp.transpose(w, (2, 3, 1, 0)).reshape(4 * cin, cout)

    p = {}
    p["w1"], p["b1"] = ladder_w(IN_C, MID_C), nrm((1, MID_C))
    p["w2"], p["b2"] = ladder_w(MID_C, MID_C), nrm((1, MID_C))
    p["w3"], p["b3"] = ladder_w(MID_C, MID_C), nrm((1, MID_C))

    gamma = 1.0 + 0.1 * jax.random.normal(next(keys), (1, MID_C), jnp.float32)
    beta = 0.1 * jax.random.normal(next(keys), (1, MID_C), jnp.float32)
    rmean = 0.1 * jax.random.normal(next(keys), (1, MID_C), jnp.float32)
    rvar = 1.0 + jax.random.uniform(next(keys), (1, MID_C), jnp.float32)
    p["bns"] = gamma / jnp.sqrt(rvar + 1e-5)
    p["bnb"] = beta - rmean * p["bns"]

    n_res = 3 * NUM_BLOCKS
    p["rwa"], p["rba"] = nrm((n_res * MID_C, MID_C)), nrm((n_res, MID_C))
    p["rwb"], p["rbb"] = nrm((n_res * MID_C, MID_C)), nrm((n_res, MID_C))

    p["wf"], p["bf"] = nrm((MID_C, OUT_C)), nrm((1, OUT_C))

    p["nw1"], p["nb1"] = nrm((OUT_C, NNUE_H)), nrm((1, NNUE_H))
    p["nw2"], p["nb2"] = nrm((NNUE_H, NNUE_H)), nrm((1, NNUE_H))
    p["nw3"], p["nb3"] = nrm((NNUE_H, NNUE_OUT)), nrm((1, NNUE_OUT))
    return p


# --------------------------------- main --------------------------------------
if __name__ == "__main__":
    key = jax.random.PRNGKey(0)
    kx, kp = jax.random.split(key)
    x = jax.random.normal(kx, (B, IN_C, 6, 6), jnp.float32)   # NCHW like PyTorch
    params = init_params(kp)

    # pack parameter slabs ONCE at init (not per forward call)
    wslab, bslab = pack_params(params)
    wslab, bslab = jax.device_put(wslab), jax.device_put(bslab)

    out = forward(x, wslab, bslab)
    out = jax.block_until_ready(out)

    # pure-JAX reference with identical bf16 weight slab / dot casts
    # (exact division instead of the in-kernel approximate reciprocal)
    g1 = _build_stage1_gather(x)
    ref = _forward(g1, wslab, bslab, n=8 * B, b=B, approx=False)

    # unquantized f32-weight reference to bound bf16-induced error
    wslab_f32, _ = pack_params(params, w_dtype=jnp.float32)
    ref_f32 = _forward(g1, wslab_f32, bslab, n=8 * B, b=B, approx=False)

    assert out.shape == (B, NNUE_OUT), out.shape
    assert bool(jnp.all(jnp.isfinite(out)))
    assert jnp.allclose(out, ref, rtol=2e-2, atol=2e-2), (out, ref)
    assert jnp.allclose(out, ref_f32, rtol=1.5e-1, atol=1.5e-1), (out, ref_f32)
    print("KERNEL_OK")
</pallas_src>

<mosaic_0001>
module attributes {stable_mosaic.version = 11 : i64} {
  func.func @_kernel(%arg0: memref<144x32xf32, #tpu.memory_space<vmem>>, %arg1: memref<368x32xbf16, #tpu.memory_space<vmem>>, %arg2: memref<120x32xf32, #tpu.memory_space<vmem>>, %arg3: memref<2x3xf32, #tpu.memory_space<vmem>>) attributes {dimension_semantics = [], scalar_prefetch = 0 : i64, scratch_operands = 0 : i64, tpu.core_type = #tpu.core_type<tc>} {
    %c0 = arith.constant 0 : index
    %c0_0 = arith.constant 0 : index
    %0 = vector.load %arg0[%c0, %c0_0] : memref<144x32xf32, #tpu.memory_space<vmem>>, vector<144x32xf32>
    %c0_1 = arith.constant 0 : index
    %c0_2 = arith.constant 0 : index
    %1 = vector.load %arg1[%c0_1, %c0_2] : memref<368x32xbf16, #tpu.memory_space<vmem>>, vector<368x32xbf16>
    %c0_3 = arith.constant 0 : index
    %c0_4 = arith.constant 0 : index
    %2 = vector.load %arg2[%c0_3, %c0_4] : memref<120x32xf32, #tpu.memory_space<vmem>>, vector<120x32xf32>
    %3 = vector.extract_strided_slice %2 {offsets = [24, 0], sizes = [1, 16], strides = [1, 1]} : vector<120x32xf32> to vector<1x16xf32>
    %4 = vector.extract_strided_slice %2 {offsets = [32, 0], sizes = [1, 16], strides = [1, 1]} : vector<120x32xf32> to vector<1x16xf32>
    %5 = vector.extract_strided_slice %1 {offsets = [0, 0], sizes = [32, 16], strides = [1, 1]} : vector<368x32xbf16> to vector<32x16xbf16>
    %6 = arith.truncf %0 : vector<144x32xf32> to vector<144x32xbf16>
    %cst = arith.constant dense<0.000000e+00> : vector<144x16xf32>
    %7 = tpu.matmul %6, %5, %cst {dimension_numbers = #tpu.dot_dimension_numbers<[1], [0], [0], [1], [0, 0, 1, 1], [], []>} : vector<144x32xbf16>, vector<32x16xbf16>, vector<144x16xf32> -> vector<144x16xf32>
    %8 = vector.extract_strided_slice %2 {offsets = [0, 0], sizes = [1, 16], strides = [1, 1]} : vector<120x32xf32> to vector<1x16xf32>
    %9 = vector.broadcast %8 : vector<1x16xf32> to vector<144x16xf32>
    %10 = arith.addf %7, %9 : vector<144x16xf32>
    %11 = vector.broadcast %3 : vector<1x16xf32> to vector<144x16xf32>
    %12 = arith.mulf %10, %11 : vector<144x16xf32>
    %13 = vector.broadcast %4 : vector<1x16xf32> to vector<144x16xf32>
    %14 = arith.addf %12, %13 : vector<144x16xf32>
    %15 = math.absf %14 : vector<144x16xf32>
    %cst_5 = arith.constant 0.000000e+00 : f32
    %16 = vector.broadcast %cst_5 : f32 to vector<144x16xf32>
    %17 = arith.subf %16, %15 : vector<144x16xf32>
    %18 = math.exp %17 : vector<144x16xf32>
    %cst_6 = arith.constant 0.000000e+00 : f32
    %19 = vector.broadcast %cst_6 : f32 to vector<144x16xf32>
    %20 = arith.cmpf oge, %14, %19 : vector<144x16xf32>
    %cst_7 = arith.constant 2.000000e+00 : f32
    %21 = vector.broadcast %cst_7 : f32 to vector<144x16xf32>
    %22 = arith.mulf %21, %18 : vector<144x16xf32>
    %cst_8 = arith.constant 1.000000e+00 : f32
    %23 = vector.broadcast %cst_8 : f32 to vector<144x16xf32>
    %24 = arith.addf %23, %22 : vector<144x16xf32>
    %cst_9 = arith.constant 2.000000e+00 : f32
    %25 = vector.broadcast %cst_9 : f32 to vector<144x16xf32>
    %26 = arith.addf %18, %25 : vector<144x16xf32>
    %27 = arith.mulf %18, %26 : vector<144x16xf32>
    %28 = arith.select %20, %24, %27 : vector<144x16xi1>, vector<144x16xf32>
    %cst_10 = arith.constant 2.000000e+00 : f32
    %29 = vector.broadcast %cst_10 : f32 to vector<144x16xf32>
    %30 = arith.mulf %29, %18 : vector<144x16xf32>
    %31 = arith.mulf %30, %18 : vector<144x16xf32>
    %cst_11 = arith.constant 2.000000e+00 : f32
    %32 = vector.broadcast %cst_11 : f32 to vector<144x16xf32>
    %33 = arith.select %20, %31, %32 : vector<144x16xi1>, vector<144x16xf32>
    %34 = arith.addf %28, %33 : vector<144x16xf32>
    %35 = arith.mulf %14, %28 : vector<144x16xf32>
    %36 = tpu.reciprocal %34 {approx = true} : vector<144x16xf32> -> vector<144x16xf32>
    %37 = arith.mulf %35, %36 : vector<144x16xf32>
    %38 = vector.extract_strided_slice %1 {offsets = [160, 0], sizes = [16, 16], strides = [1, 1]} : vector<368x32xbf16> to vector<16x16xbf16>
    %39 = vector.extract_strided_slice %1 {offsets = [208, 0], sizes = [16, 16], strides = [1, 1]} : vector<368x32xbf16> to vector<16x16xbf16>
    %40 = arith.truncf %37 : vector<144x16xf32> to vector<144x16xbf16>
    %cst_12 = arith.constant dense<0.000000e+00> : vector<144x16xf32>
    %41 = tpu.matmul %40, %38, %cst_12 {dimension_numbers = #tpu.dot_dimension_numbers<[1], [0], [0], [1], [0, 0, 1, 1], [], []>} : vector<144x16xbf16>, vector<16x16xbf16>, vector<144x16xf32> -> vector<144x16xf32>
    %42 = vector.extract_strided_slice %2 {offsets = [40, 0], sizes = [1, 16], strides = [1, 1]} : vector<120x32xf32> to vector<1x16xf32>
    %43 = vector.broadcast %42 : vector<1x16xf32> to vector<144x16xf32>
    %44 = arith.addf %41, %43 : vector<144x16xf32>
    %45 = math.absf %44 : vector<144x16xf32>
    %cst_13 = arith.constant 0.000000e+00 : f32
    %46 = vector.broadcast %cst_13 : f32 to vector<144x16xf32>
    %47 = arith.subf %46, %45 : vector<144x16xf32>
    %48 = math.exp %47 : vector<144x16xf32>
    %cst_14 = arith.constant 0.000000e+00 : f32
    %49 = vector.broadcast %cst_14 : f32 to vector<144x16xf32>
    %50 = arith.cmpf oge, %44, %49 : vector<144x16xf32>
    %cst_15 = arith.constant 2.000000e+00 : f32
    %51 = vector.broadcast %cst_15 : f32 to vector<144x16xf32>
    %52 = arith.mulf %51, %48 : vector<144x16xf32>
    %cst_16 = arith.constant 1.000000e+00 : f32
    %53 = vector.broadcast %cst_16 : f32 to vector<144x16xf32>
    %54 = arith.addf %53, %52 : vector<144x16xf32>
    %cst_17 = arith.constant 2.000000e+00 : f32
    %55 = vector.broadcast %cst_17 : f32 to vector<144x16xf32>
    %56 = arith.addf %48, %55 : vector<144x16xf32>
    %57 = arith.mulf %48, %56 : vector<144x16xf32>
    %58 = arith.select %50, %54, %57 : vector<144x16xi1>, vector<144x16xf32>
    %cst_18 = arith.constant 2.000000e+00 : f32
    %59 = vector.broadcast %cst_18 : f32 to vector<144x16xf32>
    %60 = arith.mulf %59, %48 : vector<144x16xf32>
    %61 = arith.mulf %60, %48 : vector<144x16xf32>
    %cst_19 = arith.constant 2.000000e+00 : f32
    %62 = vector.broadcast %cst_19 : f32 to vector<144x16xf32>
    %63 = arith.select %50, %61, %62 : vector<144x16xi1>, vector<144x16xf32>
    %64 = arith.addf %58, %63 : vector<144x16xf32>
    %65 = arith.mulf %44, %58 : vector<144x16xf32>
    %66 = tpu.reciprocal %64 {approx = true} : vector<144x16xf32> -> vector<144x16xf32>
    %67 = arith.mulf %65, %66 : vector<144x16xf32>
    %68 = arith.truncf %67 : vector<144x16xf32> to vector<144x16xbf16>
    %cst_20 = arith.constant dense<0.000000e+00> : vector<144x16xf32>
    %69 = tpu.matmul %68, %39, %cst_20 {dimension_numbers = #tpu.dot_dimension_numbers<[1], [0], [0], [1], [0, 0, 1, 1], [], []>} : vector<144x16xbf16>, vector<16x16xbf16>, vector<144x16xf32> -> vector<144x16xf32>
    %70 = arith.addf %37, %69 : vector<144x16xf32>
    %71 = vector.extract_strided_slice %2 {offsets = [64, 0], sizes = [1, 16], strides = [1, 1]} : vector<120x32xf32> to vector<1x16xf32>
    %72 = vector.broadcast %71 : vector<1x16xf32> to vector<144x16xf32>
    %73 = arith.addf %70, %72 : vector<144x16xf32>
    %74 = math.absf %73 : vector<144x16xf32>
    %cst_21 = arith.constant 0.000000e+00 : f32
    %75 = vector.broadcast %cst_21 : f32 to vector<144x16xf32>
    %76 = arith.subf %75, %74 : vector<144x16xf32>
    %77 = math.exp %76 : vector<144x16xf32>
    %cst_22 = arith.constant 0.000000e+00 : f32
    %78 = vector.broadcast %cst_22 : f32 to vector<144x16xf32>
    %79 = arith.cmpf oge, %73, %78 : vector<144x16xf32>
    %cst_23 = arith.constant 2.000000e+00 : f32
    %80 = vector.broadcast %cst_23 : f32 to vector<144x16xf32>
    %81 = arith.mulf %80, %77 : vector<144x16xf32>
    %cst_24 = arith.constant 1.000000e+00 : f32
    %82 = vector.broadcast %cst_24 : f32 to vector<144x16xf32>
    %83 = arith.addf %82, %81 : vector<144x16xf32>
    %cst_25 = arith.constant 2.000000e+00 : f32
    %84 = vector.broadcast %cst_25 : f32 to vector<144x16xf32>
    %85 = arith.addf %77, %84 : vector<144x16xf32>
    %86 = arith.mulf %77, %85 : vector<144x16xf32>
    %87 = arith.select %79, %83, %86 : vector<144x16xi1>, vector<144x16xf32>
    %cst_26 = arith.constant 2.000000e+00 : f32
    %88 = vector.broadcast %cst_26 : f32 to vector<144x16xf32>
    %89 = arith.mulf %88, %77 : vector<144x16xf32>
    %90 = arith.mulf %89, %77 : vector<144x16xf32>
    %cst_27 = arith.constant 2.000000e+00 : f32
    %91 = vector.broadcast %cst_27 : f32 to vector<144x16xf32>
    %92 = arith.select %79, %90, %91 : vector<144x16xi1>, vector<144x16xf32>
    %93 = arith.addf %87, %92 : vector<144x16xf32>
    %94 = arith.mulf %73, %87 : vector<144x16xf32>
    %95 = tpu.reciprocal %93 {approx = true} : vector<144x16xf32> -> vector<144x16xf32>
    %96 = arith.mulf %94, %95 : vector<144x16xf32>
    %97 = vector.extract_strided_slice %2 {offsets = [8, 0], sizes = [1, 16], strides = [1, 1]} : vector<120x32xf32> to vector<1x16xf32>
    %98 = vector.extract_strided_slice %96 {offsets = [0, 0], sizes = [32, 16], strides = [1, 1]} : vector<144x16xf32> to vector<32x16xf32>
    %99 = vector.extract_strided_slice %96 {offsets = [48, 0], sizes = [32, 16], strides = [1, 1]} : vector<144x16xf32> to vector<32x16xf32>
    %100 = tpu.concatenate %98, %99 in 0 : vector<32x16xf32>, vector<32x16xf32> -> vector<64x16xf32>
    %101 = vector.extract_strided_slice %1 {offsets = [32, 0], sizes = [16, 16], strides = [1, 1]} : vector<368x32xbf16> to vector<16x16xbf16>
    %102 = arith.truncf %100 : vector<64x16xf32> to vector<64x16xbf16>
    %cst_28 = arith.constant dense<0.000000e+00> : vector<64x16xf32>
    %103 = tpu.matmul %102, %101, %cst_28 {dimension_numbers = #tpu.dot_dimension_numbers<[1], [0], [0], [1], [0, 0, 1, 1], [], []>} : vector<64x16xbf16>, vector<16x16xbf16>, vector<64x16xf32> -> vector<64x16xf32>
    %104 = vector.extract_strided_slice %96 {offsets = [16, 0], sizes = [32, 16], strides = [1, 1]} : vector<144x16xf32> to vector<32x16xf32>
    %105 = vector.extract_strided_slice %96 {offsets = [64, 0], sizes = [32, 16], strides = [1, 1]} : vector<144x16xf32> to vector<32x16xf32>
    %106 = tpu.concatenate %104, %105 in 0 : vector<32x16xf32>, vector<32x16xf32> -> vector<64x16xf32>
    %107 = vector.extract_strided_slice %1 {offsets = [48, 0], sizes = [16, 16], strides = [1, 1]} : vector<368x32xbf16> to vector<16x16xbf16>
    %108 = arith.truncf %106 : vector<64x16xf32> to vector<64x16xbf16>
    %cst_29 = arith.constant dense<0.000000e+00> : vector<64x16xf32>
    %109 = tpu.matmul %108, %107, %cst_29 {dimension_numbers = #tpu.dot_dimension_numbers<[1], [0], [0], [1], [0, 0, 1, 1], [], []>} : vector<64x16xbf16>, vector<16x16xbf16>, vector<64x16xf32> -> vector<64x16xf32>
    %110 = arith.addf %103, %109 : vector<64x16xf32>
    %111 = vector.extract_strided_slice %96 {offsets = [48, 0], sizes = [32, 16], strides = [1, 1]} : vector<144x16xf32> to vector<32x16xf32>
    %112 = vector.extract_strided_slice %96 {offsets = [96, 0], sizes = [32, 16], strides = [1, 1]} : vector<144x16xf32> to vector<32x16xf32>
    %113 = tpu.concatenate %111, %112 in 0 : vector<32x16xf32>, vector<32x16xf32> -> vector<64x16xf32>
    %114 = vector.extract_strided_slice %1 {offsets = [64, 0], sizes = [16, 16], strides = [1, 1]} : vector<368x32xbf16> to vector<16x16xbf16>
    %115 = arith.truncf %113 : vector<64x16xf32> to vector<64x16xbf16>
    %cst_30 = arith.constant dense<0.000000e+00> : vector<64x16xf32>
    %116 = tpu.matmul %115, %114, %cst_30 {dimension_numbers = #tpu.dot_dimension_numbers<[1], [0], [0], [1], [0, 0, 1, 1], [], []>} : vector<64x16xbf16>, vector<16x16xbf16>, vector<64x16xf32> -> vector<64x16xf32>
    %117 = arith.addf %110, %116 : vector<64x16xf32>
    %118 = vector.extract_strided_slice %96 {offsets = [64, 0], sizes = [32, 16], strides = [1, 1]} : vector<144x16xf32> to vector<32x16xf32>
    %119 = vector.extract_strided_slice %96 {offsets = [112, 0], sizes = [32, 16], strides = [1, 1]} : vector<144x16xf32> to vector<32x16xf32>
    %120 = tpu.concatenate %118, %119 in 0 : vector<32x16xf32>, vector<32x16xf32> -> vector<64x16xf32>
    %121 = vector.extract_strided_slice %1 {offsets = [80, 0], sizes = [16, 16], strides = [1, 1]} : vector<368x32xbf16> to vector<16x16xbf16>
    %122 = arith.truncf %120 : vector<64x16xf32> to vector<64x16xbf16>
    %cst_31 = arith.constant dense<0.000000e+00> : vector<64x16xf32>
    %123 = tpu.matmul %122, %121, %cst_31 {dimension_numbers = #tpu.dot_dimension_numbers<[1], [0], [0], [1], [0, 0, 1, 1], [], []>} : vector<64x16xbf16>, vector<16x16xbf16>, vector<64x16xf32> -> vector<64x16xf32>
    %124 = arith.addf %117, %123 : vector<64x16xf32>
    %125 = vector.broadcast %97 : vector<1x16xf32> to vector<64x16xf32>
    %126 = arith.addf %124, %125 : vector<64x16xf32>
    %127 = vector.broadcast %3 : vector<1x16xf32> to vector<64x16xf32>
    %128 = arith.mulf %126, %127 : vector<64x16xf32>
    %129 = vector.broadcast %4 : vector<1x16xf32> to vector<64x16xf32>
    %130 = arith.addf %128, %129 : vector<64x16xf32>
    %131 = math.absf %130 : vector<64x16xf32>
    %cst_32 = arith.constant 0.000000e+00 : f32
    %132 = vector.broadcast %cst_32 : f32 to vector<64x16xf32>
    %133 = arith.subf %132, %131 : vector<64x16xf32>
    %134 = math.exp %133 : vector<64x16xf32>
    %cst_33 = arith.constant 0.000000e+00 : f32
    %135 = vector.broadcast %cst_33 : f32 to vector<64x16xf32>
    %136 = arith.cmpf oge, %130, %135 : vector<64x16xf32>
    %cst_34 = arith.constant 2.000000e+00 : f32
    %137 = vector.broadcast %cst_34 : f32 to vector<64x16xf32>
    %138 = arith.mulf %137, %134 : vector<64x16xf32>
    %cst_35 = arith.constant 1.000000e+00 : f32
    %139 = vector.broadcast %cst_35 : f32 to vector<64x16xf32>
    %140 = arith.addf %139, %138 : vector<64x16xf32>
    %cst_36 = arith.constant 2.000000e+00 : f32
    %141 = vector.broadcast %cst_36 : f32 to vector<64x16xf32>
    %142 = arith.addf %134, %141 : vector<64x16xf32>
    %143 = arith.mulf %134, %142 : vector<64x16xf32>
    %144 = arith.select %136, %140, %143 : vector<64x16xi1>, vector<64x16xf32>
    %cst_37 = arith.constant 2.000000e+00 : f32
    %145 = vector.broadcast %cst_37 : f32 to vector<64x16xf32>
    %146 = arith.mulf %145, %134 : vector<64x16xf32>
    %147 = arith.mulf %146, %134 : vector<64x16xf32>
    %cst_38 = arith.constant 2.000000e+00 : f32
    %148 = vector.broadcast %cst_38 : f32 to vector<64x16xf32>
    %149 = arith.select %136, %147, %148 : vector<64x16xi1>, vector<64x16xf32>
    %150 = arith.addf %144, %149 : vector<64x16xf32>
    %151 = arith.mulf %130, %144 : vector<64x16xf32>
    %152 = tpu.reciprocal %150 {approx = true} : vector<64x16xf32> -> vector<64x16xf32>
    %153 = arith.mulf %151, %152 : vector<64x16xf32>
    %154 = vector.extract_strided_slice %1 {offsets = [176, 0], sizes = [16, 16], strides = [1, 1]} : vector<368x32xbf16> to vector<16x16xbf16>
    %155 = vector.extract_strided_slice %1 {offsets = [224, 0], sizes = [16, 16], strides = [1, 1]} : vector<368x32xbf16> to vector<16x16xbf16>
    %156 = arith.truncf %153 : vector<64x16xf32> to vector<64x16xbf16>
    %cst_39 = arith.constant dense<0.000000e+00> : vector<64x16xf32>
    %157 = tpu.matmul %156, %154, %cst_39 {dimension_numbers = #tpu.dot_dimension_numbers<[1], [0], [0], [1], [0, 0, 1, 1], [], []>} : vector<64x16xbf16>, vector<16x16xbf16>, vector<64x16xf32> -> vector<64x16xf32>
    %158 = vector.extract_strided_slice %2 {offsets = [48, 0], sizes = [1, 16], strides = [1, 1]} : vector<120x32xf32> to vector<1x16xf32>
    %159 = vector.broadcast %158 : vector<1x16xf32> to vector<64x16xf32>
    %160 = arith.addf %157, %159 : vector<64x16xf32>
    %161 = math.absf %160 : vector<64x16xf32>
    %cst_40 = arith.constant 0.000000e+00 : f32
    %162 = vector.broadcast %cst_40 : f32 to vector<64x16xf32>
    %163 = arith.subf %162, %161 : vector<64x16xf32>
    %164 = math.exp %163 : vector<64x16xf32>
    %cst_41 = arith.constant 0.000000e+00 : f32
    %165 = vector.broadcast %cst_41 : f32 to vector<64x16xf32>
    %166 = arith.cmpf oge, %160, %165 : vector<64x16xf32>
    %cst_42 = arith.constant 2.000000e+00 : f32
    %167 = vector.broadcast %cst_42 : f32 to vector<64x16xf32>
    %168 = arith.mulf %167, %164 : vector<64x16xf32>
    %cst_43 = arith.constant 1.000000e+00 : f32
    %169 = vector.broadcast %cst_43 : f32 to vector<64x16xf32>
    %170 = arith.addf %169, %168 : vector<64x16xf32>
    %cst_44 = arith.constant 2.000000e+00 : f32
    %171 = vector.broadcast %cst_44 : f32 to vector<64x16xf32>
    %172 = arith.addf %164, %171 : vector<64x16xf32>
    %173 = arith.mulf %164, %172 : vector<64x16xf32>
    %174 = arith.select %166, %170, %173 : vector<64x16xi1>, vector<64x16xf32>
    %cst_45 = arith.constant 2.000000e+00 : f32
    %175 = vector.broadcast %cst_45 : f32 to vector<64x16xf32>
    %176 = arith.mulf %175, %164 : vector<64x16xf32>
    %177 = arith.mulf %176, %164 : vector<64x16xf32>
    %cst_46 = arith.constant 2.000000e+00 : f32
    %178 = vector.broadcast %cst_46 : f32 to vector<64x16xf32>
    %179 = arith.select %166, %177, %178 : vector<64x16xi1>, vector<64x16xf32>
    %180 = arith.addf %174, %179 : vector<64x16xf32>
    %181 = arith.mulf %160, %174 : vector<64x16xf32>
    %182 = tpu.reciprocal %180 {approx = true} : vector<64x16xf32> -> vector<64x16xf32>
    %183 = arith.mulf %181, %182 : vector<64x16xf32>
    %184 = arith.truncf %183 : vector<64x16xf32> to vector<64x16xbf16>
    %cst_47 = arith.constant dense<0.000000e+00> : vector<64x16xf32>
    %185 = tpu.matmul %184, %155, %cst_47 {dimension_numbers = #tpu.dot_dimension_numbers<[1], [0], [0], [1], [0, 0, 1, 1], [], []>} : vector<64x16xbf16>, vector<16x16xbf16>, vector<64x16xf32> -> vector<64x16xf32>
    %186 = arith.addf %153, %185 : vector<64x16xf32>
    %187 = vector.extract_strided_slice %2 {offsets = [72, 0], sizes = [1, 16], strides = [1, 1]} : vector<120x32xf32> to vector<1x16xf32>
    %188 = vector.broadcast %187 : vector<1x16xf32> to vector<64x16xf32>
    %189 = arith.addf %186, %188 : vector<64x16xf32>
    %190 = math.absf %189 : vector<64x16xf32>
    %cst_48 = arith.constant 0.000000e+00 : f32
    %191 = vector.broadcast %cst_48 : f32 to vector<64x16xf32>
    %192 = arith.subf %191, %190 : vector<64x16xf32>
    %193 = math.exp %192 : vector<64x16xf32>
    %cst_49 = arith.constant 0.000000e+00 : f32
    %194 = vector.broadcast %cst_49 : f32 to vector<64x16xf32>
    %195 = arith.cmpf oge, %189, %194 : vector<64x16xf32>
    %cst_50 = arith.constant 2.000000e+00 : f32
    %196 = vector.broadcast %cst_50 : f32 to vector<64x16xf32>
    %197 = arith.mulf %196, %193 : vector<64x16xf32>
    %cst_51 = arith.constant 1.000000e+00 : f32
    %198 = vector.broadcast %cst_51 : f32 to vector<64x16xf32>
    %199 = arith.addf %198, %197 : vector<64x16xf32>
    %cst_52 = arith.constant 2.000000e+00 : f32
    %200 = vector.broadcast %cst_52 : f32 to vector<64x16xf32>
    %201 = arith.addf %193, %200 : vector<64x16xf32>
    %202 = arith.mulf %193, %201 : vector<64x16xf32>
    %203 = arith.select %195, %199, %202 : vector<64x16xi1>, vector<64x16xf32>
    %cst_53 = arith.constant 2.000000e+00 : f32
    %204 = vector.broadcast %cst_53 : f32 to vector<64x16xf32>
    %205 = arith.mulf %204, %193 : vector<64x16xf32>
    %206 = arith.mulf %205, %193 : vector<64x16xf32>
    %cst_54 = arith.constant 2.000000e+00 : f32
    %207 = vector.broadcast %cst_54 : f32 to vector<64x16xf32>
    %208 = arith.select %195, %206, %207 : vector<64x16xi1>, vector<64x16xf32>
    %209 = arith.addf %203, %208 : vector<64x16xf32>
    %210 = arith.mulf %189, %203 : vector<64x16xf32>
    %211 = tpu.reciprocal %209 {approx = true} : vector<64x16xf32> -> vector<64x16xf32>
    %212 = arith.mulf %210, %211 : vector<64x16xf32>
    %213 = vector.extract_strided_slice %2 {offsets = [16, 0], sizes = [1, 16], strides = [1, 1]} : vector<120x32xf32> to vector<1x16xf32>
    %214 = vector.extract_strided_slice %212 {offsets = [0, 0], sizes = [16, 16], strides = [1, 1]} : vector<64x16xf32> to vector<16x16xf32>
    %215 = vector.extract_strided_slice %1 {offsets = [96, 0], sizes = [16, 16], strides = [1, 1]} : vector<368x32xbf16> to vector<16x16xbf16>
    %216 = arith.truncf %214 : vector<16x16xf32> to vector<16x16xbf16>
    %cst_55 = arith.constant dense<0.000000e+00> : vector<16x16xf32>
    %217 = tpu.matmul %216, %215, %cst_55 {dimension_numbers = #tpu.dot_dimension_numbers<[1], [0], [0], [1], [0, 0, 1, 1], [], []>} : vector<16x16xbf16>, vector<16x16xbf16>, vector<16x16xf32> -> vector<16x16xf32>
    %218 = vector.extract_strided_slice %212 {offsets = [16, 0], sizes = [16, 16], strides = [1, 1]} : vector<64x16xf32> to vector<16x16xf32>
    %219 = vector.extract_strided_slice %1 {offsets = [112, 0], sizes = [16, 16], strides = [1, 1]} : vector<368x32xbf16> to vector<16x16xbf16>
    %220 = arith.truncf %218 : vector<16x16xf32> to vector<16x16xbf16>
    %cst_56 = arith.constant dense<0.000000e+00> : vector<16x16xf32>
    %221 = tpu.matmul %220, %219, %cst_56 {dimension_numbers = #tpu.dot_dimension_numbers<[1], [0], [0], [1], [0, 0, 1, 1], [], []>} : vector<16x16xbf16>, vector<16x16xbf16>, vector<16x16xf32> -> vector<16x16xf32>
    %222 = arith.addf %217, %221 : vector<16x16xf32>
    %223 = vector.extract_strided_slice %212 {offsets = [32, 0], sizes = [16, 16], strides = [1, 1]} : vector<64x16xf32> to vector<16x16xf32>
    %224 = vector.extract_strided_slice %1 {offsets = [128, 0], sizes = [16, 16], strides = [1, 1]} : vector<368x32xbf16> to vector<16x16xbf16>
    %225 = arith.truncf %223 : vector<16x16xf32> to vector<16x16xbf16>
    %cst_57 = arith.constant dense<0.000000e+00> : vector<16x16xf32>
    %226 = tpu.matmul %225, %224, %cst_57 {dimension_numbers = #tpu.dot_dimension_numbers<[1], [0], [0], [1], [0, 0, 1, 1], [], []>} : vector<16x16xbf16>, vector<16x16xbf16>, vector<16x16xf32> -> vector<16x16xf32>
    %227 = arith.addf %222, %226 : vector<16x16xf32>
    %228 = vector.extract_strided_slice %212 {offsets = [48, 0], sizes = [16, 16], strides = [1, 1]} : vector<64x16xf32> to vector<16x16xf32>
    %229 = vector.extract_strided_slice %1 {offsets = [144, 0], sizes = [16, 16], strides = [1, 1]} : vector<368x32xbf16> to vector<16x16xbf16>
    %230 = arith.truncf %228 : vector<16x16xf32> to vector<16x16xbf16>
    %cst_58 = arith.constant dense<0.000000e+00> : vector<16x16xf32>
    %231 = tpu.matmul %230, %229, %cst_58 {dimension_numbers = #tpu.dot_dimension_numbers<[1], [0], [0], [1], [0, 0, 1, 1], [], []>} : vector<16x16xbf16>, vector<16x16xbf16>, vector<16x16xf32> -> vector<16x16xf32>
    %232 = arith.addf %227, %231 : vector<16x16xf32>
    %233 = vector.broadcast %213 : vector<1x16xf32> to vector<16x16xf32>
    %234 = arith.addf %232, %233 : vector<16x16xf32>
    %235 = math.absf %234 : vector<16x16xf32>
    %cst_59 = arith.constant 0.000000e+00 : f32
    %236 = vector.broadcast %cst_59 : f32 to vector<16x16xf32>
    %237 = arith.subf %236, %235 : vector<16x16xf32>
    %238 = math.exp %237 : vector<16x16xf32>
    %cst_60 = arith.constant 0.000000e+00 : f32
    %239 = vector.broadcast %cst_60 : f32 to vector<16x16xf32>
    %240 = arith.cmpf oge, %234, %239 : vector<16x16xf32>
    %cst_61 = arith.constant 2.000000e+00 : f32
    %241 = vector.broadcast %cst_61 : f32 to vector<16x16xf32>
    %242 = arith.mulf %241, %238 : vector<16x16xf32>
    %cst_62 = arith.constant 1.000000e+00 : f32
    %243 = vector.broadcast %cst_62 : f32 to vector<16x16xf32>
    %244 = arith.addf %243, %242 : vector<16x16xf32>
    %cst_63 = arith.constant 2.000000e+00 : f32
    %245 = vector.broadcast %cst_63 : f32 to vector<16x16xf32>
    %246 = arith.addf %238, %245 : vector<16x16xf32>
    %247 = arith.mulf %238, %246 : vector<16x16xf32>
    %248 = arith.select %240, %244, %247 : vector<16x16xi1>, vector<16x16xf32>
    %cst_64 = arith.constant 2.000000e+00 : f32
    %249 = vector.broadcast %cst_64 : f32 to vector<16x16xf32>
    %250 = arith.mulf %249, %238 : vector<16x16xf32>
    %251 = arith.mulf %250, %238 : vector<16x16xf32>
    %cst_65 = arith.constant 2.000000e+00 : f32
    %252 = vector.broadcast %cst_65 : f32 to vector<16x16xf32>
    %253 = arith.select %240, %251, %252 : vector<16x16xi1>, vector<16x16xf32>
    %254 = arith.addf %248, %253 : vector<16x16xf32>
    %255 = arith.mulf %234, %248 : vector<16x16xf32>
    %256 = tpu.reciprocal %254 {approx = true} : vector<16x16xf32> -> vector<16x16xf32>
    %257 = arith.mulf %255, %256 : vector<16x16xf32>
    %258 = vector.extract_strided_slice %1 {offsets = [192, 0], sizes = [16, 16], strides = [1, 1]} : vector<368x32xbf16> to vector<16x16xbf16>
    %259 = vector.extract_strided_slice %1 {offsets = [240, 0], sizes = [16, 16], strides = [1, 1]} : vector<368x32xbf16> to vector<16x16xbf16>
    %260 = arith.truncf %257 : vector<16x16xf32> to vector<16x16xbf16>
    %cst_66 = arith.constant dense<0.000000e+00> : vector<16x16xf32>
    %261 = tpu.matmul %260, %258, %cst_66 {dimension_numbers = #tpu.dot_dimension_numbers<[1], [0], [0], [1], [0, 0, 1, 1], [], []>} : vector<16x16xbf16>, vector<16x16xbf16>, vector<16x16xf32> -> vector<16x16xf32>
    %262 = vector.extract_strided_slice %2 {offsets = [56, 0], sizes = [1, 16], strides = [1, 1]} : vector<120x32xf32> to vector<1x16xf32>
    %263 = vector.broadcast %262 : vector<1x16xf32> to vector<16x16xf32>
    %264 = arith.addf %261, %263 : vector<16x16xf32>
    %265 = math.absf %264 : vector<16x16xf32>
    %cst_67 = arith.constant 0.000000e+00 : f32
    %266 = vector.broadcast %cst_67 : f32 to vector<16x16xf32>
    %267 = arith.subf %266, %265 : vector<16x16xf32>
    %268 = math.exp %267 : vector<16x16xf32>
    %cst_68 = arith.constant 0.000000e+00 : f32
    %269 = vector.broadcast %cst_68 : f32 to vector<16x16xf32>
    %270 = arith.cmpf oge, %264, %269 : vector<16x16xf32>
    %cst_69 = arith.constant 2.000000e+00 : f32
    %271 = vector.broadcast %cst_69 : f32 to vector<16x16xf32>
    %272 = arith.mulf %271, %268 : vector<16x16xf32>
    %cst_70 = arith.constant 1.000000e+00 : f32
    %273 = vector.broadcast %cst_70 : f32 to vector<16x16xf32>
    %274 = arith.addf %273, %272 : vector<16x16xf32>
    %cst_71 = arith.constant 2.000000e+00 : f32
    %275 = vector.broadcast %cst_71 : f32 to vector<16x16xf32>
    %276 = arith.addf %268, %275 : vector<16x16xf32>
    %277 = arith.mulf %268, %276 : vector<16x16xf32>
    %278 = arith.select %270, %274, %277 : vector<16x16xi1>, vector<16x16xf32>
    %cst_72 = arith.constant 2.000000e+00 : f32
    %279 = vector.broadcast %cst_72 : f32 to vector<16x16xf32>
    %280 = arith.mulf %279, %268 : vector<16x16xf32>
    %281 = arith.mulf %280, %268 : vector<16x16xf32>
    %cst_73 = arith.constant 2.000000e+00 : f32
    %282 = vector.broadcast %cst_73 : f32 to vector<16x16xf32>
    %283 = arith.select %270, %281, %282 : vector<16x16xi1>, vector<16x16xf32>
    %284 = arith.addf %278, %283 : vector<16x16xf32>
    %285 = arith.mulf %264, %278 : vector<16x16xf32>
    %286 = tpu.reciprocal %284 {approx = true} : vector<16x16xf32> -> vector<16x16xf32>
    %287 = arith.mulf %285, %286 : vector<16x16xf32>
    %288 = arith.truncf %287 : vector<16x16xf32> to vector<16x16xbf16>
    %cst_74 = arith.constant dense<0.000000e+00> : vector<16x16xf32>
    %289 = tpu.matmul %288, %259, %cst_74 {dimension_numbers = #tpu.dot_dimension_numbers<[1], [0], [0], [1], [0, 0, 1, 1], [], []>} : vector<16x16xbf16>, vector<16x16xbf16>, vector<16x16xf32> -> vector<16x16xf32>
    %290 = arith.addf %257, %289 : vector<16x16xf32>
    %291 = vector.extract_strided_slice %2 {offsets = [80, 0], sizes = [1, 16], strides = [1, 1]} : vector<120x32xf32> to vector<1x16xf32>
    %292 = vector.broadcast %291 : vector<1x16xf32> to vector<16x16xf32>
    %293 = arith.addf %290, %292 : vector<16x16xf32>
    %294 = math.absf %293 : vector<16x16xf32>
    %cst_75 = arith.constant 0.000000e+00 : f32
    %295 = vector.broadcast %cst_75 : f32 to vector<16x16xf32>
    %296 = arith.subf %295, %294 : vector<16x16xf32>
    %297 = math.exp %296 : vector<16x16xf32>
    %cst_76 = arith.constant 0.000000e+00 : f32
    %298 = vector.broadcast %cst_76 : f32 to vector<16x16xf32>
    %299 = arith.cmpf oge, %293, %298 : vector<16x16xf32>
    %cst_77 = arith.constant 2.000000e+00 : f32
    %300 = vector.broadcast %cst_77 : f32 to vector<16x16xf32>
    %301 = arith.mulf %300, %297 : vector<16x16xf32>
    %cst_78 = arith.constant 1.000000e+00 : f32
    %302 = vector.broadcast %cst_78 : f32 to vector<16x16xf32>
    %303 = arith.addf %302, %301 : vector<16x16xf32>
    %cst_79 = arith.constant 2.000000e+00 : f32
    %304 = vector.broadcast %cst_79 : f32 to vector<16x16xf32>
    %305 = arith.addf %297, %304 : vector<16x16xf32>
    %306 = arith.mulf %297, %305 : vector<16x16xf32>
    %307 = arith.select %299, %303, %306 : vector<16x16xi1>, vector<16x16xf32>
    %cst_80 = arith.constant 2.000000e+00 : f32
    %308 = vector.broadcast %cst_80 : f32 to vector<16x16xf32>
    %309 = arith.mulf %308, %297 : vector<16x16xf32>
    %310 = arith.mulf %309, %297 : vector<16x16xf32>
    %cst_81 = arith.constant 2.000000e+00 : f32
    %311 = vector.broadcast %cst_81 : f32 to vector<16x16xf32>
    %312 = arith.select %299, %310, %311 : vector<16x16xi1>, vector<16x16xf32>
    %313 = arith.addf %307, %312 : vector<16x16xf32>
    %314 = arith.mulf %293, %307 : vector<16x16xf32>
    %315 = tpu.reciprocal %313 {approx = true} : vector<16x16xf32> -> vector<16x16xf32>
    %316 = arith.mulf %314, %315 : vector<16x16xf32>
    %317 = vector.extract_strided_slice %1 {offsets = [256, 0], sizes = [16, 32], strides = [1, 1]} : vector<368x32xbf16> to vector<16x32xbf16>
    %318 = arith.truncf %316 : vector<16x16xf32> to vector<16x16xbf16>
    %cst_82 = arith.constant dense<0.000000e+00> : vector<16x32xf32>
    %319 = tpu.matmul %318, %317, %cst_82 {dimension_numbers = #tpu.dot_dimension_numbers<[1], [0], [0], [1], [0, 0, 1, 1], [], []>} : vector<16x16xbf16>, vector<16x32xbf16>, vector<16x32xf32> -> vector<16x32xf32>
    %320 = vector.extract_strided_slice %2 {offsets = [88, 0], sizes = [1, 32], strides = [1, 1]} : vector<120x32xf32> to vector<1x32xf32>
    %321 = vector.broadcast %320 : vector<1x32xf32> to vector<16x32xf32>
    %322 = arith.addf %319, %321 : vector<16x32xf32>
    %cst_83 = arith.constant -1.000000e+00 : f32
    %cst_84 = arith.constant 0.9921875 : f32
    %323 = vector.broadcast %cst_83 : f32 to vector<16x32xf32>
    %324 = arith.maximumf %323, %322 : vector<16x32xf32>
    %325 = vector.broadcast %cst_84 : f32 to vector<16x32xf32>
    %326 = arith.minimumf %325, %324 : vector<16x32xf32>
    %327 = vector.extract_strided_slice %326 {offsets = [0, 0], sizes = [8, 32], strides = [1, 1]} : vector<16x32xf32> to vector<8x32xf32>
    %328 = vector.extract_strided_slice %326 {offsets = [8, 0], sizes = [8, 32], strides = [1, 1]} : vector<16x32xf32> to vector<8x32xf32>
    %329 = arith.addf %327, %328 : vector<8x32xf32>
    %330 = vector.extract_strided_slice %329 {offsets = [0, 0], sizes = [4, 32], strides = [1, 1]} : vector<8x32xf32> to vector<4x32xf32>
    %331 = vector.extract_strided_slice %329 {offsets = [4, 0], sizes = [4, 32], strides = [1, 1]} : vector<8x32xf32> to vector<4x32xf32>
    %332 = arith.addf %330, %331 : vector<4x32xf32>
    %333 = vector.extract_strided_slice %332 {offsets = [0, 0], sizes = [2, 32], strides = [1, 1]} : vector<4x32xf32> to vector<2x32xf32>
    %334 = vector.extract_strided_slice %332 {offsets = [2, 0], sizes = [2, 32], strides = [1, 1]} : vector<4x32xf32> to vector<2x32xf32>
    %335 = arith.addf %333, %334 : vector<2x32xf32>
    %336 = vector.extract_strided_slice %1 {offsets = [272, 0], sizes = [32, 32], strides = [1, 1]} : vector<368x32xbf16> to vector<32x32xbf16>
    %337 = arith.truncf %335 : vector<2x32xf32> to vector<2x32xbf16>
    %cst_85 = arith.constant dense<0.000000e+00> : vector<2x32xf32>
    %338 = tpu.matmul %337, %336, %cst_85 {dimension_numbers = #tpu.dot_dimension_numbers<[1], [0], [0], [1], [0, 0, 1, 1], [], []>} : vector<2x32xbf16>, vector<32x32xbf16>, vector<2x32xf32> -> vector<2x32xf32>
    %339 = vector.extract_strided_slice %2 {offsets = [96, 0], sizes = [1, 32], strides = [1, 1]} : vector<120x32xf32> to vector<1x32xf32>
    %340 = vector.broadcast %339 : vector<1x32xf32> to vector<2x32xf32>
    %341 = arith.addf %338, %340 : vector<2x32xf32>
    %cst_86 = arith.constant 0.000000e+00 : f32
    %cst_87 = arith.constant 1.000000e+00 : f32
    %342 = vector.broadcast %cst_86 : f32 to vector<2x32xf32>
    %343 = arith.maximumf %342, %341 : vector<2x32xf32>
    %344 = vector.broadcast %cst_87 : f32 to vector<2x32xf32>
    %345 = arith.minimumf %344, %343 : vector<2x32xf32>
    %346 = vector.extract_strided_slice %1 {offsets = [304, 0], sizes = [32, 32], strides = [1, 1]} : vector<368x32xbf16> to vector<32x32xbf16>
    %347 = arith.truncf %345 : vector<2x32xf32> to vector<2x32xbf16>
    %cst_88 = arith.constant dense<0.000000e+00> : vector<2x32xf32>
    %348 = tpu.matmul %347, %346, %cst_88 {dimension_numbers = #tpu.dot_dimension_numbers<[1], [0], [0], [1], [0, 0, 1, 1], [], []>} : vector<2x32xbf16>, vector<32x32xbf16>, vector<2x32xf32> -> vector<2x32xf32>
    %349 = vector.extract_strided_slice %2 {offsets = [104, 0], sizes = [1, 32], strides = [1, 1]} : vector<120x32xf32> to vector<1x32xf32>
    %350 = vector.broadcast %349 : vector<1x32xf32> to vector<2x32xf32>
    %351 = arith.addf %348, %350 : vector<2x32xf32>
    %cst_89 = arith.constant 0.000000e+00 : f32
    %cst_90 = arith.constant 1.000000e+00 : f32
    %352 = vector.broadcast %cst_89 : f32 to vector<2x32xf32>
    %353 = arith.maximumf %352, %351 : vector<2x32xf32>
    %354 = vector.broadcast %cst_90 : f32 to vector<2x32xf32>
    %355 = arith.minimumf %354, %353 : vector<2x32xf32>
    %356 = vector.extract_strided_slice %1 {offsets = [336, 0], sizes = [32, 3], strides = [1, 1]} : vector<368x32xbf16> to vector<32x3xbf16>
    %357 = arith.truncf %355 : vector<2x32xf32> to vector<2x32xbf16>
    %cst_91 = arith.constant dense<0.000000e+00> : vector<2x3xf32>
    %358 = tpu.matmul %357, %356, %cst_91 {dimension_numbers = #tpu.dot_dimension_numbers<[1], [0], [0], [1], [0, 0, 1, 1], [], []>} : vector<2x32xbf16>, vector<32x3xbf16>, vector<2x3xf32> -> vector<2x3xf32>
    %359 = vector.extract_strided_slice %2 {offsets = [112, 0], sizes = [1, 3], strides = [1, 1]} : vector<120x32xf32> to vector<1x3xf32>
    %360 = vector.broadcast %359 : vector<1x3xf32> to vector<2x3xf32>
    %361 = arith.addf %358, %360 : vector<2x3xf32>
    %c0_92 = arith.constant 0 : index
    %c0_93 = arith.constant 0 : index
    %362 = vector.load %arg3[%c0_92, %c0_93] : memref<2x3xf32, #tpu.memory_space<vmem>>, vector<2x3xf32>
    tpu.vector_store %arg3[%c0_92, %c0_93], %361 {strides = array<i32>} : memref<2x3xf32, #tpu.memory_space<vmem>>, vector<2x3xf32>,
    return
  }
}

</mosaic_0001>

<bundles_post_ra>
// kernel: forward.1
= control target key start
LH: loop header
LB: loop body
LE: loop exit
PB: predicated region body
PF: predicated region fallthrough
CT: control target
= control target key end

     0   :  { %v3958_v1 = vmov 0.0   ;;  %vm3959_vm0 = vmmov 0   ;;  %vm120_vm1 = vcmask 261120   ;;  %s5181_s0 = inlined_call_operand.vmem [shape: f32[144,32], index: 0, kind: input, shape index: {}]   ;;  %s5182_s1 = inlined_call_operand.vmem [shape: bf16[368,32], index: 1, kind: input, shape index: {}]   ;;  %s5183_s2 = inlined_call_operand.vmem [shape: f32[120,32], index: 2, kind: input, shape index: {}]   ;;  %s5184_s3 = inlined_call_operand.hbm [shape: f32[2,3], index: 3, kind: output, shape index: {}]  }
   0x1   :  { %v3575_v0 = vld [vmem:[%s5182_s1] sm:$0xff]   ;;  %3306 = vmatprep.subr.bf16.mxu0 %v3958_v1  ;;  %3346 = vmatprep.subr.bf16.mxu1 %v3958_v1  ;;  %v3576_v2 = vld [vmem:[%s5182_s1 + $0x8] sm:$0xff]   ;;  %v18_v6 = vld [vmem:[%s5181_s0 + $0x10] sm:$0xff] }
   0x2   :  { %3307 = vmatpush3.bf16.msra.mxu0 %v3575_v0  ;;  %3310 = vmatprep.mubr.msk.bf16.mxu0 %vm3959_vm0, %v3958_v1  ;;  %v16_v3 = vld [vmem:[%s5181_s0] sm:$0xff]  ;;  %v17_v4 = vld [vmem:[%s5181_s0 + $0x8] sm:$0xff]  ;;  %v19_v7 = vld [vmem:[%s5181_s0 + $0x18] sm:$0xff] }
   0x3   :  { %3308 = vmatprep.subr.bf16.mxu0 %v3958_v1  ;;  %3348 = vmatprep.mubr.msk.bf16.mxu1 %vm3959_vm0, %v3958_v1  ;;  %v95_v5 = vpack.c.bf16 %v17_v4, %v16_v3  ;;  %v96_v8 = vpack.c.bf16 %v19_v7, %v18_v6  ;;  %v20_v9 = vld [vmem:[%s5181_s0 + $0x20] sm:$0xff]  ;;  %v21_v10 = vld [vmem:[%s5181_s0 + $0x28] sm:$0xff] }
   0x4   :  { %v97_v11 = vpack.c.bf16 %v21_v10, %v20_v9 }
   0x6   :  { %3309 = vmatpush3.bf16.msra.mxu0 %v3576_v2 }
   0x9   :  { %3311 = vmatmul.mubr.msk.bf16.vlgmr.msra.gmra.mrb[0].mxu0 %vm120_vm1, %v95_v5 }
   0xa   :  { %3314 = vmatprep.mubr.msk.bf16.mxu0 %vm3959_vm0, %v3958_v1 }
  0x11   :  { %3315 = vmatmul.mubr.msk.bf16.gmra.mrb[4].mxu0 %vm120_vm1, %v96_v8 }
  0x12   :  { %3318 = vmatprep.mubr.msk.bf16.mxu0 %vm3959_vm0, %v3958_v1 }
  0x13   :  { %8 = vsyncpa [#allocation3], 0  ;;  %v22_v12 = vld [vmem:[%s5181_s0 + $0x30] sm:$0xff]  ;;  %v23_v13 = vld [vmem:[%s5181_s0 + $0x38] sm:$0xff]  ;;  %v104_v31 = vlaneseq  ;;  %vm604_vm6 = vcmask 130048  }
  0x14   :  { %v98_v14 = vpack.c.bf16 %v23_v13, %v22_v12  ;;  %v24_v15 = vld [vmem:[%s5181_s0 + $0x40] sm:$0xff]  ;;  %v25_v16 = vld [vmem:[%s5181_s0 + $0x48] sm:$0xff]  ;;  %v26_v18 = vld [vmem:[%s5181_s0 + $0x50] sm:$0xff] }
  0x15   :  { %v99_v17 = vpack.c.bf16 %v25_v16, %v24_v15  ;;  %v27_v19 = vld [vmem:[%s5181_s0 + $0x58] sm:$0xff]  ;;  %v28_v21 = vld [vmem:[%s5181_s0 + $0x60] sm:$0xff]  ;;  %v29_v22 = vld [vmem:[%s5181_s0 + $0x68] sm:$0xff]  ;;  %v105_v32 = vshrl.u32 %v104_v31, 7 }
  0x16   :  { %v100_v20 = vpack.c.bf16 %v27_v19, %v26_v18  ;;  %v101_v23 = vpack.c.bf16 %v29_v22, %v28_v21  ;;  %v30_v24 = vld [vmem:[%s5181_s0 + $0x70] sm:$0xff]  ;;  %v31_v25 = vld [vmem:[%s5181_s0 + $0x78] sm:$0xff]  ;;  %v32_v27 = vld [vmem:[%s5181_s0 + $0x80] sm:$0xff] }
  0x17   :  { %v102_v26 = vpack.c.bf16 %v31_v25, %v30_v24  ;;  %v33_v28 = vld [vmem:[%s5181_s0 + $0x88] sm:$0xff]  ;;  %v3577_v30 = vld [vmem:[%s5182_s1 + $0x50] sm:$0xff]   ;;  %v4077_v33 = vsub.s32 0, %v105_v32  ;;  %v80_v34 = vld [vmem:[%s5183_s2] sm:$0xff] }
  0x18   :  { %v103_v29 = vpack.c.bf16 %v33_v28, %v32_v27  ;;  %3347 = vmatpush3.bf16.msra.mxu1 %v3577_v30  ;;  %v83_v35 = vld [vmem:[%s5183_s2 + $0x18] sm:$0xff]  ;;  %v84_v37 = vld [vmem:[%s5183_s2 + $0x20] sm:$0xff] }
  0x19   :  { %3319 = vmatmul.mubr.msk.bf16.gmra.mrb[8].mxu0 %vm120_vm1, %v97_v11  ;;  %3384 = vmatprep.subr.bf16.mxu1 %v3958_v1  ;;  %v4086_v36 = vrot.slane %v80_v34, %v4077_v33  ;;  %v4092_v38 = vrot.slane %v83_v35, %v4077_v33  ;;  %v4096_v41 = vrot.slane %v84_v37, %v4077_v33 }
  0x1a   :  { %3322 = vmatprep.mubr.msk.bf16.mxu0 %vm3959_vm0, %v3958_v1 }
  0x21   :  { %3323 = vmatmul.mubr.msk.bf16.gmra.mrb[12].mxu0 %vm120_vm1, %v98_v14 }
  0x22   :  { %3326 = vmatprep.mubr.msk.bf16.mxu0 %vm3959_vm0, %v3958_v1 }
  0x29   :  { %3327 = vmatmul.mubr.msk.bf16.gmra.mrb[16].mxu0 %vm120_vm1, %v99_v17 }
  0x2a   :  { %3330 = vmatprep.mubr.msk.bf16.mxu0 %vm3959_vm0, %v3958_v1 }
  0x31   :  { %3331 = vmatmul.mubr.msk.bf16.gmra.mrb[20].mxu0 %vm120_vm1, %v100_v20 }
  0x32   :  { %3334 = vmatprep.mubr.msk.bf16.mxu0 %vm3959_vm0, %v3958_v1 }
  0x39   :  { %3335 = vmatmul.mubr.msk.bf16.gmra.mrb[24].mxu0 %vm120_vm1, %v101_v23 }
  0x3a   :  { %3338 = vmatprep.mubr.msk.bf16.mxu0 %vm3959_vm0, %v3958_v1 }
  0x41   :  { %3339 = vmatmul.mubr.msk.bf16.gmra.mrb[28].mxu0 %vm120_vm1, %v102_v26 }
  0x42   :  { %3342 = vmatprep.mubr.msk.bf16.mxu0 %vm3959_vm0, %v3958_v1 }
  0x49   :  { %3343 = vmatmul.mubr.msk.bf16.gmra.mrb[32].mxu0 %vm120_vm1, %v103_v29 }
  0xdc   :  { %v182_v39 = vpop.f32.mrb[0].mxu0 }
  0xdd   :  { %v183_v40 = vadd.f32 %v182_v39, %v4086_v36  ;;  %v3312_v42 = vpop.f32.mrb[1].mxu0 }
  0xde   :  { %v185_v43 = vpop.f32.mrb[2].mxu0 }
  0xdf   :  { %v257_v44 = vmul.f32 %v4092_v38, %v183_v40  ;;  %v186_v45 = vadd.f32 %v185_v43, %v4086_v36  ;;  %v3313_v46 = vpop.f32.mrb[3].mxu0 }
  0xe1   :  { %v4101_v47 = vadd.f32 %v4096_v41, %v257_v44  ;;  %v258_v48 = vmul.f32 %v4092_v38, %v186_v45 }
  0xe3   :  { %v297_v49 = vand.u32 2147483647, %v4101_v47  ;;  %v4106_v50 = vadd.f32 %v4096_v41, %v258_v48  ;;  %vm369_vm2 = vcmp.ge.f32.partialorder %v4101_v47, 0.0 }
  0xe4   :  { %v190_v51 = vpop.f32.mrb[4].mxu0 }
  0xe5   :  { %v315_v52 = vsub.f32 0.0, %v297_v49  ;;  %v298_v53 = vand.u32 2147483647, %v4106_v50  ;;  %v191_v54 = vadd.f32 %v190_v51, %v4086_v36  ;;  %v3316_v55 = vpop.f32.mrb[5].mxu0  ;;  %vm370_vm3 = vcmp.ge.f32.partialorder %v4106_v50, 0.0 }
  0xe6   :  { %v193_v56 = vpop.f32.mrb[6].mxu0 }
  0xe7   :  { %v333_v57 = vmul.f32 1.442695, %v315_v52  ;;  %v316_v58 = vsub.f32 0.0, %v298_v53  ;;  %v259_v59 = vmul.f32 %v4092_v38, %v191_v54  ;;  %v194_v60 = vadd.f32 %v193_v56, %v4086_v36  ;;  %v3317_v61 = vpop.f32.mrb[7].mxu0 }
  0xe9   :  { %3598 = vpow2.f32 %v333_v57  ;;  %v335_v62 = vmul.f32 1.442695, %v316_v58  ;;  %v4113_v63 = vadd.f32 %v4096_v41, %v259_v59  ;;  %v260_v0 = vmul.f32 %v4092_v38, %v194_v60 }
  0xeb   :  { %3600 = vpow2.f32 %v335_v62  ;;  %v299_v2 = vand.u32 2147483647, %v4113_v63  ;;  %v4118_v3 = vadd.f32 %v4096_v41, %v260_v0  ;;  %vm371_vm4 = vcmp.ge.f32.partialorder %v4113_v63, 0.0 }
  0xec   :  { %v198_v4 = vpop.f32.mrb[8].mxu0 }
  0xed   :  { %v317_v5 = vsub.f32 0.0, %v299_v2  ;;  %v300_v6 = vand.u32 2147483647, %v4118_v3  ;;  %v199_v7 = vadd.f32 %v198_v4, %v4086_v36  ;;  %v3320_v8 = vpop.f32.mrb[9].mxu0  ;;  %vm372_vm5 = vcmp.ge.f32.partialorder %v4118_v3, 0.0 }
  0xee   :  { %v201_v9 = vpop.f32.mrb[10].mxu0 }
  0xef   :  { %v337_v10 = vmul.f32 1.442695, %v317_v5  ;;  %v318_v11 = vsub.f32 0.0, %v300_v6  ;;  %v261_v12 = vmul.f32 %v4092_v38, %v199_v7  ;;  %v202_v13 = vadd.f32 %v201_v9, %v4086_v36  ;;  %v3321_v14 = vpop.f32.mrb[11].mxu0 }
  0xf1   :  { %3602 = vpow2.f32 %v337_v10  ;;  %v339_v15 = vmul.f32 1.442695, %v318_v11  ;;  %v4125_v16 = vadd.f32 %v4096_v41, %v261_v12  ;;  %v262_v17 = vmul.f32 %v4092_v38, %v202_v13 }
  0xf3   :  { %v3599_v18 = vpop.eup %3598  ;;  %3604 = vpow2.f32 %v339_v15  ;;  %v301_v19 = vand.u32 2147483647, %v4125_v16  ;;  %v4130_v20 = vadd.f32 %v4096_v41, %v262_v17  ;;  %vm373_vm7 = vcmp.ge.f32.partialorder %v4125_v16, 0.0 }
  0xf4   :  { %v387_v21 = vmul.f32 2.0, %v3599_v18  ;;  %v423_v22 = vadd.f32 2.0, %v3599_v18  ;;  %v206_v23 = vpop.f32.mrb[12].mxu0 }
  0xf5   :  { %v3601_v24 = vpop.eup %3600  ;;  %v319_v25 = vsub.f32 0.0, %v301_v19  ;;  %v302_v26 = vand.u32 2147483647, %v4130_v20  ;;  %v207_v27 = vadd.f32 %v206_v23, %v4086_v36  ;;  %v3324_v28 = vpop.f32.mrb[13].mxu0  ;;  %vm374_vm8 = vcmp.ge.f32.partialorder %v4130_v20, 0.0 }
  0xf6   :  { %v405_v29 = vadd.f32 1.0, %v387_v21  ;;  %v441_v30 = vmul.f32 %v3599_v18, %v423_v22  ;;  %v477_v31 = vmul.f32 %v3599_v18, %v387_v21  ;;  %v388_v32 = vmul.f32 2.0, %v3601_v24  ;;  %v209_v34 = vpop.f32.mrb[14].mxu0 }
  0xf7   :  { %v424_v35 = vadd.f32 2.0, %v3601_v24  ;;  %v341_v37 = vmul.f32 1.442695, %v319_v25  ;;  %v320_v39 = vsub.f32 0.0, %v302_v26  ;;  %v263_v40 = vmul.f32 %v4092_v38, %v207_v27  ;;  %v3325_v42 = vpop.f32.mrb[15].mxu0 }
  0xf8   :  { %v406_v43 = vadd.f32 1.0, %v388_v32  ;;  %v478_v44 = vmul.f32 %v3601_v24, %v388_v32  ;;  %v4136_v45 = vsel %vm369_vm2, %v405_v29, %v441_v30  ;;  %v495_v48 = vsel %vm369_vm2, %v477_v31, 2.0 }
  0xf9   :  { %v442_v46 = vmul.f32 %v3601_v24, %v424_v35  ;;  %v343_v49 = vmul.f32 1.442695, %v320_v39  ;;  %v4140_v51 = vadd.f32 %v4096_v41, %v263_v40  ;;  %v210_v52 = vadd.f32 %v209_v34, %v4086_v36 }
  0xfa   :  { %v496_v55 = vsel %vm370_vm3, %v478_v44, 2.0  ;;  %3606 = vpow2.f32 %v341_v37  ;;  %v513_v60 = vadd.f32 %v495_v48, %v4136_v45 }
  0xfb   :  { %v3603_v53 = vpop.eup %3602  ;;  %v460_v54 = vsel %vm370_vm3, %v406_v43, %v442_v46  ;;  %3608 = vpow2.f32 %v343_v49  ;;  %v303_v61 = vand.u32 2147483647, %v4140_v51  ;;  %v264_v62 = vmul.f32 %v4092_v38, %v210_v52 }
  0xfc   :  { %v389_v56 = vmul.f32 2.0, %v3603_v53  ;;  %v425_v57 = vadd.f32 2.0, %v3603_v53  ;;  %v214_v58 = vpop.f32.mrb[16].mxu0  ;;  %v514_v2 = vadd.f32 %v496_v55, %v460_v54  ;;  %3610 = vrcp.f32 %v513_v60 }
  0xfd   :  { %v3605_v59 = vpop.eup %3604  ;;  %v3328_v0 = vpop.f32.mrb[17].mxu0  ;;  %v321_v8 = vsub.f32 0.0, %v303_v61  ;;  %v4147_v9 = vadd.f32 %v4096_v41, %v264_v62  ;;  %v215_v13 = vadd.f32 %v214_v58, %v4086_v36  ;;  %v531_v52 = vmul.f32 %v4136_v45, %v4101_v47 }
  0xfe   :  { %v407_v4 = vadd.f32 1.0, %v389_v56  ;;  %v217_v5 = vpop.f32.mrb[18].mxu0  ;;  %v443_v6 = vmul.f32 %v3603_v53, %v425_v57  ;;  %v479_v7 = vmul.f32 %v3603_v53, %v389_v56  ;;  %v390_v11 = vmul.f32 2.0, %v3605_v59 }
  0xff   :  { %v3329_v10 = vpop.f32.mrb[19].mxu0  ;;  %v426_v12 = vadd.f32 2.0, %v3605_v59  ;;  %v218_v14 = vadd.f32 %v217_v5, %v4086_v36  ;;  %3612 = vrcp.f32 %v514_v2  ;;  %v345_v15 = vmul.f32 1.442695, %v321_v8 }
 0x100   :  { %v304_v17 = vand.u32 2147483647, %v4147_v9  ;;  %v4153_v18 = vsel %vm371_vm4, %v407_v4, %v443_v6  ;;  %v265_v19 = vmul.f32 %v4092_v38, %v215_v13  ;;  %v497_v22 = vsel %vm371_vm4, %v479_v7, 2.0 }
 0x101   :  { %v266_v21 = vmul.f32 %v4092_v38, %v218_v14  ;;  %v408_v23 = vadd.f32 1.0, %v390_v11  ;;  %v444_v24 = vmul.f32 %v3605_v59, %v426_v12  ;;  %v480_v25 = vmul.f32 %v3605_v59, %v390_v11 }
 0x102   :  { %3614 = vpow2.f32 %v345_v15  ;;  %v322_v28 = vsub.f32 0.0, %v304_v17  ;;  %v4158_v29 = vadd.f32 %v4096_v41, %v265_v19  ;;  %v515_v35 = vadd.f32 %v497_v22, %v4153_v18 }
 0x103   :  { %v4161_v31 = vadd.f32 %v4096_v41, %v266_v21  ;;  %v4166_v42 = vsel %vm372_vm5, %v408_v23, %v444_v24  ;;  %v498_v43 = vsel %vm372_vm5, %v480_v25, 2.0  ;;  %v532_v53 = vmul.f32 %v460_v54, %v4106_v50  ;;  %v3578_v24 = vld [vmem:[%s5182_s1 + $0x68] sm:$0xff]  }
 0x104   :  { %v222_v26 = vpop.f32.mrb[20].mxu0  ;;  %v3607_v27 = vpop.eup %3606  ;;  %v347_v37 = vmul.f32 1.442695, %v322_v28  ;;  %v305_v39 = vand.u32 2147483647, %v4158_v29  ;;  %v516_v58 = vadd.f32 %v498_v43, %v4166_v42  ;;  %vm375_vm9 = vcmp.ge.f32.partialorder %v4140_v51, 0.0 }
 0x105   :  { %v3332_v30 = vpop.f32.mrb[21].mxu0  ;;  %v3609_v34 = vpop.eup %3608  ;;  %v391_v44 = vmul.f32 2.0, %v3607_v27  ;;  %v427_v46 = vadd.f32 2.0, %v3607_v27  ;;  %v306_v56 = vand.u32 2147483647, %v4161_v31  ;;  %v223_v60 = vadd.f32 %v222_v26, %v4086_v36 }
 0x106   :  { %v225_v32 = vpop.f32.mrb[22].mxu0  ;;  %v392_v48 = vmul.f32 2.0, %v3609_v34  ;;  %3616 = vpow2.f32 %v347_v37  ;;  %v323_v49 = vsub.f32 0.0, %v305_v39  ;;  %v428_v55 = vadd.f32 2.0, %v3609_v34  ;;  %v3611_v57 = vpop.eup %3610 }
 0x107   :  { %v3333_v40 = vpop.f32.mrb[23].mxu0  ;;  %3618 = vrcp.f32 %v515_v35  ;;  %v409_v62 = vadd.f32 1.0, %v391_v44  ;;  %v445_v0 = vmul.f32 %v3607_v27, %v427_v46  ;;  %v324_v2 = vsub.f32 0.0, %v306_v56 }
 0x108   :  { %v349_v59 = vmul.f32 1.442695, %v323_v49  ;;  %v226_v47 = vadd.f32 %v225_v32, %v4086_v36  ;;  %v481_v50 = vmul.f32 %v3607_v27, %v391_v44  ;;  %v410_v54 = vadd.f32 1.0, %v392_v48 }
 0x109   :  { %v3613_v61 = vpop.eup %3612  ;;  %v267_v4 = vmul.f32 %v4092_v38, %v223_v60  ;;  %v446_v6 = vmul.f32 %v3609_v34, %v428_v55  ;;  %v351_v7 = vmul.f32 1.442695, %v324_v2  ;;  %v4183_v14 = vmul.f32 %v3611_v57, %v531_v52 }
 0x10a   :  { %3620 = vpow2.f32 %v349_v59  ;;  %v268_v8 = vmul.f32 %v4092_v38, %v226_v47  ;;  %v4185_v15 = vmul.f32 %v3613_v61, %v532_v53  ;;  %v482_v25 = vmul.f32 %v3609_v34, %v392_v48 }
 0x10b   :  { %v4181_v13 = vadd.f32 %v4096_v41, %v267_v4  ;;  %3622 = vpow2.f32 %v351_v7  ;;  %v4200_v30 = vsel %vm373_vm7, %v409_v62, %v445_v0  ;;  %v499_v32 = vsel %vm373_vm7, %v481_v50, 2.0 }
 0x10c   :  { %v230_v45 = vpop.f32.mrb[24].mxu0  ;;  %v3615_v12 = vpop.eup %3614  ;;  %v4189_v23 = vadd.f32 %v4096_v41, %v268_v8  ;;  %v585_v28 = vpack.c.bf16 %v4185_v15, %v4183_v14  ;;  %3624 = vrcp.f32 %v516_v58  ;;  %v4207_v34 = vsel %vm374_vm8, %v410_v54, %v446_v6 }
 0x10d   :  { %v3336_v5 = vpop.f32.mrb[25].mxu0  ;;  %v231_v10 = vadd.f32 %v230_v45, %v4086_v36  ;;  %v393_v21 = vmul.f32 2.0, %v3615_v12  ;;  %v429_v22 = vadd.f32 2.0, %v3615_v12  ;;  %v307_v26 = vand.u32 2147483647, %v4181_v13 }
 0x10e   :  { %v233_v11 = vpop.f32.mrb[26].mxu0  ;;  %v308_v35 = vand.u32 2147483647, %v4189_v23  ;;  %3349 = vmatmul.mubr.msk.bf16.vlgmr.msra.gmra.mrb[0].mxu1 %vm604_vm6, %v585_v28  ;;  %v500_v55 = vsel %vm374_vm8, %v482_v25, 2.0  ;;  %vm376_vm10 = vcmp.ge.f32.partialorder %v4147_v9, 0.0  ;;  %v517_v54 = vadd.f32 %v499_v32, %v4200_v30 }
 0x10f   :  { %v234_v17 = vadd.f32 %v233_v11, %v4086_v36  ;;  %v3337_v19 = vpop.f32.mrb[27].mxu0  ;;  %v269_v27 = vmul.f32 %v4092_v38, %v231_v10  ;;  %v411_v39 = vadd.f32 1.0, %v393_v21  ;;  %v325_v40 = vsub.f32 0.0, %v307_v26  ;;  %3352 = vmatprep.mubr.msk.bf16.mxu1 %vm3959_vm0, %v3958_v1  ;;  %3385 = vmatpush3.bf16.msra.mxu1 %v3578_v24 }
 0x110   :  { %v3617_v37 = vpop.eup %3616  ;;  %v447_v44 = vmul.f32 %v3615_v12, %v429_v22  ;;  %v483_v56 = vmul.f32 %v3615_v12, %v393_v21  ;;  %v326_v58 = vsub.f32 0.0, %v308_v35  ;;  %v518_v4 = vadd.f32 %v500_v55, %v4207_v34 }
 0x111   :  { %v4210_v43 = vadd.f32 %v4096_v41, %v269_v27  ;;  %v394_v46 = vmul.f32 2.0, %v3617_v37  ;;  %v430_v48 = vadd.f32 2.0, %v3617_v37  ;;  %v270_v49 = vmul.f32 %v4092_v38, %v234_v17  ;;  %v3619_v53 = vpop.eup %3618 }
 0x112   :  { %v353_v57 = vmul.f32 1.442695, %v325_v40  ;;  %v355_v45 = vmul.f32 1.442695, %v326_v58  ;;  %v4223_v5 = vsel %vm375_vm9, %v411_v39, %v447_v44  ;;  %v501_v7 = vsel %vm375_vm9, %v483_v56, 2.0 }
 0x113   :  { %v412_v60 = vadd.f32 1.0, %v394_v46  ;;  %v448_v61 = vmul.f32 %v3617_v37, %v430_v48  ;;  %v484_v62 = vmul.f32 %v3617_v37, %v394_v46  ;;  %v309_v0 = vand.u32 2147483647, %v4210_v43 }
 0x114   :  { %v238_v52 = vpop.f32.mrb[28].mxu0  ;;  %v3621_v47 = vpop.eup %3620  ;;  %v4226_v6 = vadd.f32 %v4096_v41, %v270_v49  ;;  %3626 = vpow2.f32 %v353_v57  ;;  %v533_v21 = vmul.f32 %v4153_v18, %v4113_v63  ;;  %v534_v22 = vmul.f32 %v4166_v42, %v4118_v3 }
 0x115   :  { %v3340_v59 = vpop.f32.mrb[29].mxu0  ;;  %v395_v8 = vmul.f32 2.0, %v3621_v47  ;;  %v327_v10 = vsub.f32 0.0, %v309_v0  ;;  %v3623_v11 = vpop.eup %3622  ;;  %v4228_v12 = vsel %vm376_vm10, %v412_v60, %v448_v61  ;;  %v502_v17 = vsel %vm376_vm10, %v484_v62, 2.0 }
 0x116   :  { %v241_v2 = vpop.f32.mrb[30].mxu0  ;;  %v431_v19 = vadd.f32 2.0, %v3621_v47  ;;  %3628 = vpow2.f32 %v355_v45  ;;  %v396_v24 = vmul.f32 2.0, %v3623_v11  ;;  %v3625_v26 = vpop.eup %3624  ;;  %vm377_vm11 = vcmp.ge.f32.partialorder %v4158_v29, 0.0 }
 0x117   :  { %v3341_v50 = vpop.f32.mrb[31].mxu0  ;;  %v357_v25 = vmul.f32 1.442695, %v327_v10  ;;  %3630 = vrcp.f32 %v517_v54  ;;  %v432_v27 = vadd.f32 2.0, %v3623_v11  ;;  %v310_v28 = vand.u32 2147483647, %v4226_v6 }
 0x118   :  { %3632 = vrcp.f32 %v518_v4  ;;  %v519_v35 = vadd.f32 %v501_v7, %v4223_v5  ;;  %v520_v37 = vadd.f32 %v502_v17, %v4228_v12  ;;  %v413_v39 = vadd.f32 1.0, %v395_v8 }
 0x119   :  { %v449_v18 = vmul.f32 %v3621_v47, %v431_v19  ;;  %v485_v40 = vmul.f32 %v3621_v47, %v395_v8  ;;  %v328_v3 = vsub.f32 0.0, %v310_v28  ;;  %v239_v42 = vadd.f32 %v238_v52, %v4086_v36 }
 0x11a   :  { %v414_v46 = vadd.f32 1.0, %v396_v24  ;;  %3634 = vpow2.f32 %v357_v25  ;;  %v4239_v48 = vmul.f32 %v3619_v53, %v533_v21  ;;  %v4241_v49 = vmul.f32 %v3625_v26, %v534_v22 }
 0x11b   :  { %v450_v56 = vmul.f32 %v3623_v11, %v432_v27  ;;  %v486_v57 = vmul.f32 %v3623_v11, %v396_v24  ;;  %v359_v58 = vmul.f32 1.442695, %v328_v3  ;;  %v271_v59 = vmul.f32 %v4092_v38, %v239_v42 }
 0x11c   :  { %v246_v32 = vpop.f32.mrb[32].mxu0  ;;  %v535_v60 = vmul.f32 %v4200_v30, %v4125_v16  ;;  %v586_v61 = vpack.c.bf16 %v4241_v49, %v4239_v48  ;;  %v242_v52 = vadd.f32 %v241_v2, %v4086_v36  ;;  %v4252_v53 = vsel %vm377_vm11, %v413_v39, %v449_v18 }
 0x11d   :  { %v3344_v63 = vpop.f32.mrb[33].mxu0  ;;  %v247_v62 = vadd.f32 %v246_v32, %v4086_v36  ;;  %v503_v0 = vsel %vm377_vm11, %v485_v40, 2.0  ;;  %3636 = vpow2.f32 %v359_v58  ;;  %v4257_v47 = vadd.f32 %v4096_v41, %v271_v59 }
 0x11e   :  { %v249_v44 = vpop.f32.mrb[34].mxu0  ;;  %v3627_v45 = vpop.eup %3626  ;;  %3638 = vrcp.f32 %v519_v35  ;;  %vm378_vm12 = vcmp.ge.f32.partialorder %v4161_v31, 0.0  ;;  %3353 = vmatmul.mubr.msk.bf16.gmra.mrb[4].mxu1 %vm604_vm6, %v586_v61  ;;  %v272_v16 = vmul.f32 %v4092_v38, %v242_v52  ;;  %v521_v7 = vadd.f32 %v503_v0, %v4252_v53 }
 0x11f   :  { %v3345_v55 = vpop.f32.mrb[35].mxu0  ;;  %v273_v30 = vmul.f32 %v4092_v38, %v247_v62  ;;  %3640 = vrcp.f32 %v520_v37  ;;  %v4263_v50 = vsel %vm378_vm12, %v414_v46, %v450_v56  ;;  %v504_v54 = vsel %vm378_vm12, %v486_v57, 2.0  ;;  %3356 = vmatprep.mubr.msk.bf16.mxu1 %vm3959_vm0, %v3958_v1 }
 0x120   :  { %v3629_v2 = vpop.eup %3628  ;;  %v311_v4 = vand.u32 2147483647, %v4257_v47  ;;  %v4270_v11 = vadd.f32 %v4096_v41, %v272_v16  ;;  %v536_v19 = vmul.f32 %v4207_v34, %v4130_v20  ;;  %v397_v21 = vmul.f32 2.0, %v3627_v45 }
 0x121   :  { %v398_v8 = vmul.f32 2.0, %v3629_v2  ;;  %v434_v10 = vadd.f32 2.0, %v3629_v2  ;;  %v3631_v17 = vpop.eup %3630  ;;  %v433_v22 = vadd.f32 2.0, %v3627_v45  ;;  %v522_v26 = vadd.f32 %v504_v54, %v4263_v50 }
 0x122   :  { %v329_v24 = vsub.f32 0.0, %v311_v4  ;;  %v3633_v25 = vpop.eup %3632  ;;  %vm379_vm13 = vcmp.ge.f32.partialorder %v4181_v13, 0.0  ;;  %v312_v27 = vand.u32 2147483647, %v4270_v11  ;;  %v4278_v28 = vadd.f32 %v4096_v41, %v273_v30 }
 0x123   :  { %vm380_vm14 = vcmp.ge.f32.partialorder %v4189_v23, 0.0  ;;  %v416_v32 = vadd.f32 1.0, %v398_v8  ;;  %v452_v35 = vmul.f32 %v3629_v2, %v434_v10  ;;  %v488_v37 = vmul.f32 %v3629_v2, %v398_v8 }
 0x124   :  { %v3635_v39 = vpop.eup %3634  ;;  %v537_v20 = vmul.f32 %v4223_v5, %v4140_v51  ;;  %3642 = vrcp.f32 %v521_v7  ;;  %v361_v34 = vmul.f32 1.442695, %v329_v24  ;;  %v4283_v63 = vmul.f32 %v3631_v17, %v535_v60 }
 0x125   :  { %v415_v18 = vadd.f32 1.0, %v397_v21  ;;  %v451_v40 = vmul.f32 %v3627_v45, %v433_v22  ;;  %v487_v3 = vmul.f32 %v3627_v45, %v397_v21  ;;  %v4285_v42 = vmul.f32 %v3633_v25, %v536_v19 }
 0x126   :  { %3644 = vrcp.f32 %v522_v26  ;;  %v330_v46 = vsub.f32 0.0, %v312_v27  ;;  %v313_v55 = vand.u32 2147483647, %v4278_v28  ;;  %v250_v56 = vadd.f32 %v249_v44, %v4086_v36 }
 0x127   :  { %v3637_v57 = vpop.eup %3636  ;;  %v4291_v58 = vsel %vm380_vm14, %v416_v32, %v452_v35  ;;  %v506_v51 = vsel %vm380_vm14, %v488_v37, 2.0  ;;  %v399_v5 = vmul.f32 2.0, %v3635_v39  ;;  %v435_v59 = vadd.f32 2.0, %v3635_v39 }
 0x128   :  { %v3639_v60 = vpop.eup %3638  ;;  %v400_v61 = vmul.f32 2.0, %v3637_v57  ;;  %v436_v52 = vadd.f32 2.0, %v3637_v57  ;;  %3646 = vpow2.f32 %v361_v34  ;;  %v363_v62 = vmul.f32 1.442695, %v330_v46 }
 0x129   :  { %v3641_v0 = vpop.eup %3640  ;;  %v4297_v45 = vsel %vm379_vm13, %v415_v18, %v451_v40  ;;  %v505_v36 = vsel %vm379_vm13, %v487_v3, 2.0  ;;  %v331_v44 = vsub.f32 0.0, %v313_v55  ;;  %v587_v16 = vpack.c.bf16 %v4285_v42, %v4283_v63 }
 0x12a   :  { %v538_v30 = vmul.f32 %v4228_v12, %v4147_v9  ;;  %v524_v2 = vadd.f32 %v506_v51, %v4291_v58  ;;  %v418_v54 = vadd.f32 1.0, %v400_v61  ;;  %v454_v4 = vmul.f32 %v3637_v57, %v436_v52 }
 0x12b   :  { %v490_v7 = vmul.f32 %v3637_v57, %v400_v61  ;;  %3648 = vpow2.f32 %v363_v62  ;;  %v365_v8 = vmul.f32 1.442695, %v331_v44  ;;  %3357 = vmatmul.mubr.msk.bf16.gmra.mrb[8].mxu1 %vm604_vm6, %v587_v16  ;;  %v274_v10 = vmul.f32 %v4092_v38, %v250_v56 }
 0x12c   :  { %v523_v17 = vadd.f32 %v505_v36, %v4297_v45  ;;  %v417_v19 = vadd.f32 1.0, %v399_v5  ;;  %v453_v21 = vmul.f32 %v3635_v39, %v435_v59  ;;  %3360 = vmatprep.mubr.msk.bf16.mxu1 %vm3959_vm0, %v3958_v1  ;;  %v4311_v22 = vmul.f32 %v3641_v0, %v538_v30 }
 0x12d   :  { %v489_v9 = vmul.f32 %v3635_v39, %v399_v5  ;;  %3650 = vpow2.f32 %v365_v8  ;;  %v4314_v12 = vadd.f32 %v4096_v41, %v274_v10  ;;  %v4316_v24 = vmul.f32 %v3639_v60, %v537_v20 }
 0x12e   :  { %v3643_v25 = vpop.eup %3642  ;;  %3652 = vrcp.f32 %v524_v2  ;;  %vm382_vm15 = vcmp.ge.f32.partialorder %v4226_v6, 0.0  ;;  %vm381_vm2 = vcmp.ge.f32.partialorder %v4210_v43, 0.0  ;;  %v540_v39 = vmul.f32 %v4263_v50, %v4161_v31 }
 0x12f   :  { %v4319_v26 = vsel %vm382_vm15, %v418_v54, %v454_v4  ;;  %v508_v27 = vsel %vm382_vm15, %v490_v7, 2.0  ;;  %v314_v32 = vand.u32 2147483647, %v4314_v12  ;;  %v588_v35 = vpack.c.bf16 %v4311_v22, %v4316_v24 }
 0x130   :  { %v3645_v37 = vpop.eup %3644  ;;  %3654 = vrcp.f32 %v523_v17  ;;  %v4327_v20 = vsel %vm381_vm2, %v417_v19, %v453_v21  ;;  %v507_v34 = vsel %vm381_vm2, %v489_v9, 2.0  ;;  %v539_v3 = vmul.f32 %v4252_v53, %v4158_v29 }
 0x131   :  { %v332_v18 = vsub.f32 0.0, %v314_v32  ;;  %v526_v46 = vadd.f32 %v508_v27, %v4319_v26  ;;  %v4333_v51 = vmul.f32 %v3645_v37, %v540_v39  ;;  %v525_v5 = vadd.f32 %v507_v34, %v4327_v20 }
 0x132   :  { %v3647_v40 = vpop.eup %3646  ;;  %v4338_v31 = vmul.f32 %v3643_v25, %v539_v3  ;;  %v542_v62 = vmul.f32 %v4291_v58, %v4189_v23  ;;  %vm383_vm3 = vcmp.ge.f32.partialorder %v4257_v47, 0.0  ;;  %vm384_vm4 = vcmp.ge.f32.partialorder %v4270_v11, 0.0 }
 0x133   :  { %v401_v55 = vmul.f32 2.0, %v3647_v40  ;;  %v437_v56 = vadd.f32 2.0, %v3647_v40  ;;  %v367_v57 = vmul.f32 1.442695, %v332_v18  ;;  %3361 = vmatmul.mubr.msk.bf16.gmra.mrb[12].mxu1 %vm604_vm6, %v588_v35  ;;  %v541_v23 = vmul.f32 %v4297_v45, %v4181_v13 }
 0x134   :  { %3364 = vmatprep.mubr.msk.bf16.mxu1 %vm3959_vm0, %v3958_v1  ;;  %v589_v0 = vpack.c.bf16 %v4333_v51, %v4338_v31  ;;  %vm385_vm5 = vcmp.ge.f32.partialorder %v4278_v28, 0.0  ;;  %v544_v34 = vmul.f32 %v4319_v26, %v4226_v6  ;;  %vm386_vm7 = vcmp.ge.f32.partialorder %v4314_v12, 0.0 }
 0x135   :  { %v3649_v50 = vpop.eup %3648  ;;  %v419_v59 = vadd.f32 1.0, %v401_v55  ;;  %v455_v60 = vmul.f32 %v3647_v40, %v437_v56  ;;  %v491_v29 = vmul.f32 %v3647_v40, %v401_v55  ;;  %3656 = vpow2.f32 %v367_v57 }
 0x136   :  { %3658 = vrcp.f32 %v526_v46  ;;  %v402_v53 = vmul.f32 2.0, %v3649_v50  ;;  %v438_v61 = vadd.f32 2.0, %v3649_v50  ;;  %v543_v57 = vmul.f32 %v4327_v20, %v4210_v43 }
 0x137   :  { %v3651_v52 = vpop.eup %3650  ;;  %3660 = vrcp.f32 %v525_v5  ;;  %v473_v44 = vsel %vm383_vm3, %v419_v59, %v455_v60  ;;  %v509_v2 = vsel %vm383_vm3, %v491_v29, 2.0 }
 0x138   :  { %v3653_v36 = vpop.eup %3652  ;;  %v420_v16 = vadd.f32 1.0, %v402_v53  ;;  %v456_v30 = vmul.f32 %v3649_v50, %v438_v61  ;;  %v492_v54 = vmul.f32 %v3649_v50, %v402_v53  ;;  %v403_v4 = vmul.f32 2.0, %v3651_v52 }
 0x139   :  { %v439_v7 = vadd.f32 2.0, %v3651_v52  ;;  %v4349_v17 = vmul.f32 %v3653_v36, %v542_v62  ;;  %v527_v19 = vadd.f32 %v509_v2, %v473_v44  ;;  %v545_v61 = vmul.f32 %v473_v44, %v4257_v47 }
 0x13a   :  { %v3655_v8 = vpop.eup %3654  ;;  %v474_v10 = vsel %vm384_vm4, %v420_v16, %v456_v30  ;;  %v510_v58 = vsel %vm384_vm4, %v492_v54, 2.0  ;;  %v421_v9 = vadd.f32 1.0, %v403_v4  ;;  %v493_v27 = vmul.f32 %v3651_v52, %v403_v4 }
 0x13b   :  { %3365 = vmatmul.mubr.msk.bf16.gmra.mrb[16].mxu1 %vm604_vm6, %v589_v0  ;;  %v528_v21 = vadd.f32 %v510_v58, %v474_v10  ;;  %v457_v25 = vmul.f32 %v3651_v52, %v439_v7  ;;  %v4353_v32 = vmul.f32 %v3655_v8, %v541_v23  ;;  %v546_v43 = vmul.f32 %v474_v10, %v4270_v11 }
 0x13c   :  { %3368 = vmatprep.mubr.msk.bf16.mxu1 %vm3959_vm0, %v3958_v1  ;;  %v511_v40 = vsel %vm385_vm5, %v493_v27, 2.0 }
 0x13d   :  { %3662 = vrcp.f32 %v528_v21  ;;  %v590_v13 = vpack.c.bf16 %v4349_v17, %v4353_v32  ;;  %v475_v18 = vsel %vm385_vm5, %v421_v9, %v457_v25 }
 0x13e   :  { %3664 = vrcp.f32 %v527_v19  ;;  %v529_v50 = vadd.f32 %v511_v40, %v475_v18  ;;  %v547_v11 = vmul.f32 %v475_v18, %v4278_v28  ;;  %v85_v28 = vld [vmem:[%s5183_s2 + $0x28] sm:$0xff] }
 0x13f   :  { %v3657_v35 = vpop.eup %3656 }
 0x140   :  { %v3659_v45 = vpop.eup %3658  ;;  %v404_v37 = vmul.f32 2.0, %v3657_v35  ;;  %v440_v39 = vadd.f32 2.0, %v3657_v35 }
 0x141   :  { %v3661_v3 = vpop.eup %3660  ;;  %v4364_v5 = vmul.f32 %v3659_v45, %v544_v34 }
 0x142   :  { %v422_v46 = vadd.f32 1.0, %v404_v37  ;;  %v458_v55 = vmul.f32 %v3657_v35, %v440_v39  ;;  %v494_v56 = vmul.f32 %v3657_v35, %v404_v37  ;;  %v4368_v26 = vmul.f32 %v3661_v3, %v543_v57 }
 0x143   :  { %3369 = vmatmul.mubr.msk.bf16.gmra.mrb[20].mxu1 %vm604_vm6, %v590_v13 }
 0x144   :  { %v476_v59 = vsel %vm386_vm7, %v422_v46, %v458_v55  ;;  %v512_v60 = vsel %vm386_vm7, %v494_v56, 2.0  ;;  %3372 = vmatprep.mubr.msk.bf16.mxu1 %vm3959_vm0, %v3958_v1  ;;  %v591_v29 = vpack.c.bf16 %v4364_v5, %v4368_v26 }
 0x145   :  { %v530_v6 = vadd.f32 %v512_v60, %v476_v59  ;;  %v548_v16 = vmul.f32 %v476_v59, %v4314_v12  ;;  %v4401_v12 = vrot.slane %v85_v28, %v4077_v33 }
 0x147   :  { %3666 = vrcp.f32 %v530_v6  ;;  %v3663_v53 = vpop.eup %3662 }
 0x148   :  { %3668 = vrcp.f32 %v529_v50  ;;  %v3665_v20 = vpop.eup %3664  ;;  %v4375_v52 = vmul.f32 %v3663_v53, %v546_v43 }
 0x149   :  { %v4379_v62 = vmul.f32 %v3665_v20, %v545_v61 }
 0x14b   :  { %3373 = vmatmul.mubr.msk.bf16.gmra.mrb[24].mxu1 %vm604_vm6, %v591_v29  ;;  %v592_v0 = vpack.c.bf16 %v4375_v52, %v4379_v62 }
 0x14c   :  { %3376 = vmatprep.mubr.msk.bf16.mxu1 %vm3959_vm0, %v3958_v1 }
 0x151   :  { %v3667_v36 = vpop.eup %3666 }
 0x152   :  { %v3669_v30 = vpop.eup %3668  ;;  %v4386_v47 = vmul.f32 %v3667_v36, %v548_v16 }
 0x153   :  { %3377 = vmatmul.mubr.msk.bf16.gmra.mrb[28].mxu1 %vm604_vm6, %v592_v0  ;;  %v4390_v44 = vmul.f32 %v3669_v30, %v547_v11 }
 0x154   :  { %3380 = vmatprep.mubr.msk.bf16.mxu1 %vm3959_vm0, %v3958_v1 }
 0x155   :  { %v593_v2 = vpack.c.bf16 %v4386_v47, %v4390_v44 }
 0x15b   :  { %3381 = vmatmul.mubr.msk.bf16.gmra.mrb[32].mxu1 %vm604_vm6, %v593_v2 }
 0x15c   :  { %3386 = vmatprep.mubr.msk.bf16.mxu1 %vm3959_vm0, %v3958_v1 }
 0x1e1   :  { %v666_v54 = vpop.f32.mrb[0].mxu1 }
 0x1e2   :  { %v4404_v4 = vadd.f32 %v666_v54, %v4401_v12  ;;  %v3350_v7 = vpop.f32.mrb[1].mxu1 }
 0x1e3   :  { %v669_v8 = vpop.f32.mrb[2].mxu1 }
 0x1e4   :  { %v737_v10 = vand.u32 2147483647, %v4404_v4  ;;  %v4408_v23 = vadd.f32 %v669_v8, %v4401_v12  ;;  %v3351_v58 = vpop.f32.mrb[3].mxu1  ;;  %vm809_vm8 = vcmp.ge.f32.partialorder %v4404_v4, 0.0 }
 0x1e6   :  { %v755_v19 = vsub.f32 0.0, %v737_v10  ;;  %v738_v21 = vand.u32 2147483647, %v4408_v23  ;;  %vm810_vm9 = vcmp.ge.f32.partialorder %v4408_v23, 0.0 }
 0x1e8   :  { %v773_v9 = vmul.f32 1.442695, %v755_v19  ;;  %v756_v25 = vsub.f32 0.0, %v738_v21 }
 0x1ea   :  { %3670 = vpow2.f32 %v773_v9  ;;  %v775_v27 = vmul.f32 1.442695, %v756_v25 }
 0x1ec   :  { %3672 = vpow2.f32 %v775_v27 }
 0x1f1   :  { %v674_v35 = vpop.f32.mrb[4].mxu1 }
 0x1f2   :  { %v4412_v13 = vadd.f32 %v674_v35, %v4401_v12  ;;  %v3354_v45 = vpop.f32.mrb[5].mxu1 }
 0x1f3   :  { %v677_v37 = vpop.f32.mrb[6].mxu1 }
 0x1f4   :  { %v3671_v39 = vpop.eup %3670  ;;  %v739_v34 = vand.u32 2147483647, %v4412_v13  ;;  %v4416_v18 = vadd.f32 %v677_v37, %v4401_v12  ;;  %v3355_v40 = vpop.f32.mrb[7].mxu1  ;;  %vm811_vm10 = vcmp.ge.f32.partialorder %v4412_v13, 0.0 }
 0x1f5   :  { %v827_v3 = vmul.f32 2.0, %v3671_v39  ;;  %v863_v46 = vadd.f32 2.0, %v3671_v39 }
 0x1f6   :  { %v3673_v55 = vpop.eup %3672  ;;  %v757_v56 = vsub.f32 0.0, %v739_v34  ;;  %v740_v57 = vand.u32 2147483647, %v4416_v18  ;;  %vm812_vm11 = vcmp.ge.f32.partialorder %v4416_v18, 0.0 }
 0x1f7   :  { %v845_v50 = vadd.f32 1.0, %v827_v3  ;;  %v881_v59 = vmul.f32 %v3671_v39, %v863_v46  ;;  %v917_v60 = vmul.f32 %v3671_v39, %v827_v3  ;;  %v828_v6 = vmul.f32 2.0, %v3673_v55 }
 0x1f8   :  { %v864_v29 = vadd.f32 2.0, %v3673_v55  ;;  %v777_v53 = vmul.f32 1.442695, %v757_v56  ;;  %v758_v43 = vsub.f32 0.0, %v740_v57 }
 0x1f9   :  { %v899_v20 = vsel %vm809_vm8, %v845_v50, %v881_v59  ;;  %v935_v61 = vsel %vm809_vm8, %v917_v60, 2.0  ;;  %v846_v0 = vadd.f32 1.0, %v828_v6  ;;  %v918_v36 = vmul.f32 %v3673_v55, %v828_v6 }
 0x1fa   :  { %v953_v16 = vadd.f32 %v935_v61, %v899_v20  ;;  %v882_v30 = vmul.f32 %v3673_v55, %v864_v29  ;;  %3674 = vpow2.f32 %v777_v53  ;;  %v779_v2 = vmul.f32 1.442695, %v758_v43 }
 0x1fb   :  { %v936_v11 = vsel %vm810_vm9, %v918_v36, 2.0  ;;  %v971_v55 = vmul.f32 %v899_v20, %v4404_v4 }
 0x1fc   :  { %3676 = vrcp.f32 %v953_v16  ;;  %v900_v28 = vsel %vm810_vm9, %v846_v0, %v882_v30 }
 0x1fd   :  { %v954_v54 = vadd.f32 %v936_v11, %v900_v28  ;;  %3678 = vpow2.f32 %v779_v2  ;;  %v972_v56 = vmul.f32 %v900_v28, %v4408_v23 }
 0x1fe   :  { %v682_v7 = vpop.f32.mrb[8].mxu1 }
 0x1ff   :  { %3680 = vrcp.f32 %v954_v54  ;;  %v4422_v8 = vadd.f32 %v682_v7, %v4401_v12  ;;  %v3358_v10 = vpop.f32.mrb[9].mxu1 }
 0x200   :  { %v685_v58 = vpop.f32.mrb[10].mxu1 }
 0x201   :  { %v741_v19 = vand.u32 2147483647, %v4422_v8  ;;  %v4426_v21 = vadd.f32 %v685_v58, %v4401_v12  ;;  %v3359_v9 = vpop.f32.mrb[11].mxu1  ;;  %vm813_vm12 = vcmp.ge.f32.partialorder %v4422_v8, 0.0 }
 0x203   :  { %v759_v25 = vsub.f32 0.0, %v741_v19  ;;  %v742_v27 = vand.u32 2147483647, %v4426_v21  ;;  %vm814_vm13 = vcmp.ge.f32.partialorder %v4426_v21, 0.0 }
 0x204   :  { %v3675_v35 = vpop.eup %3674 }
 0x205   :  { %v829_v45 = vmul.f32 2.0, %v3675_v35  ;;  %v865_v37 = vadd.f32 2.0, %v3675_v35  ;;  %v781_v39 = vmul.f32 1.442695, %v759_v25  ;;  %v760_v34 = vsub.f32 0.0, %v742_v27 }
 0x206   :  { %v3677_v40 = vpop.eup %3676  ;;  %v690_v3 = vpop.f32.mrb[12].mxu1 }
 0x207   :  { %v3679_v46 = vpop.eup %3678  ;;  %v847_v57 = vadd.f32 1.0, %v829_v45  ;;  %v3362_v50 = vpop.f32.mrb[13].mxu1  ;;  %3682 = vpow2.f32 %v781_v39  ;;  %v783_v6 = vmul.f32 1.442695, %v760_v34  ;;  %v883_v43 = vmul.f32 %v3675_v35, %v865_v37 }
 0x208   :  { %v830_v59 = vmul.f32 2.0, %v3679_v46  ;;  %v866_v60 = vadd.f32 2.0, %v3679_v46  ;;  %v693_v29 = vpop.f32.mrb[14].mxu1  ;;  %v919_v61 = vmul.f32 %v3675_v35, %v829_v45  ;;  %v4432_v0 = vadd.f32 %v690_v3, %v4401_v12 }
 0x209   :  { %v3681_v53 = vpop.eup %3680  ;;  %v4435_v36 = vadd.f32 %v693_v29, %v4401_v12  ;;  %v3363_v16 = vpop.f32.mrb[15].mxu1  ;;  %v1007_v4 = vmul.f32 %v3677_v40, %v971_v55  ;;  %3684 = vpow2.f32 %v783_v6  ;;  %v901_v54 = vsel %vm811_vm10, %v847_v57, %v883_v43 }
 0x20a   :  { %v1008_v20 = vmul.f32 %v3681_v53, %v972_v56  ;;  %v743_v23 = vand.u32 2147483647, %v4432_v0  ;;  %v848_v11 = vadd.f32 1.0, %v830_v59  ;;  %v884_v2 = vmul.f32 %v3679_v46, %v866_v60 }
 0x20b   :  { %v744_v28 = vand.u32 2147483647, %v4435_v36  ;;  %v937_v7 = vsel %vm811_vm10, %v919_v61, 2.0  ;;  %v920_v10 = vmul.f32 %v3679_v46, %v830_v59  ;;  %vm815_vm14 = vcmp.ge.f32.partialorder %v4432_v0, 0.0 }
 0x20c   :  { %v1025_v30 = vpack.c.bf16 %v1008_v20, %v1007_v4  ;;  %v761_v58 = vsub.f32 0.0, %v743_v23  ;;  %v955_v45 = vadd.f32 %v937_v7, %v901_v54  ;;  %v902_v37 = vsel %vm812_vm11, %v848_v11, %v884_v2 }
 0x20d   :  { %v762_v19 = vsub.f32 0.0, %v744_v28  ;;  %v938_v40 = vsel %vm812_vm11, %v920_v10, 2.0  ;;  %vm816_vm15 = vcmp.ge.f32.partialorder %v4435_v36, 0.0 }
 0x20e   :  { %v698_v9 = vpop.f32.mrb[16].mxu1  ;;  %3387 = vmatmul.mubr.msk.bf16.vlgmr.msra.gmra.mrb[36].mxu1 %vm604_vm6, %v1025_v30  ;;  %v785_v25 = vmul.f32 1.442695, %v761_v58  ;;  %v956_v6 = vadd.f32 %v938_v40, %v902_v37 }
 0x20f   :  { %v4443_v27 = vadd.f32 %v698_v9, %v4401_v12  ;;  %v3366_v35 = vpop.f32.mrb[17].mxu1  ;;  %3390 = vmatprep.mubr.msk.bf16.mxu1 %vm3959_vm0, %v3958_v1  ;;  %v787_v39 = vmul.f32 1.442695, %v762_v19 }
 0x210   :  { %v701_v34 = vpop.f32.mrb[18].mxu1  ;;  %3686 = vpow2.f32 %v785_v25 }
 0x211   :  { %v745_v3 = vand.u32 2147483647, %v4443_v27  ;;  %v4449_v46 = vadd.f32 %v701_v34, %v4401_v12  ;;  %v3367_v55 = vpop.f32.mrb[19].mxu1  ;;  %v3683_v56 = vpop.eup %3682  ;;  %3688 = vpow2.f32 %v787_v39  ;;  %v973_v34 = vmul.f32 %v901_v54, %v4412_v13 }
 0x212   :  { %v831_v57 = vmul.f32 2.0, %v3683_v56  ;;  %v867_v50 = vadd.f32 2.0, %v3683_v56  ;;  %3690 = vrcp.f32 %v955_v45  ;;  %v974_v13 = vmul.f32 %v902_v37, %v4416_v18 }
 0x213   :  { %v763_v59 = vsub.f32 0.0, %v745_v3  ;;  %v746_v60 = vand.u32 2147483647, %v4449_v46  ;;  %v3685_v29 = vpop.eup %3684  ;;  %vm817_vm2 = vcmp.ge.f32.partialorder %v4443_v27, 0.0  ;;  %vm818_vm3 = vcmp.ge.f32.partialorder %v4449_v46, 0.0 }
 0x214   :  { %v849_v53 = vadd.f32 1.0, %v831_v57  ;;  %v885_v43 = vmul.f32 %v3683_v56, %v867_v50  ;;  %v921_v61 = vmul.f32 %v3683_v56, %v831_v57  ;;  %v832_v4 = vmul.f32 2.0, %v3685_v29 }
 0x215   :  { %v789_v16 = vmul.f32 1.442695, %v763_v59  ;;  %v868_v20 = vadd.f32 2.0, %v3685_v29  ;;  %v764_v23 = vsub.f32 0.0, %v746_v60 }
 0x216   :  { %v706_v30 = vpop.f32.mrb[20].mxu1  ;;  %v4453_v11 = vsel %vm813_vm12, %v849_v53, %v885_v43  ;;  %v939_v2 = vsel %vm813_vm12, %v921_v61, 2.0  ;;  %v850_v10 = vadd.f32 1.0, %v832_v4  ;;  %v922_v9 = vmul.f32 %v3685_v29, %v832_v4 }
 0x217   :  { %3692 = vpow2.f32 %v789_v16  ;;  %v3370_v28 = vpop.f32.mrb[21].mxu1  ;;  %v957_v7 = vadd.f32 %v939_v2, %v4453_v11  ;;  %v886_v58 = vmul.f32 %v3685_v29, %v868_v20  ;;  %v791_v25 = vmul.f32 1.442695, %v764_v23 }
 0x218   :  { %3694 = vrcp.f32 %v956_v6  ;;  %v709_v19 = vpop.f32.mrb[22].mxu1  ;;  %v4458_v35 = vadd.f32 %v706_v30, %v4401_v12  ;;  %v940_v55 = vsel %vm814_vm13, %v922_v9, 2.0 }
 0x219   :  { %v4461_v45 = vadd.f32 %v709_v19, %v4401_v12  ;;  %v3371_v39 = vpop.f32.mrb[23].mxu1  ;;  %3696 = vrcp.f32 %v957_v7  ;;  %v904_v40 = vsel %vm814_vm13, %v850_v10, %v886_v58 }
 0x21a   :  { %v3687_v3 = vpop.eup %3686  ;;  %3698 = vpow2.f32 %v791_v25  ;;  %v958_v57 = vadd.f32 %v940_v55, %v904_v40  ;;  %v747_v60 = vand.u32 2147483647, %v4458_v35  ;;  %vm819_vm4 = vcmp.ge.f32.partialorder %v4458_v35, 0.0 }
 0x21b   :  { %v3689_v56 = vpop.eup %3688  ;;  %v833_v50 = vmul.f32 2.0, %v3687_v3  ;;  %v869_v59 = vadd.f32 2.0, %v3687_v3  ;;  %v748_v29 = vand.u32 2147483647, %v4461_v45  ;;  %vm820_vm5 = vcmp.ge.f32.partialorder %v4461_v45, 0.0 }
 0x21c   :  { %v834_v54 = vmul.f32 2.0, %v3689_v56  ;;  %v870_v6 = vadd.f32 2.0, %v3689_v56  ;;  %v3691_v53 = vpop.eup %3690  ;;  %3700 = vrcp.f32 %v958_v57  ;;  %v765_v2 = vsub.f32 0.0, %v747_v60 }
 0x21d   :  { %v851_v43 = vadd.f32 1.0, %v833_v50  ;;  %v887_v61 = vmul.f32 %v3687_v3, %v869_v59  ;;  %v923_v16 = vmul.f32 %v3687_v3, %v833_v50  ;;  %v766_v37 = vsub.f32 0.0, %v748_v29 }
 0x21e   :  { %v714_v4 = vpop.f32.mrb[24].mxu1  ;;  %v852_v20 = vadd.f32 1.0, %v834_v54  ;;  %v888_v23 = vmul.f32 %v3689_v56, %v870_v6  ;;  %v924_v30 = vmul.f32 %v3689_v56, %v834_v54  ;;  %v1009_v55 = vmul.f32 %v3691_v53, %v973_v34 }
 0x21f   :  { %v3374_v28 = vpop.f32.mrb[25].mxu1  ;;  %v4475_v7 = vsel %vm815_vm14, %v851_v43, %v887_v61  ;;  %v941_v18 = vsel %vm815_vm14, %v923_v16, 2.0  ;;  %v793_v59 = vmul.f32 1.442695, %v765_v2  ;;  %v795_v60 = vmul.f32 1.442695, %v766_v37 }
 0x220   :  { %v717_v10 = vpop.f32.mrb[26].mxu1  ;;  %v959_v19 = vadd.f32 %v941_v18, %v4475_v7  ;;  %v4483_v9 = vsel %vm816_vm15, %v852_v20, %v888_v23  ;;  %v942_v25 = vsel %vm816_vm15, %v924_v30, 2.0  ;;  %v4490_v54 = vadd.f32 %v714_v4, %v4401_v12 }
 0x221   :  { %v3693_v58 = vpop.eup %3692  ;;  %v3375_v39 = vpop.f32.mrb[27].mxu1  ;;  %v960_v56 = vadd.f32 %v942_v25, %v4483_v9  ;;  %v975_v34 = vmul.f32 %v4453_v11, %v4422_v8  ;;  %v976_v18 = vmul.f32 %v904_v40, %v4426_v21 }
 0x222   :  { %v3695_v3 = vpop.eup %3694  ;;  %v835_v57 = vmul.f32 2.0, %v3693_v58  ;;  %v871_v50 = vadd.f32 2.0, %v3693_v58  ;;  %3702 = vrcp.f32 %v959_v19  ;;  %v749_v53 = vand.u32 2147483647, %v4490_v54 }
 0x223   :  { %v3697_v6 = vpop.eup %3696  ;;  %3704 = vrcp.f32 %v960_v56  ;;  %v1010_v20 = vmul.f32 %v3695_v3, %v974_v13  ;;  %v4501_v39 = vadd.f32 %v717_v10, %v4401_v12  ;;  %vm821_vm7 = vcmp.ge.f32.partialorder %v4490_v54, 0.0 }
 0x224   :  { %v853_v29 = vadd.f32 1.0, %v835_v57  ;;  %v889_v43 = vmul.f32 %v3693_v58, %v871_v50  ;;  %v925_v61 = vmul.f32 %v3693_v58, %v835_v57  ;;  %v3699_v16 = vpop.eup %3698  ;;  %3706 = vpow2.f32 %v793_v59 }
 0x225   :  { %v836_v30 = vmul.f32 2.0, %v3699_v16  ;;  %v872_v2 = vadd.f32 2.0, %v3699_v16  ;;  %3708 = vpow2.f32 %v795_v60  ;;  %v767_v13 = vsub.f32 0.0, %v749_v53 }
 0x226   :  { %v907_v23 = vsel %vm817_vm2, %v853_v29, %v889_v43  ;;  %v943_v4 = vsel %vm817_vm2, %v925_v61, 2.0  ;;  %v722_v28 = vpop.f32.mrb[28].mxu1  ;;  %v3701_v19 = vpop.eup %3700  ;;  %v1011_v56 = vmul.f32 %v3697_v6, %v975_v34  ;;  %v1026_v59 = vpack.c.bf16 %v1010_v20, %v1009_v55 }
 0x227   :  { %v961_v37 = vadd.f32 %v943_v4, %v907_v23  ;;  %v3378_v58 = vpop.f32.mrb[29].mxu1  ;;  %v854_v8 = vadd.f32 1.0, %v836_v30  ;;  %v890_v11 = vmul.f32 %v3699_v16, %v872_v2  ;;  %v926_v25 = vmul.f32 %v3699_v16, %v836_v30 }
 0x228   :  { %v725_v3 = vpop.f32.mrb[30].mxu1  ;;  %v1012_v57 = vmul.f32 %v3701_v19, %v976_v18  ;;  %v797_v50 = vmul.f32 1.442695, %v767_v13  ;;  %v750_v60 = vand.u32 2147483647, %v4501_v39  ;;  %3391 = vmatmul.mubr.msk.bf16.gmra.mrb[40].mxu1 %vm604_vm6, %v1026_v59  ;;  %v4510_v10 = vadd.f32 %v722_v28, %v4401_v12 }
 0x229   :  { %v3379_v29 = vpop.f32.mrb[31].mxu1  ;;  %3710 = vrcp.f32 %v961_v37  ;;  %v908_v21 = vsel %vm818_vm3, %v854_v8, %v890_v11  ;;  %v944_v40 = vsel %vm818_vm3, %v926_v25, 2.0  ;;  %v4513_v55 = vadd.f32 %v725_v3, %v4401_v12  ;;  %3394 = vmatprep.mubr.msk.bf16.mxu1 %vm3959_vm0, %v3958_v1 }
 0x22a   :  { %v962_v43 = vadd.f32 %v944_v40, %v908_v21  ;;  %3712 = vpow2.f32 %v797_v50  ;;  %v768_v6 = vsub.f32 0.0, %v750_v60  ;;  %v1027_v61 = vpack.c.bf16 %v1012_v57, %v1011_v56 }
 0x22b   :  { %v751_v20 = vand.u32 2147483647, %v4510_v10  ;;  %v977_v53 = vmul.f32 %v4475_v7, %v4432_v0  ;;  %v752_v30 = vand.u32 2147483647, %v4513_v55  ;;  %v978_v18 = vmul.f32 %v4483_v9, %v4435_v36 }
 0x22c   :  { %v3703_v16 = vpop.eup %3702  ;;  %3714 = vrcp.f32 %v962_v43  ;;  %v799_v4 = vmul.f32 1.442695, %v768_v6  ;;  %v979_v37 = vmul.f32 %v907_v23, %v4443_v27  ;;  %v980_v3 = vmul.f32 %v908_v21, %v4449_v46 }
 0x22d   :  { %v3705_v34 = vpop.eup %3704  ;;  %v769_v13 = vsub.f32 0.0, %v751_v20  ;;  %v770_v0 = vsub.f32 0.0, %v752_v30  ;;  %v1013_v6 = vmul.f32 %v3703_v16, %v977_v53  ;;  %vm822_vm8 = vcmp.ge.f32.partialorder %v4501_v39, 0.0 }
 0x22e   :  { %v730_v2 = vpop.f32.mrb[32].mxu1  ;;  %v3707_v28 = vpop.eup %3706  ;;  %3716 = vpow2.f32 %v799_v4  ;;  %v1014_v4 = vmul.f32 %v3705_v34, %v978_v18  ;;  %vm823_vm9 = vcmp.ge.f32.partialorder %v4510_v10, 0.0  ;;  %vm824_vm10 = vcmp.ge.f32.partialorder %v4513_v55, 0.0 }
 0x22f   :  { %v4527_v58 = vadd.f32 %v730_v2, %v4401_v12  ;;  %v3382_v19 = vpop.f32.mrb[33].mxu1  ;;  %v837_v8 = vmul.f32 2.0, %v3707_v28  ;;  %v873_v11 = vadd.f32 2.0, %v3707_v28  ;;  %v3709_v25 = vpop.eup %3708  ;;  %v801_v56 = vmul.f32 1.442695, %v769_v13 }
 0x230   :  { %v733_v7 = vpop.f32.mrb[34].mxu1  ;;  %v838_v59 = vmul.f32 2.0, %v3709_v25  ;;  %v874_v29 = vadd.f32 2.0, %v3709_v25  ;;  %v803_v40 = vmul.f32 1.442695, %v770_v0  ;;  %3395 = vmatmul.mubr.msk.bf16.gmra.mrb[44].mxu1 %vm604_vm6, %v1027_v61 }
 0x231   :  { %v753_v57 = vand.u32 2147483647, %v4527_v58  ;;  %v4532_v36 = vadd.f32 %v733_v7, %v4401_v12  ;;  %v3383_v27 = vpop.f32.mrb[35].mxu1  ;;  %v855_v9 = vadd.f32 1.0, %v837_v8  ;;  %v891_v23 = vmul.f32 %v3707_v28, %v873_v11  ;;  %3398 = vmatprep.mubr.msk.bf16.mxu1 %vm3959_vm0, %v3958_v1 }
 0x232   :  { %v927_v50 = vmul.f32 %v3707_v28, %v837_v8  ;;  %3718 = vpow2.f32 %v801_v56  ;;  %v856_v21 = vadd.f32 1.0, %v838_v59  ;;  %v892_v2 = vmul.f32 %v3709_v25, %v874_v29 }
 0x233   :  { %v771_v60 = vsub.f32 0.0, %v753_v57  ;;  %v3711_v43 = vpop.eup %3710  ;;  %v909_v46 = vsel %vm819_vm4, %v855_v9, %v891_v23  ;;  %v928_v28 = vmul.f32 %v3709_v25, %v838_v59  ;;  %3720 = vpow2.f32 %v803_v40 }
 0x234   :  { %v945_v12 = vsel %vm819_vm4, %v927_v50, 2.0  ;;  %v3713_v20 = vpop.eup %3712  ;;  %v1015_v53 = vmul.f32 %v3711_v43, %v979_v37  ;;  %v910_v8 = vsel %vm820_vm5, %v856_v21, %v892_v2  ;;  %v754_v0 = vand.u32 2147483647, %v4532_v36 }
 0x235   :  { %v963_v30 = vadd.f32 %v945_v12, %v909_v46  ;;  %v839_v13 = vmul.f32 2.0, %v3713_v20  ;;  %v875_v61 = vadd.f32 2.0, %v3713_v20  ;;  %v805_v19 = vmul.f32 1.442695, %v771_v60 }
 0x236   :  { %v3715_v16 = vpop.eup %3714  ;;  %v946_v11 = vsel %vm820_vm5, %v928_v28, 2.0  ;;  %v772_v57 = vsub.f32 0.0, %v754_v0  ;;  %v1028_v37 = vpack.c.bf16 %v1014_v4, %v1013_v6  ;;  %v981_v0 = vmul.f32 %v909_v46, %v4458_v35 }
 0x237   :  { %v1016_v7 = vmul.f32 %v3715_v16, %v980_v3  ;;  %3722 = vrcp.f32 %v963_v30  ;;  %v964_v34 = vadd.f32 %v946_v11, %v910_v8  ;;  %v857_v18 = vadd.f32 1.0, %v839_v13 }
 0x238   :  { %v893_v56 = vmul.f32 %v3713_v20, %v875_v61  ;;  %v929_v25 = vmul.f32 %v3713_v20, %v839_v13  ;;  %3724 = vpow2.f32 %v805_v19  ;;  %v3717_v27 = vpop.eup %3716  ;;  %v807_v60 = vmul.f32 1.442695, %v772_v57  ;;  %3399 = vmatmul.mubr.msk.bf16.gmra.mrb[48].mxu1 %vm604_vm6, %v1028_v37 }
 0x239   :  { %3726 = vrcp.f32 %v964_v34  ;;  %v1029_v9 = vpack.c.bf16 %v1016_v7, %v1015_v53  ;;  %v840_v59 = vmul.f32 2.0, %v3717_v27  ;;  %v876_v29 = vadd.f32 2.0, %v3717_v27  ;;  %3402 = vmatprep.mubr.msk.bf16.mxu1 %vm3959_vm0, %v3958_v1 }
 0x23a   :  { %v911_v23 = vsel %vm821_vm7, %v857_v18, %v893_v56  ;;  %v947_v50 = vsel %vm821_vm7, %v929_v25, 2.0  ;;  %3728 = vpow2.f32 %v807_v60  ;;  %v982_v18 = vmul.f32 %v910_v8, %v4461_v45 }
 0x23b   :  { %v965_v40 = vadd.f32 %v947_v50, %v911_v23  ;;  %v858_v43 = vadd.f32 1.0, %v840_v59  ;;  %v894_v12 = vmul.f32 %v3717_v27, %v876_v29  ;;  %v930_v21 = vmul.f32 %v3717_v27, %v840_v59 }
 0x23c   :  { %v3719_v3 = vpop.eup %3718  ;;  %vm825_vm11 = vcmp.ge.f32.partialorder %v4527_v58, 0.0  ;;  %vm826_vm12 = vcmp.ge.f32.partialorder %v4532_v36, 0.0 }
 0x23d   :  { %v841_v20 = vmul.f32 2.0, %v3719_v3  ;;  %v877_v6 = vadd.f32 2.0, %v3719_v3  ;;  %v912_v4 = vsel %vm822_vm8, %v858_v43, %v894_v12  ;;  %v948_v30 = vsel %vm822_vm8, %v930_v21, 2.0  ;;  %v3721_v2 = vpop.eup %3720 }
 0x23e   :  { %3730 = vrcp.f32 %v965_v40  ;;  %v966_v28 = vadd.f32 %v948_v30, %v912_v4  ;;  %v842_v16 = vmul.f32 2.0, %v3721_v2  ;;  %v878_v53 = vadd.f32 2.0, %v3721_v2 }
 0x23f   :  { %v859_v13 = vadd.f32 1.0, %v841_v20  ;;  %v895_v61 = vmul.f32 %v3719_v3, %v877_v6  ;;  %v931_v19 = vmul.f32 %v3719_v3, %v841_v20 }
 0x240   :  { %3732 = vrcp.f32 %v966_v28  ;;  %v860_v25 = vadd.f32 1.0, %v842_v16  ;;  %v896_v57 = vmul.f32 %v3721_v2, %v878_v53  ;;  %v932_v50 = vmul.f32 %v3721_v2, %v842_v16  ;;  %3403 = vmatmul.mubr.msk.bf16.gmra.mrb[52].mxu1 %vm604_vm6, %v1029_v9 }
 0x241   :  { %v3723_v11 = vpop.eup %3722  ;;  %v913_v7 = vsel %vm823_vm9, %v859_v13, %v895_v61  ;;  %v949_v56 = vsel %vm823_vm9, %v931_v19, 2.0  ;;  %3406 = vmatprep.mubr.msk.bf16.mxu1 %vm3959_vm0, %v3958_v1  ;;  %v983_v28 = vmul.f32 %v911_v23, %v4490_v54  ;;  %v984_v13 = vmul.f32 %v912_v4, %v4501_v39 }
 0x242   :  { %v3725_v34 = vpop.eup %3724  ;;  %v967_v37 = vadd.f32 %v949_v56, %v913_v7  ;;  %v1017_v40 = vmul.f32 %v3723_v11, %v981_v0  ;;  %v914_v35 = vsel %vm824_vm10, %v860_v25, %v896_v57  ;;  %v950_v45 = vsel %vm824_vm10, %v932_v50, 2.0 }
 0x243   :  { %v3727_v27 = vpop.eup %3726  ;;  %v843_v59 = vmul.f32 2.0, %v3725_v34  ;;  %v879_v29 = vadd.f32 2.0, %v3725_v34  ;;  %v968_v8 = vadd.f32 %v950_v45, %v914_v35  ;;  %v985_v4 = vmul.f32 %v913_v7, %v4510_v10 }
 0x244   :  { %v1018_v60 = vmul.f32 %v3727_v27, %v982_v18  ;;  %3734 = vrcp.f32 %v967_v37  ;;  %v3729_v9 = vpop.eup %3728  ;;  %v986_v25 = vmul.f32 %v914_v35, %v4513_v55  ;;  %v3579_v55 = vld [vmem:[%s5182_s1 + $0x18] sm:$0xff]  }
 0x245   :  { %v861_v46 = vadd.f32 1.0, %v843_v59  ;;  %v897_v3 = vmul.f32 %v3725_v34, %v879_v29  ;;  %v933_v43 = vmul.f32 %v3725_v34, %v843_v59  ;;  %3736 = vrcp.f32 %v968_v8  ;;  %3422 = vmatprep.subr.bf16.mxu0 %v3579_v55 }
 0x246   :  { %v1030_v12 = vpack.c.bf16 %v1018_v60, %v1017_v40  ;;  %v844_v30 = vmul.f32 2.0, %v3729_v9  ;;  %v880_v2 = vadd.f32 2.0, %v3729_v9  ;;  %3423 = vmatpush3.bf16.msra.mxu0 %v3579_v55 }
 0x247   :  { %v915_v21 = vsel %vm825_vm11, %v861_v46, %v897_v3  ;;  %v951_v20 = vsel %vm825_vm11, %v933_v43, 2.0 }
 0x248   :  { %v3731_v6 = vpop.eup %3730  ;;  %v969_v61 = vadd.f32 %v951_v20, %v915_v21  ;;  %v862_v16 = vadd.f32 1.0, %v844_v30  ;;  %v898_v53 = vmul.f32 %v3729_v9, %v880_v2  ;;  %v934_v11 = vmul.f32 %v3729_v9, %v844_v30  ;;  %3407 = vmatmul.mubr.msk.bf16.gmra.mrb[56].mxu1 %vm604_vm6, %v1030_v12 }
 0x249   :  { %v1019_v0 = vmul.f32 %v3731_v6, %v983_v28  ;;  %3410 = vmatprep.mubr.msk.bf16.mxu1 %vm3959_vm0, %v3958_v1  ;;  %v987_v29 = vmul.f32 %v915_v21, %v4527_v58  ;;  %v4586_v58 = vld [vmem:[%s5182_s1 + $0x10] sm:$0xff]  }
 0x24a   :  { %v3733_v19 = vpop.eup %3732  ;;  %v916_v18 = vsel %vm826_vm12, %v862_v16, %v898_v53  ;;  %v952_v56 = vsel %vm826_vm12, %v934_v11, 2.0  ;;  %3738 = vrcp.f32 %v969_v61  ;;  %3432 = vmatprep.subr.bf16.mxu0 %v4586_v58 }
 0x24b   :  { %v1020_v34 = vmul.f32 %v3733_v19, %v984_v13  ;;  %v970_v54 = vadd.f32 %v952_v56, %v916_v18  ;;  %v988_v40 = vmul.f32 %v916_v18, %v4532_v36  ;;  %v88_v36 = vld [vmem:[%s5183_s2 + $0x40] sm:$0xff] }
 0x24c   :  { %v4593_v7 = vrot.slane %v88_v36, %v4077_v33 }
 0x24d   :  { %v1031_v23 = vpack.c.bf16 %v1020_v34, %v1019_v0  ;;  %3740 = vrcp.f32 %v970_v54 }
 0x24e   :  { %v3735_v39 = vpop.eup %3734 }
 0x24f   :  { %v3737_v57 = vpop.eup %3736  ;;  %v1021_v27 = vmul.f32 %v3735_v39, %v985_v4 }
 0x250   :  { %v1022_v37 = vmul.f32 %v3737_v57, %v986_v25  ;;  %3411 = vmatmul.mubr.msk.bf16.gmra.mrb[60].mxu1 %vm604_vm6, %v1031_v23 }
 0x251   :  { %3414 = vmatprep.mubr.msk.bf16.mxu1 %vm3959_vm0, %v3958_v1 }
 0x252   :  { %v1032_v50 = vpack.c.bf16 %v1022_v37, %v1021_v27 }
 0x254   :  { %v3739_v59 = vpop.eup %3738 }
 0x255   :  { %v1023_v45 = vmul.f32 %v3739_v59, %v987_v29 }
 0x257   :  { %v3741_v60 = vpop.eup %3740 }
 0x258   :  { %v1024_v46 = vmul.f32 %v3741_v60, %v988_v40  ;;  %3415 = vmatmul.mubr.msk.bf16.gmra.mrb[64].mxu1 %vm604_vm6, %v1032_v50 }
 0x259   :  { %3418 = vmatprep.mubr.msk.bf16.mxu1 %vm3959_vm0, %v3958_v1 }
 0x25a   :  { %v1033_v10 = vpack.c.bf16 %v1024_v46, %v1023_v45 }
 0x260   :  { %3419 = vmatmul.mubr.msk.bf16.gmra.mrb[68].mxu1 %vm604_vm6, %v1033_v10 }
 0x2e1   :  { %v1101_v35 = vpop.f32.mrb[36].mxu1 }
 0x2e2   :  { %v1172_v8 = vadd.f32 %v1101_v35, %v4183_v14  ;;  %v3388_v3 = vpop.f32.mrb[37].mxu1 }
 0x2e3   :  { %v1104_v43 = vpop.f32.mrb[38].mxu1 }
 0x2e4   :  { %v1194_v12 = vadd.f32 %v4593_v7, %v1172_v8  ;;  %v1173_v9 = vadd.f32 %v1104_v43, %v4185_v15  ;;  %v3389_v21 = vpop.f32.mrb[39].mxu1 }
 0x2e6   :  { %v1212_v20 = vand.u32 2147483647, %v1194_v12  ;;  %v1195_v6 = vadd.f32 %v4593_v7, %v1173_v9  ;;  %vm1284_vm13 = vcmp.ge.f32.partialorder %v1194_v12, 0.0 }
 0x2e8   :  { %v1230_v30 = vsub.f32 0.0, %v1212_v20  ;;  %v1213_v2 = vand.u32 2147483647, %v1195_v6  ;;  %vm1285_vm14 = vcmp.ge.f32.partialorder %v1195_v6, 0.0 }
 0x2ea   :  { %v1248_v28 = vmul.f32 1.442695, %v1230_v30  ;;  %v1231_v13 = vsub.f32 0.0, %v1213_v2 }
 0x2ec   :  { %3742 = vpow2.f32 %v1248_v28  ;;  %v1250_v61 = vmul.f32 1.442695, %v1231_v13 }
 0x2ee   :  { %3744 = vpow2.f32 %v1250_v61 }
 0x2f6   :  { %v3743_v19 = vpop.eup %3742 }
 0x2f7   :  { %v1302_v16 = vmul.f32 2.0, %v3743_v19  ;;  %v1338_v14 = vadd.f32 2.0, %v3743_v19 }
 0x2f8   :  { %v3745_v53 = vpop.eup %3744 }
 0x2f9   :  { %v1320_v11 = vadd.f32 1.0, %v1302_v16  ;;  %v1356_v0 = vmul.f32 %v3743_v19, %v1338_v14  ;;  %v1392_v34 = vmul.f32 %v3743_v19, %v1302_v16  ;;  %v1303_v18 = vmul.f32 2.0, %v3745_v53 }
 0x2fa   :  { %v1339_v15 = vadd.f32 2.0, %v3745_v53 }
 0x2fb   :  { %v1374_v56 = vsel %vm1284_vm13, %v1320_v11, %v1356_v0  ;;  %v1410_v54 = vsel %vm1284_vm13, %v1392_v34, 2.0  ;;  %v1321_v23 = vadd.f32 1.0, %v1303_v18  ;;  %v1393_v39 = vmul.f32 %v3745_v53, %v1303_v18  ;;  %v1109_v37 = vpop.f32.mrb[40].mxu1 }
 0x2fc   :  { %v1428_v4 = vadd.f32 %v1410_v54, %v1374_v56  ;;  %v1357_v25 = vmul.f32 %v3745_v53, %v1339_v15  ;;  %v1174_v59 = vadd.f32 %v1109_v37, %v4239_v48  ;;  %v3392_v29 = vpop.f32.mrb[41].mxu1  ;;  %v1446_v28 = vmul.f32 %v1374_v56, %v1194_v12 }
 0x2fd   :  { %v1411_v57 = vsel %vm1285_vm14, %v1393_v39, 2.0  ;;  %v1112_v40 = vpop.f32.mrb[42].mxu1 }
 0x2fe   :  { %v1375_v27 = vsel %vm1285_vm14, %v1321_v23, %v1357_v25  ;;  %3746 = vrcp.f32 %v1428_v4  ;;  %v4601_v60 = vadd.f32 %v4593_v7, %v1174_v59  ;;  %v1175_v45 = vadd.f32 %v1112_v40, %v4241_v49  ;;  %v3393_v46 = vpop.f32.mrb[43].mxu1 }
 0x2ff   :  { %v1429_v50 = vadd.f32 %v1411_v57, %v1375_v27  ;;  %v1447_v13 = vmul.f32 %v1375_v27, %v1195_v6 }
 0x300   :  { %v1214_v10 = vand.u32 2147483647, %v4601_v60  ;;  %v4606_v55 = vadd.f32 %v4593_v7, %v1175_v45  ;;  %vm1286_vm15 = vcmp.ge.f32.partialorder %v4601_v60, 0.0 }
 0x301   :  { %3748 = vrcp.f32 %v1429_v50 }
 0x302   :  { %v1232_v36 = vsub.f32 0.0, %v1214_v10  ;;  %v1215_v35 = vand.u32 2147483647, %v4606_v55  ;;  %vm1287_vm2 = vcmp.ge.f32.partialorder %v4606_v55, 0.0 }
 0x303   :  { %v1117_v8 = vpop.f32.mrb[44].mxu1 }
 0x304   :  { %v1252_v3 = vmul.f32 1.442695, %v1232_v36  ;;  %v1233_v48 = vsub.f32 0.0, %v1215_v35  ;;  %v1176_v43 = vadd.f32 %v1117_v8, %v4283_v63  ;;  %v3396_v9 = vpop.f32.mrb[45].mxu1 }
 0x305   :  { %v1120_v21 = vpop.f32.mrb[46].mxu1 }
 0x306   :  { %3750 = vpow2.f32 %v1252_v3  ;;  %v1254_v30 = vmul.f32 1.442695, %v1233_v48  ;;  %v4611_v49 = vadd.f32 %v4593_v7, %v1176_v43  ;;  %v3397_v2 = vpop.f32.mrb[47].mxu1  ;;  %v1177_v61 = vadd.f32 %v1120_v21, %v4285_v42 }
 0x308   :  { %v3747_v20 = vpop.eup %3746  ;;  %3752 = vpow2.f32 %v1254_v30  ;;  %v1216_v16 = vand.u32 2147483647, %v4611_v49  ;;  %v4620_v53 = vadd.f32 %v4593_v7, %v1177_v61  ;;  %vm1288_vm3 = vcmp.ge.f32.partialorder %v4611_v49, 0.0 }
 0x309   :  { %v4615_v14 = vmul.f32 %v3747_v20, %v1446_v28 }
 0x30a   :  { %v1234_v11 = vsub.f32 0.0, %v1216_v16  ;;  %v1217_v0 = vand.u32 2147483647, %v4620_v53  ;;  %vm1289_vm4 = vcmp.ge.f32.partialorder %v4620_v53, 0.0 }
 0x30b   :  { %v3749_v19 = vpop.eup %3748  ;;  %v1125_v34 = vpop.f32.mrb[48].mxu1 }
 0x30c   :  { %v4617_v63 = vmul.f32 %v3749_v19, %v1447_v13  ;;  %v1256_v6 = vmul.f32 1.442695, %v1234_v11  ;;  %v1235_v42 = vsub.f32 0.0, %v1217_v0  ;;  %v1178_v18 = vadd.f32 %v1125_v34, %v4316_v24  ;;  %v3400_v15 = vpop.f32.mrb[49].mxu1 }
 0x30d   :  { %v1128_v56 = vpop.f32.mrb[50].mxu1 }
 0x30e   :  { %v1500_v12 = vpack.c.bf16 %v4617_v63, %v4615_v14  ;;  %3754 = vpow2.f32 %v1256_v6  ;;  %v1258_v54 = vmul.f32 1.442695, %v1235_v42  ;;  %v4627_v23 = vadd.f32 %v4593_v7, %v1178_v18  ;;  %v3401_v4 = vpop.f32.mrb[51].mxu1 }
 0x30f   :  { %v1179_v39 = vadd.f32 %v1128_v56, %v4311_v22 }
 0x310   :  { %v3751_v25 = vpop.eup %3750  ;;  %3756 = vpow2.f32 %v1258_v54  ;;  %v1218_v37 = vand.u32 2147483647, %v4627_v23  ;;  %vm1290_vm5 = vcmp.ge.f32.partialorder %v4627_v23, 0.0 }
 0x311   :  { %v1304_v57 = vmul.f32 2.0, %v3751_v25  ;;  %v1340_v27 = vadd.f32 2.0, %v3751_v25  ;;  %v4632_v59 = vadd.f32 %v4593_v7, %v1179_v39 }
 0x312   :  { %v3753_v50 = vpop.eup %3752  ;;  %v1236_v10 = vsub.f32 0.0, %v1218_v37 }
 0x313   :  { %v1322_v24 = vadd.f32 1.0, %v1304_v57  ;;  %v1358_v29 = vmul.f32 %v3751_v25, %v1340_v27  ;;  %v1394_v40 = vmul.f32 %v3751_v25, %v1304_v57  ;;  %v1305_v45 = vmul.f32 2.0, %v3753_v50  ;;  %v1133_v22 = vpop.f32.mrb[52].mxu1 }
 0x314   :  { %v1341_v46 = vadd.f32 2.0, %v3753_v50  ;;  %v1219_v36 = vand.u32 2147483647, %v4632_v59  ;;  %v3404_v3 = vpop.f32.mrb[53].mxu1  ;;  %v1260_v21 = vmul.f32 1.442695, %v1236_v10  ;;  %v1180_v28 = vadd.f32 %v1133_v22, %v4338_v31 }
 0x315   :  { %v1323_v35 = vadd.f32 1.0, %v1305_v45  ;;  %v1395_v8 = vmul.f32 %v3753_v50, %v1305_v45  ;;  %v4637_v48 = vsel %vm1286_vm15, %v1322_v24, %v1358_v29  ;;  %v1412_v43 = vsel %vm1286_vm15, %v1394_v40, 2.0  ;;  %v1136_v20 = vpop.f32.mrb[54].mxu1 }
 0x316   :  { %v1359_v9 = vmul.f32 %v3753_v50, %v1341_v46  ;;  %v1237_v2 = vsub.f32 0.0, %v1219_v36  ;;  %v1181_v13 = vadd.f32 %v1136_v20, %v4333_v51  ;;  %v3405_v61 = vpop.f32.mrb[55].mxu1  ;;  %v1430_v11 = vadd.f32 %v1412_v43, %v4637_v48 }
 0x317   :  { %v1413_v30 = vsel %vm1287_vm2, %v1395_v8, 2.0  ;;  %3758 = vpow2.f32 %v1260_v21  ;;  %v4644_v18 = vadd.f32 %v4593_v7, %v1180_v28  ;;  %vm1291_vm7 = vcmp.ge.f32.partialorder %v4632_v59, 0.0 }
 0x318   :  { %v3755_v19 = vpop.eup %3754  ;;  %v1377_v16 = vsel %vm1287_vm2, %v1323_v35, %v1359_v9  ;;  %v1262_v42 = vmul.f32 1.442695, %v1237_v2  ;;  %v4647_v15 = vadd.f32 %v4593_v7, %v1181_v13 }
 0x319   :  { %v1431_v0 = vadd.f32 %v1413_v30, %v1377_v16  ;;  %v1306_v6 = vmul.f32 2.0, %v3755_v19  ;;  %v1342_v34 = vadd.f32 2.0, %v3755_v19  ;;  %v1220_v25 = vand.u32 2147483647, %v4644_v18 }
 0x31a   :  { %v3757_v31 = vpop.eup %3756  ;;  %v1221_v50 = vand.u32 2147483647, %v4647_v15  ;;  %vm1292_vm8 = vcmp.ge.f32.partialorder %v4644_v18, 0.0  ;;  %vm1293_vm9 = vcmp.ge.f32.partialorder %v4647_v15, 0.0 }
 0x31b   :  { %3760 = vrcp.f32 %v1431_v0  ;;  %v1324_v51 = vadd.f32 1.0, %v1306_v6  ;;  %v1360_v56 = vmul.f32 %v3755_v19, %v1342_v34  ;;  %v1396_v54 = vmul.f32 %v3755_v19, %v1306_v6  ;;  %v1141_v57 = vpop.f32.mrb[56].mxu1 }
 0x31c   :  { %v1307_v39 = vmul.f32 2.0, %v3757_v31  ;;  %v1343_v4 = vadd.f32 2.0, %v3757_v31  ;;  %3762 = vpow2.f32 %v1262_v42  ;;  %v3408_v24 = vpop.f32.mrb[57].mxu1  ;;  %v1238_v36 = vsub.f32 0.0, %v1220_v25 }
 0x31d   :  { %v1378_v27 = vsel %vm1288_vm3, %v1324_v51, %v1360_v56  ;;  %v1414_v37 = vsel %vm1288_vm3, %v1396_v54, 2.0  ;;  %3764 = vrcp.f32 %v1430_v11  ;;  %v1144_v46 = vpop.f32.mrb[58].mxu1  ;;  %v1239_v22 = vsub.f32 0.0, %v1221_v50 }
 0x31e   :  { %v1432_v29 = vadd.f32 %v1414_v37, %v1378_v27  ;;  %v1325_v40 = vadd.f32 1.0, %v1307_v39  ;;  %v1361_v45 = vmul.f32 %v3757_v31, %v1343_v4  ;;  %v1397_v10 = vmul.f32 %v3757_v31, %v1307_v39  ;;  %v3409_v35 = vpop.f32.mrb[59].mxu1 }
 0x31f   :  { %v1182_v3 = vadd.f32 %v1141_v57, %v4353_v32  ;;  %v1183_v43 = vadd.f32 %v1144_v46, %v4349_v17  ;;  %v1264_v21 = vmul.f32 1.442695, %v1238_v36  ;;  %v1266_v20 = vmul.f32 1.442695, %v1239_v22 }
 0x320   :  { %3766 = vrcp.f32 %v1432_v29  ;;  %v1379_v8 = vsel %vm1289_vm4, %v1325_v40, %v1361_v45  ;;  %v1415_v9 = vsel %vm1289_vm4, %v1397_v10, 2.0  ;;  %v1449_v32 = vmul.f32 %v1377_v16, %v4606_v55 }
 0x321   :  { %v1433_v30 = vadd.f32 %v1415_v9, %v1379_v8  ;;  %v4659_v2 = vadd.f32 %v4593_v7, %v1182_v3  ;;  %v4662_v28 = vadd.f32 %v4593_v7, %v1183_v43  ;;  %3768 = vpow2.f32 %v1264_v21  ;;  %v3759_v13 = vpop.eup %3758 }
 0x322   :  { %v1448_v0 = vmul.f32 %v4637_v48, %v4601_v60  ;;  %v1308_v6 = vmul.f32 2.0, %v3759_v13  ;;  %v1344_v34 = vadd.f32 2.0, %v3759_v13  ;;  %v1450_v36 = vmul.f32 %v1378_v27, %v4611_v49 }
 0x323   :  { %3770 = vrcp.f32 %v1433_v30  ;;  %v1222_v17 = vand.u32 2147483647, %v4659_v2  ;;  %v1223_v61 = vand.u32 2147483647, %v4662_v28  ;;  %v1149_v19 = vpop.f32.mrb[60].mxu1  ;;  %v1451_v21 = vmul.f32 %v1379_v8, %v4620_v53 }
 0x324   :  { %3772 = vpow2.f32 %v1266_v20  ;;  %v3412_v42 = vpop.f32.mrb[61].mxu1  ;;  %v1184_v55 = vadd.f32 %v1149_v19, %v4368_v26  ;;  %v1326_v39 = vadd.f32 1.0, %v1308_v6  ;;  %v1362_v4 = vmul.f32 %v3759_v13, %v1344_v34 }
 0x325   :  { %v3761_v11 = vpop.eup %3760  ;;  %v1240_v56 = vsub.f32 0.0, %v1222_v17  ;;  %v1241_v54 = vsub.f32 0.0, %v1223_v61  ;;  %v1152_v16 = vpop.f32.mrb[62].mxu1  ;;  %v1398_v25 = vmul.f32 %v3759_v13, %v1308_v6  ;;  %vm1294_vm10 = vcmp.ge.f32.partialorder %v4659_v2, 0.0 }
 0x326   :  { %v3763_v31 = vpop.eup %3762  ;;  %v1485_v51 = vmul.f32 %v3761_v11, %v1449_v32  ;;  %v3413_v37 = vpop.f32.mrb[63].mxu1  ;;  %v4673_v48 = vadd.f32 %v4593_v7, %v1184_v55  ;;  %v4677_v40 = vsel %vm1290_vm5, %v1326_v39, %v1362_v4  ;;  %v1185_v49 = vadd.f32 %v1152_v16, %v4364_v5 }
 0x327   :  { %v1309_v57 = vmul.f32 2.0, %v3763_v31  ;;  %v3765_v50 = vpop.eup %3764  ;;  %v1345_v24 = vadd.f32 2.0, %v3763_v31  ;;  %v1268_v29 = vmul.f32 1.442695, %v1240_v56  ;;  %v1270_v60 = vmul.f32 1.442695, %v1241_v54 }
 0x328   :  { %v1416_v26 = vsel %vm1290_vm5, %v1398_v25, 2.0  ;;  %v1484_v3 = vmul.f32 %v3765_v50, %v1448_v0  ;;  %v1224_v9 = vand.u32 2147483647, %v4673_v48  ;;  %v4695_v53 = vadd.f32 %v4593_v7, %v1185_v49 }
 0x329   :  { %v1327_v45 = vadd.f32 1.0, %v1309_v57  ;;  %v1399_v46 = vmul.f32 %v3763_v31, %v1309_v57  ;;  %v1434_v22 = vadd.f32 %v1416_v26, %v4677_v40  ;;  %v1363_v35 = vmul.f32 %v3763_v31, %v1345_v24  ;;  %v4704_v57 = vld [vmem:[%s5182_s1 + $0x20] sm:$0xff]  }
 0x32a   :  { %v3767_v10 = vpop.eup %3766  ;;  %3774 = vpow2.f32 %v1268_v29  ;;  %v1242_v17 = vsub.f32 0.0, %v1224_v9  ;;  %v4692_v61 = vpack.c.bf16 %v1485_v51, %v1484_v3  ;;  %v1225_v25 = vand.u32 2147483647, %v4695_v53 }
 0x32b   :  { %v1417_v43 = vsel %vm1291_vm7, %v1399_v46, 2.0  ;;  %3776 = vpow2.f32 %v1270_v60  ;;  %v1381_v20 = vsel %vm1291_vm7, %v1327_v45, %v1363_v35  ;;  %v1157_v27 = vpop.f32.mrb[64].mxu1  ;;  %v3769_v30 = vpop.eup %3768  ;;  %v1486_v13 = vmul.f32 %v3767_v10, %v1450_v36 }
 0x32c   :  { %v1435_v32 = vadd.f32 %v1417_v43, %v1381_v20  ;;  %v3416_v19 = vpop.f32.mrb[65].mxu1  ;;  %3778 = vrcp.f32 %v1434_v22  ;;  %v1310_v0 = vmul.f32 2.0, %v3769_v30  ;;  %v1346_v6 = vadd.f32 2.0, %v3769_v30  ;;  %3424 = vmatprep.mubr.msk.bf16.mxu0 %vm604_vm6, %v4692_v61 }
 0x32d   :  { %v3771_v11 = vpop.eup %3770  ;;  %v1160_v8 = vpop.f32.mrb[66].mxu1  ;;  %v1272_v5 = vmul.f32 1.442695, %v1242_v17  ;;  %v1186_v31 = vadd.f32 %v1157_v27, %v4379_v62  ;;  %v1453_v46 = vmul.f32 %v1381_v20, %v4632_v59  ;;  %vm1295_vm11 = vcmp.ge.f32.partialorder %v4662_v28, 0.0 }
 0x32e   :  { %v3773_v34 = vpop.eup %3772  ;;  %v1487_v42 = vmul.f32 %v3771_v11, %v1451_v21  ;;  %3780 = vrcp.f32 %v1435_v32  ;;  %v3417_v51 = vpop.f32.mrb[67].mxu1  ;;  %v1328_v56 = vadd.f32 1.0, %v1310_v0  ;;  %v1364_v54 = vmul.f32 %v3769_v30, %v1346_v6 }
 0x32f   :  { %v1400_v55 = vmul.f32 %v3769_v30, %v1310_v0  ;;  %v1311_v16 = vmul.f32 2.0, %v3773_v34  ;;  %v1347_v4 = vadd.f32 2.0, %v3773_v34  ;;  %3782 = vpow2.f32 %v1272_v5 }
 0x330   :  { %v1504_v39 = vpack.c.bf16 %v1487_v42, %v1486_v13  ;;  %v4708_v37 = vsel %vm1292_vm8, %v1328_v56, %v1364_v54  ;;  %v1187_v26 = vadd.f32 %v1160_v8, %v4375_v52  ;;  %v1243_v36 = vsub.f32 0.0, %v1225_v25 }
 0x331   :  { %v1418_v62 = vsel %vm1292_vm8, %v1400_v55, 2.0  ;;  %v1329_v50 = vadd.f32 1.0, %v1311_v16  ;;  %v1401_v24 = vmul.f32 %v3773_v34, %v1311_v16  ;;  %v1365_v60 = vmul.f32 %v3773_v34, %v1347_v4 }
 0x332   :  { %v1436_v29 = vadd.f32 %v1418_v62, %v4708_v37  ;;  %3425 = vmatmul.mubr.msk.bf16.vlgmr.msra.gmra.mrb[36].mxu0 %vm604_vm6, %v1504_v39  ;;  %v4724_v9 = vadd.f32 %v4593_v7, %v1186_v31  ;;  %v4728_v32 = vadd.f32 %v4593_v7, %v1187_v26  ;;  %v1274_v5 = vmul.f32 1.442695, %v1243_v36 }
 0x333   :  { %v1419_v10 = vsel %vm1293_vm9, %v1401_v24, 2.0  ;;  %v1165_v22 = vpop.f32.mrb[68].mxu1  ;;  %3433 = vmatpush3.bf16.msra.mxu0 %v4586_v58  ;;  %v1383_v3 = vsel %vm1293_vm9, %v1329_v50, %v1365_v60  ;;  %v1452_v51 = vmul.f32 %v4677_v40, %v4627_v23  ;;  %vm1296_vm12 = vcmp.ge.f32.partialorder %v4673_v48, 0.0 }
 0x334   :  { %v3775_v45 = vpop.eup %3774  ;;  %v3420_v21 = vpop.f32.mrb[69].mxu1  ;;  %3442 = vmatprep.subr.bf16.mxu0 %v4704_v57  ;;  %3784 = vrcp.f32 %v1436_v29  ;;  %v1437_v59 = vadd.f32 %v1419_v10, %v1383_v3  ;;  %v1226_v31 = vand.u32 2147483647, %v4724_v9  ;;  %v1227_v23 = vand.u32 2147483647, %v4728_v32 }
 0x335   :  { %v3777_v35 = vpop.eup %3776  ;;  %v1312_v43 = vmul.f32 2.0, %v3775_v45  ;;  %v1348_v52 = vadd.f32 2.0, %v3775_v45  ;;  %v1168_v27 = vpop.f32.mrb[70].mxu1  ;;  %v1454_v21 = vmul.f32 %v4708_v37, %v4644_v18  ;;  %vm1297_vm13 = vcmp.ge.f32.partialorder %v4695_v53, 0.0 }
 0x336   :  { %v1313_v20 = vmul.f32 2.0, %v3777_v35  ;;  %v1349_v49 = vadd.f32 2.0, %v3777_v35  ;;  %v3421_v17 = vpop.f32.mrb[71].mxu1  ;;  %v3779_v19 = vpop.eup %3778  ;;  %3786 = vrcp.f32 %v1437_v59  ;;  %v1244_v4 = vsub.f32 0.0, %v1226_v31 }
 0x337   :  { %v1330_v30 = vadd.f32 1.0, %v1312_v43  ;;  %v1366_v13 = vmul.f32 %v3775_v45, %v1348_v52  ;;  %v1402_v58 = vmul.f32 %v3775_v45, %v1312_v43  ;;  %3788 = vpow2.f32 %v1274_v5 }
 0x338   :  { %v1331_v11 = vadd.f32 1.0, %v1313_v20  ;;  %v1367_v0 = vmul.f32 %v3777_v35, %v1349_v49  ;;  %v1403_v6 = vmul.f32 %v3777_v35, %v1313_v20  ;;  %v3781_v8 = vpop.eup %3780  ;;  %v1488_v24 = vmul.f32 %v3779_v19, %v1452_v51 }
 0x339   :  { %v1384_v34 = vsel %vm1294_vm10, %v1330_v30, %v1366_v13  ;;  %v1420_v42 = vsel %vm1294_vm10, %v1402_v58, 2.0  ;;  %v3783_v55 = vpop.eup %3782  ;;  %v1489_v16 = vmul.f32 %v3781_v8, %v1453_v46  ;;  %v1276_v29 = vmul.f32 1.442695, %v1244_v4 }
 0x33a   :  { %v1438_v56 = vadd.f32 %v1420_v42, %v1384_v34  ;;  %v1385_v54 = vsel %vm1295_vm11, %v1331_v11, %v1367_v0  ;;  %v1421_v39 = vsel %vm1295_vm11, %v1403_v6, 2.0  ;;  %v1314_v62 = vmul.f32 2.0, %v3783_v55 }
 0x33b   :  { %v1439_v25 = vadd.f32 %v1421_v39, %v1385_v54  ;;  %v1350_v50 = vadd.f32 2.0, %v3783_v55  ;;  %v1245_v45 = vsub.f32 0.0, %v1227_v23  ;;  %v1188_v46 = vadd.f32 %v1165_v22, %v4390_v44 }
 0x33c   :  { %3790 = vrcp.f32 %v1438_v56  ;;  %v1332_v40 = vadd.f32 1.0, %v1314_v62  ;;  %v1404_v26 = vmul.f32 %v3783_v55, %v1314_v62  ;;  %v1189_v10 = vadd.f32 %v1168_v27, %v4386_v47 }
 0x33d   :  { %3792 = vrcp.f32 %v1439_v25  ;;  %v1368_v60 = vmul.f32 %v3783_v55, %v1350_v50  ;;  %v4747_v52 = vpack.c.bf16 %v1489_v16, %v1488_v24  ;;  %v1455_v59 = vmul.f32 %v1383_v3, %v4647_v15 }
 0x33e   :  { %3794 = vpow2.f32 %v1276_v29  ;;  %v3785_v36 = vpop.eup %3784  ;;  %v1422_v43 = vsel %vm1296_vm12, %v1404_v26, 2.0  ;;  %v1278_v20 = vmul.f32 1.442695, %v1245_v45  ;;  %v4753_v49 = vadd.f32 %v4593_v7, %v1188_v46 }
 0x33f   :  { %v4745_v35 = vsel %vm1296_vm12, %v1332_v40, %v1368_v60  ;;  %v4756_v44 = vadd.f32 %v4593_v7, %v1189_v10  ;;  %v1490_v47 = vmul.f32 %v3785_v36, %v1454_v21  ;;  %v1456_v7 = vmul.f32 %v1384_v34, %v4659_v2 }
 0x340   :  { %v3787_v30 = vpop.eup %3786  ;;  %v1440_v27 = vadd.f32 %v1422_v43, %v4745_v35  ;;  %v1228_v13 = vand.u32 2147483647, %v4753_v49  ;;  %3796 = vpow2.f32 %v1278_v20  ;;  %v1457_v0 = vmul.f32 %v1385_v54, %v4662_v28  ;;  %v3582_v20 = vld [vmem:[%s5182_s1 + $0x28] sm:$0xff]  }
 0x341   :  { %v1491_v22 = vmul.f32 %v3787_v30, %v1455_v59  ;;  %v1229_v58 = vand.u32 2147483647, %v4756_v44  ;;  %v3789_v18 = vpop.eup %3788  ;;  %vm1298_vm14 = vcmp.ge.f32.partialorder %v4724_v9, 0.0  ;;  %vm1299_vm15 = vcmp.ge.f32.partialorder %v4728_v32, 0.0 }
 0x342   :  { %v1246_v37 = vsub.f32 0.0, %v1228_v13  ;;  %v1315_v17 = vmul.f32 2.0, %v3789_v18  ;;  %v1351_v19 = vadd.f32 2.0, %v3789_v18  ;;  %3798 = vrcp.f32 %v1440_v27 }
 0x343   :  { %v4761_v15 = vpack.c.bf16 %v1491_v22, %v1490_v47  ;;  %v1247_v11 = vsub.f32 0.0, %v1229_v58  ;;  %v1458_v47 = vmul.f32 %v4745_v35, %v4673_v48  ;;  %vm1300_vm2 = vcmp.ge.f32.partialorder %v4753_v49, 0.0 }
 0x344   :  { %v1280_v6 = vmul.f32 1.442695, %v1246_v37  ;;  %v1333_v42 = vadd.f32 1.0, %v1315_v17  ;;  %v1369_v5 = vmul.f32 %v3789_v18, %v1351_v19  ;;  %v1405_v31 = vmul.f32 %v3789_v18, %v1315_v17 }
 0x345   :  { %3428 = vmatprep.mubr.msk.bf16.mxu0 %vm604_vm6, %v4761_v15  ;;  %v1282_v51 = vmul.f32 1.442695, %v1247_v11  ;;  %vm1301_vm3 = vcmp.ge.f32.partialorder %v4756_v44, 0.0 }
 0x346   :  { %v3791_v3 = vpop.eup %3790  ;;  %3800 = vpow2.f32 %v1280_v6  ;;  %v1387_v39 = vsel %vm1297_vm13, %v1333_v42, %v1369_v5  ;;  %v1423_v2 = vsel %vm1297_vm13, %v1405_v31, 2.0 }
 0x347   :  { %v3793_v8 = vpop.eup %3792  ;;  %v1492_v55 = vmul.f32 %v3791_v3, %v1456_v7  ;;  %v1441_v54 = vadd.f32 %v1423_v2, %v1387_v39  ;;  %3802 = vpow2.f32 %v1282_v51  ;;  %v1459_v22 = vmul.f32 %v1387_v39, %v4695_v53 }
 0x348   :  { %v3795_v56 = vpop.eup %3794  ;;  %v1493_v16 = vmul.f32 %v3793_v8, %v1457_v0 }
 0x349   :  { %v1316_v34 = vmul.f32 2.0, %v3795_v56  ;;  %v1352_v28 = vadd.f32 2.0, %v3795_v56  ;;  %3804 = vrcp.f32 %v1441_v54 }
 0x34a   :  { %v4768_v4 = vpack.c.bf16 %v1493_v16, %v1492_v55  ;;  %v3797_v24 = vpop.eup %3796 }
 0x34b   :  { %v1334_v25 = vadd.f32 1.0, %v1316_v34  ;;  %v1370_v62 = vmul.f32 %v3795_v56, %v1352_v28  ;;  %v1406_v50 = vmul.f32 %v3795_v56, %v1316_v34  ;;  %v1317_v40 = vmul.f32 2.0, %v3797_v24 }
 0x34c   :  { %3429 = vmatmul.mubr.msk.bf16.gmra.mrb[40].mxu0 %vm604_vm6, %v4768_v4  ;;  %v1353_v60 = vadd.f32 2.0, %v3797_v24  ;;  %v3799_v45 = vpop.eup %3798 }
 0x34d   :  { %v1388_v29 = vsel %vm1298_vm14, %v1334_v25, %v1370_v62  ;;  %v1424_v23 = vsel %vm1298_vm14, %v1406_v50, 2.0  ;;  %3434 = vmatprep.mubr.msk.bf16.mxu0 %vm604_vm6, %v1500_v12  ;;  %v1335_v46 = vadd.f32 1.0, %v1317_v40  ;;  %v1407_v36 = vmul.f32 %v3797_v24, %v1317_v40 }
 0x34e   :  { %v1442_v26 = vadd.f32 %v1424_v23, %v1388_v29  ;;  %v1371_v10 = vmul.f32 %v3797_v24, %v1353_v60  ;;  %v1494_v48 = vmul.f32 %v3799_v45, %v1458_v47  ;;  %v1460_v5 = vmul.f32 %v1388_v29, %v4724_v9 }
 0x34f   :  { %v1425_v59 = vsel %vm1299_vm15, %v1407_v36, 2.0 }
 0x350   :  { %v3801_v43 = vpop.eup %3800  ;;  %v1389_v21 = vsel %vm1299_vm15, %v1335_v46, %v1371_v10  ;;  %3806 = vrcp.f32 %v1442_v26 }
 0x351   :  { %v1443_v14 = vadd.f32 %v1425_v59, %v1389_v21  ;;  %v1318_v63 = vmul.f32 2.0, %v3801_v43  ;;  %v1354_v12 = vadd.f32 2.0, %v3801_v43  ;;  %v3803_v30 = vpop.eup %3802  ;;  %v1461_v31 = vmul.f32 %v1389_v21, %v4728_v32 }
 0x352   :  { %v1319_v37 = vmul.f32 2.0, %v3803_v30  ;;  %v1355_v3 = vadd.f32 2.0, %v3803_v30 }
 0x353   :  { %3808 = vrcp.f32 %v1443_v14  ;;  %v1336_v27 = vadd.f32 1.0, %v1318_v63  ;;  %v1372_v13 = vmul.f32 %v3801_v43, %v1354_v12  ;;  %v1408_v58 = vmul.f32 %v3801_v43, %v1318_v63  ;;  %v3805_v18 = vpop.eup %3804 }
 0x354   :  { %3435 = vmatmul.mubr.msk.bf16.vlgmr.msra.gmra.mrb[36].mxu0 %vm604_vm6, %v4692_v61  ;;  %v1495_v53 = vmul.f32 %v3805_v18, %v1459_v22  ;;  %v1337_v19 = vadd.f32 1.0, %v1319_v37  ;;  %v1373_v11 = vmul.f32 %v3803_v30, %v1355_v3  ;;  %v1409_v7 = vmul.f32 %v3803_v30, %v1319_v37 }
 0x355   :  { %3443 = vmatpush3.bf16.msra.mxu0 %v4704_v57  ;;  %3438 = vmatprep.mubr.msk.bf16.mxu0 %vm604_vm6, %v4747_v52  ;;  %v1390_v35 = vsel %vm1300_vm2, %v1336_v27, %v1372_v13  ;;  %v1426_v17 = vsel %vm1300_vm2, %v1408_v58, 2.0 }
 0x356   :  { %3452 = vmatprep.subr.bf16.mxu0 %v3582_v20  ;;  %v1444_v61 = vadd.f32 %v1426_v17, %v1390_v35  ;;  %v1666_v57 = vpack.c.bf16 %v1495_v53, %v1494_v48  ;;  %v1391_v0 = vsel %vm1301_vm3, %v1337_v19, %v1373_v11  ;;  %v1427_v6 = vsel %vm1301_vm3, %v1409_v7, 2.0 }
 0x357   :  { %v1445_v8 = vadd.f32 %v1427_v6, %v1391_v0  ;;  %v1462_v2 = vmul.f32 %v1390_v35, %v4753_v49  ;;  %v3583_v49 = vld [vmem:[%s5182_s1 + $0x58] sm:$0xff]  }
 0x358   :  { %3810 = vrcp.f32 %v1444_v61 }
 0x359   :  { %3812 = vrcp.f32 %v1445_v8 }
 0x35a   :  { %v3807_v42 = vpop.eup %3806 }
 0x35b   :  { %v1496_v56 = vmul.f32 %v3807_v42, %v1460_v5 }
 0x35c   :  { %3439 = vmatmul.mubr.msk.bf16.gmra.mrb[40].mxu0 %vm604_vm6, %v4761_v15 }
 0x35d   :  { %3444 = vmatprep.mubr.msk.bf16.mxu0 %vm604_vm6, %v4747_v52  ;;  %v3809_v51 = vpop.eup %3808  ;;  %v1463_v52 = vmul.f32 %v1391_v0, %v4756_v44  ;;  %v3584_v44 = vld [vmem:[%s5182_s1 + $0x70] sm:$0xff]  }
 0x35e   :  { %v1497_v55 = vmul.f32 %v3809_v51, %v1461_v31  ;;  %3472 = vmatprep.subr.bf16.mxu1 %v3584_v44 }
 0x35f   :  { %3473 = vmatpush3.bf16.msra.mxu1 %v3584_v44 }
 0x360   :  { %v1667_v16 = vpack.c.bf16 %v1497_v55, %v1496_v56  ;;  %3488 = vmatprep.subr.bf16.mxu1 %v3958_v1 }
 0x362   :  { %v3811_v39 = vpop.eup %3810 }
 0x363   :  { %v3813_v34 = vpop.eup %3812  ;;  %v1498_v9 = vmul.f32 %v3811_v39, %v1462_v2 }
 0x364   :  { %3445 = vmatmul.mubr.msk.bf16.vlgmr.msra.gmra.mrb[36].mxu0 %vm604_vm6, %v4761_v15  ;;  %v1499_v28 = vmul.f32 %v3813_v34, %v1463_v52 }
 0x365   :  { %3453 = vmatpush3.bf16.msra.mxu0 %v3582_v20  ;;  %3448 = vmatprep.mubr.msk.bf16.mxu0 %vm604_vm6, %v1666_v57 }
 0x366   :  { %v1753_v32 = vpack.c.bf16 %v1499_v28, %v1498_v9  ;;  %3462 = vmatprep.subr.bf16.mxu0 %v3583_v49 }
 0x36c   :  { %3449 = vmatmul.mubr.msk.bf16.gmra.mrb[40].mxu0 %vm604_vm6, %v1667_v16 }
 0x36d   :  { %3454 = vmatprep.mubr.msk.bf16.mxu0 %vm604_vm6, %v4761_v15  ;;  %v81_v15 = vld [vmem:[%s5183_s2 + $0x8] sm:$0xff] }
 0x36e   :  { %v1839_v54 = vrot.slane %v81_v15, %v4077_v33 }
 0x374   :  { %3455 = vmatmul.mubr.msk.bf16.vlgmr.msra.gmra.mrb[36].mxu0 %vm604_vm6, %v4768_v4 }
 0x375   :  { %3458 = vmatprep.mubr.msk.bf16.mxu0 %vm604_vm6, %v1667_v16  ;;  %3463 = vmatpush3.bf16.msra.mxu0 %v3583_v49 }
 0x376   :  { %3482 = vmatprep.subr.bf16.mxu0 %v3958_v1 }
 0x37c   :  { %3459 = vmatmul.mubr.msk.bf16.gmra.mrb[40].mxu0 %vm604_vm6, %v1753_v32 }
 0x447   :  { %v3456_v4 = vpop.f32.mrb[36].mxu0 }
 0x448   :  { %v1842_v25 = vadd.f32 %v3456_v4, %v1839_v54  ;;  %v1797_v62 = vpop.f32.mrb[37].mxu0 }
 0x449   :  { %v1840_v50 = vadd.f32 %v1839_v54, %v1797_v62  ;;  %v3457_v24 = vpop.f32.mrb[38].mxu0 }
 0x44a   :  { %v1850_v29 = vmul.f32 %v1842_v25, %v4092_v38  ;;  %v1843_v23 = vadd.f32 %v3457_v24, %v1839_v54  ;;  %v1800_v40 = vpop.f32.mrb[39].mxu0 }
 0x44b   :  { %v1848_v60 = vmul.f32 %v1840_v50, %v4092_v38  ;;  %v1841_v26 = vadd.f32 %v1839_v54, %v1800_v40 }
 0x44c   :  { %v4824_v45 = vadd.f32 %v1850_v29, %v4096_v41  ;;  %v1851_v46 = vmul.f32 %v1843_v23, %v4092_v38 }
 0x44d   :  { %v4828_v10 = vadd.f32 %v1848_v60, %v4096_v41  ;;  %v1849_v36 = vmul.f32 %v1841_v26, %v4092_v38 }
 0x44e   :  { %v1866_v43 = vand.u32 2147483647, %v4824_v45  ;;  %v4833_v21 = vadd.f32 %v1851_v46, %v4096_v41  ;;  %vm1898_vm4 = vcmp.ge.f32.partialorder %v4824_v45, 0.0 }
 0x44f   :  { %v1864_v59 = vand.u32 2147483647, %v4828_v10  ;;  %v4837_v20 = vadd.f32 %v1849_v36, %v4096_v41  ;;  %v3460_v14 = vpop.f32.mrb[40].mxu0  ;;  %vm1896_vm5 = vcmp.ge.f32.partialorder %v4828_v10, 0.0 }
 0x450   :  { %v1874_v63 = vsub.f32 0.0, %v1866_v43  ;;  %v1867_v12 = vand.u32 2147483647, %v4833_v21  ;;  %v1846_v30 = vadd.f32 %v3460_v14, %v1839_v54  ;;  %v1813_v47 = vpop.f32.mrb[41].mxu0  ;;  %vm1899_vm7 = vcmp.ge.f32.partialorder %v4833_v21, 0.0 }
 0x451   :  { %v1872_v22 = vsub.f32 0.0, %v1864_v59  ;;  %v1865_v27 = vand.u32 2147483647, %v4837_v20  ;;  %v1844_v13 = vadd.f32 %v1839_v54, %v1813_v47  ;;  %v3461_v58 = vpop.f32.mrb[42].mxu0  ;;  %vm1897_vm8 = vcmp.ge.f32.partialorder %v4837_v20, 0.0 }
 0x452   :  { %v1884_v18 = vmul.f32 1.442695, %v1874_v63  ;;  %v1875_v37 = vsub.f32 0.0, %v1867_v12  ;;  %v1854_v3 = vmul.f32 %v1846_v30, %v4092_v38  ;;  %v1847_v48 = vadd.f32 %v3461_v58, %v1839_v54  ;;  %v1816_v53 = vpop.f32.mrb[43].mxu0 }
 0x453   :  { %v1880_v35 = vmul.f32 1.442695, %v1872_v22  ;;  %v1873_v17 = vsub.f32 0.0, %v1865_v27  ;;  %v1852_v61 = vmul.f32 %v1844_v13, %v4092_v38  ;;  %v1845_v19 = vadd.f32 %v1839_v54, %v1816_v53 }
 0x454   :  { %3814 = vpow2.f32 %v1884_v18  ;;  %v1886_v11 = vmul.f32 1.442695, %v1875_v37  ;;  %v4844_v7 = vadd.f32 %v1854_v3, %v4096_v41  ;;  %v1855_v57 = vmul.f32 %v1847_v48, %v4092_v38 }
 0x455   :  { %3816 = vpow2.f32 %v1880_v35  ;;  %v1882_v0 = vmul.f32 1.442695, %v1873_v17  ;;  %v4848_v6 = vadd.f32 %v1852_v61, %v4096_v41  ;;  %v1853_v8 = vmul.f32 %v1845_v19, %v4092_v38 }
 0x456   :  { %3818 = vpow2.f32 %v1886_v11  ;;  %v1870_v42 = vand.u32 2147483647, %v4844_v7  ;;  %v4853_v5 = vadd.f32 %v1855_v57, %v4096_v41  ;;  %vm1902_vm9 = vcmp.ge.f32.partialorder %v4844_v7, 0.0 }
 0x457   :  { %v1868_v31 = vand.u32 2147483647, %v4848_v6  ;;  %v4857_v51 = vadd.f32 %v1853_v8, %v4096_v41  ;;  %3820 = vpow2.f32 %v1882_v0  ;;  %vm1900_vm10 = vcmp.ge.f32.partialorder %v4848_v6, 0.0 }
 0x458   :  { %v1878_v56 = vsub.f32 0.0, %v1870_v42  ;;  %v1871_v55 = vand.u32 2147483647, %v4853_v5  ;;  %vm1903_vm11 = vcmp.ge.f32.partialorder %v4853_v5, 0.0 }
 0x459   :  { %v1876_v16 = vsub.f32 0.0, %v1868_v31  ;;  %v1869_v39 = vand.u32 2147483647, %v4857_v51  ;;  %vm1901_vm12 = vcmp.ge.f32.partialorder %v4857_v51, 0.0 }
 0x45a   :  { %v1892_v2 = vmul.f32 1.442695, %v1878_v56  ;;  %v1879_v38 = vsub.f32 0.0, %v1871_v55 }
 0x45b   :  { %v1888_v52 = vmul.f32 1.442695, %v1876_v16  ;;  %v1877_v34 = vsub.f32 0.0, %v1869_v39 }
 0x45c   :  { %3822 = vpow2.f32 %v1892_v2  ;;  %v1894_v9 = vmul.f32 1.442695, %v1879_v38 }
 0x45d   :  { %3824 = vpow2.f32 %v1888_v52  ;;  %v1890_v28 = vmul.f32 1.442695, %v1877_v34 }
 0x45e   :  { %v3815_v32 = vpop.eup %3814  ;;  %3826 = vpow2.f32 %v1894_v9 }
 0x45f   :  { %v3817_v49 = vpop.eup %3816  ;;  %v1906_v41 = vmul.f32 2.0, %v3815_v32  ;;  %v1922_v44 = vadd.f32 2.0, %v3815_v32  ;;  %3828 = vpow2.f32 %v1890_v28 }
 0x460   :  { %v3819_v15 = vpop.eup %3818  ;;  %v1904_v54 = vmul.f32 2.0, %v3817_v49  ;;  %v1920_v4 = vadd.f32 2.0, %v3817_v49 }
 0x461   :  { %v1914_v25 = vadd.f32 1.0, %v1906_v41  ;;  %v1930_v62 = vmul.f32 %v3815_v32, %v1922_v44  ;;  %v1946_v50 = vmul.f32 %v3815_v32, %v1906_v41  ;;  %v1907_v24 = vmul.f32 2.0, %v3819_v15  ;;  %v3821_v26 = vpop.eup %3820 }
 0x462   :  { %v1912_v29 = vadd.f32 1.0, %v1904_v54  ;;  %v1928_v23 = vmul.f32 %v3817_v49, %v1920_v4  ;;  %v1944_v40 = vmul.f32 %v3817_v49, %v1904_v54  ;;  %v1923_v60 = vadd.f32 2.0, %v3819_v15 }
 0x463   :  { %v4865_v46 = vsel %vm1898_vm4, %v1914_v25, %v1930_v62  ;;  %v1954_v36 = vsel %vm1898_vm4, %v1946_v50, 2.0  ;;  %v1915_v43 = vadd.f32 1.0, %v1907_v24  ;;  %v1947_v59 = vmul.f32 %v3819_v15, %v1907_v24 }
 0x464   :  { %v1962_v14 = vadd.f32 %v1954_v36, %v4865_v46  ;;  %v4872_v63 = vsel %vm1896_vm5, %v1912_v29, %v1928_v23  ;;  %v1952_v12 = vsel %vm1896_vm5, %v1944_v40, 2.0  ;;  %v1931_v30 = vmul.f32 %v3819_v15, %v1923_v60 }
 0x465   :  { %v1955_v47 = vsel %vm1899_vm7, %v1947_v59, 2.0  ;;  %v1960_v27 = vadd.f32 %v1952_v12, %v4872_v63  ;;  %v1905_v13 = vmul.f32 2.0, %v3821_v26  ;;  %v1921_v58 = vadd.f32 2.0, %v3821_v26 }
 0x466   :  { %v3823_v22 = vpop.eup %3822  ;;  %v1939_v37 = vsel %vm1899_vm7, %v1915_v43, %v1931_v30  ;;  %3830 = vrcp.f32 %v1962_v14 }
 0x467   :  { %v3825_v18 = vpop.eup %3824  ;;  %v1910_v3 = vmul.f32 2.0, %v3823_v22  ;;  %v1926_v48 = vadd.f32 2.0, %v3823_v22  ;;  %v1963_v53 = vadd.f32 %v1955_v47, %v1939_v37  ;;  %v1913_v35 = vadd.f32 1.0, %v1905_v13 }
 0x468   :  { %v1929_v17 = vmul.f32 %v3821_v26, %v1921_v58  ;;  %v3827_v61 = vpop.eup %3826  ;;  %v1945_v19 = vmul.f32 %v3821_v26, %v1905_v13  ;;  %3832 = vrcp.f32 %v1960_v27  ;;  %v1908_v31 = vmul.f32 2.0, %v3825_v18 }
 0x469   :  { %v1918_v11 = vadd.f32 1.0, %v1910_v3  ;;  %v1934_v57 = vmul.f32 %v3823_v22, %v1926_v48  ;;  %v1950_v0 = vmul.f32 %v3823_v22, %v1910_v3  ;;  %v3829_v8 = vpop.eup %3828  ;;  %v1924_v56 = vadd.f32 2.0, %v3825_v18 }
 0x46a   :  { %v1937_v42 = vsel %vm1897_vm8, %v1913_v35, %v1929_v17  ;;  %3834 = vrcp.f32 %v1963_v53  ;;  %v1953_v55 = vsel %vm1897_vm8, %v1945_v19, 2.0  ;;  %v1916_v38 = vadd.f32 1.0, %v1908_v31 }
 0x46b   :  { %v1961_v16 = vadd.f32 %v1953_v55, %v1937_v42  ;;  %v1942_v39 = vsel %vm1902_vm9, %v1918_v11, %v1934_v57  ;;  %v1958_v2 = vsel %vm1902_vm9, %v1950_v0, 2.0  ;;  %v1932_v52 = vmul.f32 %v3825_v18, %v1924_v56 }
 0x46c   :  { %v1948_v34 = vmul.f32 %v3825_v18, %v1908_v31  ;;  %v1911_v9 = vmul.f32 2.0, %v3827_v61  ;;  %v1927_v28 = vadd.f32 2.0, %v3827_v61  ;;  %v1909_v32 = vmul.f32 2.0, %v3829_v8 }
 0x46d   :  { %3836 = vrcp.f32 %v1961_v16  ;;  %v1925_v49 = vadd.f32 2.0, %v3829_v8  ;;  %v1966_v41 = vadd.f32 %v1958_v2, %v1942_v39  ;;  %v1940_v44 = vsel %vm1900_vm10, %v1916_v38, %v1932_v52 }
 0x46e   :  { %v1956_v15 = vsel %vm1900_vm10, %v1948_v34, 2.0  ;;  %v1919_v54 = vadd.f32 1.0, %v1911_v9  ;;  %v1935_v25 = vmul.f32 %v3827_v61, %v1927_v28  ;;  %v1951_v62 = vmul.f32 %v3827_v61, %v1911_v9 }
 0x46f   :  { %v1964_v4 = vadd.f32 %v1956_v15, %v1940_v44  ;;  %v1917_v50 = vadd.f32 1.0, %v1909_v32  ;;  %v1933_v24 = vmul.f32 %v3829_v8, %v1925_v49  ;;  %v1949_v29 = vmul.f32 %v3829_v8, %v1909_v32 }
 0x470   :  { %v3831_v23 = vpop.eup %3830  ;;  %v1943_v40 = vsel %vm1903_vm11, %v1919_v54, %v1935_v25  ;;  %v1959_v60 = vsel %vm1903_vm11, %v1951_v62, 2.0  ;;  %3838 = vrcp.f32 %v1966_v41  ;;  %v1971_v30 = vmul.f32 %v1939_v37, %v4833_v21 }
 0x471   :  { %v1967_v26 = vadd.f32 %v1959_v60, %v1943_v40  ;;  %v1941_v36 = vsel %vm1901_vm12, %v1917_v50, %v1933_v24  ;;  %v1957_v43 = vsel %vm1901_vm12, %v1949_v29, 2.0  ;;  %3840 = vrcp.f32 %v1964_v4 }
 0x472   :  { %v3833_v59 = vpop.eup %3832  ;;  %v1965_v14 = vadd.f32 %v1957_v43, %v1941_v36  ;;  %v1968_v47 = vmul.f32 %v4872_v63, %v4828_v10  ;;  %v1969_v22 = vmul.f32 %v1937_v42, %v4837_v20  ;;  %v1970_v13 = vmul.f32 %v4865_v46, %v4824_v45 }
 0x473   :  { %3842 = vrcp.f32 %v1967_v26  ;;  %v1975_v45 = vmul.f32 %v1943_v40, %v4853_v5  ;;  %v1972_v37 = vmul.f32 %v1940_v44, %v4848_v6  ;;  %v1973_v53 = vmul.f32 %v1941_v36, %v4857_v51 }
 0x474   :  { %v3835_v12 = vpop.eup %3834  ;;  %3844 = vrcp.f32 %v1965_v14  ;;  %v4895_v18 = vmul.f32 %v3833_v59, %v1968_v47  ;;  %v4899_v48 = vmul.f32 %v3831_v23, %v1970_v13  ;;  %v1974_v17 = vmul.f32 %v1942_v39, %v4844_v7  ;;  %v86_v7 = vld [vmem:[%s5183_s2 + $0x30] sm:$0xff] }
 0x475   :  { %v4893_v58 = vmul.f32 %v3835_v12, %v1971_v30  ;;  %v1999_v6 = vrot.slane %v86_v7, %v4077_v33 }
 0x477   :  { %v3837_v27 = vpop.eup %3836  ;;  %v1993_v10 = vpack.c.bf16 %v4893_v58, %v4899_v48 }
 0x478   :  { %v4897_v3 = vmul.f32 %v3837_v27, %v1969_v22 }
 0x47a   :  { %v1992_v21 = vpack.c.bf16 %v4897_v3, %v4895_v18  ;;  %v3839_v63 = vpop.eup %3838 }
 0x47b   :  { %v3841_v20 = vpop.eup %3840  ;;  %v4917_v57 = vmul.f32 %v3839_v63, %v1974_v17 }
 0x47c   :  { %3464 = vmatprep.mubr.msk.bf16.mxu0 %vm604_vm6, %v1992_v21  ;;  %v4913_v19 = vmul.f32 %v3841_v20, %v1972_v37 }
 0x47d   :  { %3465 = vmatmul.mubr.msk.bf16.vlgmr.msra.gmra.mrb[44].mxu0 %vm604_vm6, %v1993_v10  ;;  %v3843_v46 = vpop.eup %3842 }
 0x47e   :  { %v3845_v35 = vpop.eup %3844  ;;  %v4911_v61 = vmul.f32 %v3843_v46, %v1975_v45 }
 0x47f   :  { %v4915_v11 = vmul.f32 %v3845_v35, %v1973_v53 }
 0x480   :  { %v1995_v0 = vpack.c.bf16 %v4911_v61, %v4917_v57 }
 0x481   :  { %v1994_v5 = vpack.c.bf16 %v4915_v11, %v4913_v19 }
 0x483   :  { %3468 = vmatprep.mubr.msk.bf16.mxu0 %vm604_vm6, %v1994_v5 }
 0x485   :  { %3469 = vmatmul.mubr.msk.bf16.gmra.mrb[48].mxu0 %vm604_vm6, %v1995_v0 }
 0x486   :  { %3484 = vmatprep.mubr.msk.bf16.mxu0 %vm3959_vm0, %v3958_v1 }
 0x550   :  { %v3466_v51 = vpop.f32.mrb[44].mxu0 }
 0x551   :  { %v4931_v8 = vadd.f32 %v3466_v51, %v1999_v6  ;;  %v2052_v42 = vpop.f32.mrb[45].mxu0 }
 0x552   :  { %v4933_v31 = vadd.f32 %v2052_v42, %v1999_v6  ;;  %v3467_v56 = vpop.f32.mrb[46].mxu0 }
 0x553   :  { %v2085_v55 = vand.u32 2147483647, %v4931_v8  ;;  %v4936_v16 = vadd.f32 %v3467_v56, %v1999_v6  ;;  %v2055_v39 = vpop.f32.mrb[47].mxu0  ;;  %vm2117_vm13 = vcmp.ge.f32.partialorder %v4931_v8, 0.0 }
 0x554   :  { %v2083_v2 = vand.u32 2147483647, %v4933_v31  ;;  %v4939_v38 = vadd.f32 %v2055_v39, %v1999_v6  ;;  %vm2115_vm14 = vcmp.ge.f32.partialorder %v4933_v31, 0.0 }
 0x555   :  { %v2093_v52 = vsub.f32 0.0, %v2085_v55  ;;  %v2086_v34 = vand.u32 2147483647, %v4936_v16  ;;  %vm2118_vm15 = vcmp.ge.f32.partialorder %v4936_v16, 0.0 }
 0x556   :  { %v2091_v9 = vsub.f32 0.0, %v2083_v2  ;;  %v2084_v28 = vand.u32 2147483647, %v4939_v38  ;;  %vm2116_vm2 = vcmp.ge.f32.partialorder %v4939_v38, 0.0 }
 0x557   :  { %v2103_v32 = vmul.f32 1.442695, %v2093_v52  ;;  %v2094_v49 = vsub.f32 0.0, %v2086_v34 }
 0x558   :  { %v2099_v41 = vmul.f32 1.442695, %v2091_v9  ;;  %v2092_v44 = vsub.f32 0.0, %v2084_v28  ;;  %v3470_v15 = vpop.f32.mrb[48].mxu0 }
 0x559   :  { %3846 = vpow2.f32 %v2103_v32  ;;  %v2105_v54 = vmul.f32 1.442695, %v2094_v49  ;;  %v4943_v4 = vadd.f32 %v3470_v15, %v1999_v6  ;;  %v2068_v25 = vpop.f32.mrb[49].mxu0 }
 0x55a   :  { %3848 = vpow2.f32 %v2099_v41  ;;  %v2101_v62 = vmul.f32 1.442695, %v2092_v44  ;;  %v4945_v50 = vadd.f32 %v2068_v25, %v1999_v6  ;;  %v3471_v24 = vpop.f32.mrb[50].mxu0 }
 0x55b   :  { %3850 = vpow2.f32 %v2105_v54  ;;  %v2089_v29 = vand.u32 2147483647, %v4943_v4  ;;  %v4948_v23 = vadd.f32 %v3471_v24, %v1999_v6  ;;  %v2071_v40 = vpop.f32.mrb[51].mxu0  ;;  %vm2121_vm3 = vcmp.ge.f32.partialorder %v4943_v4, 0.0 }
 0x55c   :  { %v2087_v60 = vand.u32 2147483647, %v4945_v50  ;;  %v4951_v26 = vadd.f32 %v2071_v40, %v1999_v6  ;;  %3852 = vpow2.f32 %v2101_v62  ;;  %vm2119_vm4 = vcmp.ge.f32.partialorder %v4945_v50, 0.0 }
 0x55d   :  { %v2097_v36 = vsub.f32 0.0, %v2089_v29  ;;  %v2090_v43 = vand.u32 2147483647, %v4948_v23  ;;  %vm2122_vm5 = vcmp.ge.f32.partialorder %v4948_v23, 0.0 }
 0x55e   :  { %v2095_v59 = vsub.f32 0.0, %v2087_v60  ;;  %v2088_v14 = vand.u32 2147483647, %v4951_v26  ;;  %vm2120_vm7 = vcmp.ge.f32.partialorder %v4951_v26, 0.0 }
 0x55f   :  { %v2111_v12 = vmul.f32 1.442695, %v2097_v36  ;;  %v2098_v30 = vsub.f32 0.0, %v2090_v43 }
 0x560   :  { %v2107_v47 = vmul.f32 1.442695, %v2095_v59  ;;  %v2096_v22 = vsub.f32 0.0, %v2088_v14 }
 0x561   :  { %3854 = vpow2.f32 %v2111_v12  ;;  %v2113_v27 = vmul.f32 1.442695, %v2098_v30 }
 0x562   :  { %3856 = vpow2.f32 %v2107_v47  ;;  %v2109_v13 = vmul.f32 1.442695, %v2096_v22 }
 0x563   :  { %v3847_v21 = vpop.eup %3846  ;;  %3858 = vpow2.f32 %v2113_v27 }
 0x564   :  { %v3849_v10 = vpop.eup %3848  ;;  %v2125_v63 = vmul.f32 2.0, %v3847_v21  ;;  %v2141_v20 = vadd.f32 2.0, %v3847_v21  ;;  %3860 = vpow2.f32 %v2109_v13 }
 0x565   :  { %v3851_v45 = vpop.eup %3850  ;;  %v2123_v46 = vmul.f32 2.0, %v3849_v10  ;;  %v2139_v37 = vadd.f32 2.0, %v3849_v10 }
 0x566   :  { %v2133_v53 = vadd.f32 1.0, %v2125_v63  ;;  %v2149_v35 = vmul.f32 %v3847_v21, %v2141_v20  ;;  %v2165_v17 = vmul.f32 %v3847_v21, %v2125_v63  ;;  %v2126_v5 = vmul.f32 2.0, %v3851_v45  ;;  %v3853_v42 = vpop.eup %3852 }
 0x567   :  { %v2131_v0 = vadd.f32 1.0, %v2123_v46  ;;  %v2147_v7 = vmul.f32 %v3849_v10, %v2139_v37  ;;  %v2163_v6 = vmul.f32 %v3849_v10, %v2123_v46  ;;  %v2142_v51 = vadd.f32 2.0, %v3851_v45 }
 0x568   :  { %v2157_v56 = vsel %vm2117_vm13, %v2133_v53, %v2149_v35  ;;  %v2173_v55 = vsel %vm2117_vm13, %v2165_v17, 2.0  ;;  %v2134_v39 = vadd.f32 1.0, %v2126_v5  ;;  %v2166_v2 = vmul.f32 %v3851_v45, %v2126_v5 }
 0x569   :  { %v2181_v52 = vadd.f32 %v2173_v55, %v2157_v56  ;;  %v4963_v34 = vsel %vm2115_vm14, %v2131_v0, %v2147_v7  ;;  %v2171_v9 = vsel %vm2115_vm14, %v2163_v6, 2.0  ;;  %v2150_v28 = vmul.f32 %v3851_v45, %v2142_v51 }
 0x56a   :  { %v2174_v32 = vsel %vm2118_vm15, %v2166_v2, 2.0  ;;  %v2124_v41 = vmul.f32 2.0, %v3853_v42  ;;  %v2140_v44 = vadd.f32 2.0, %v3853_v42  ;;  %v2179_v54 = vadd.f32 %v2171_v9, %v4963_v34 }
 0x56b   :  { %v3855_v49 = vpop.eup %3854  ;;  %v2158_v25 = vsel %vm2118_vm15, %v2134_v39, %v2150_v28  ;;  %3862 = vrcp.f32 %v2181_v52  ;;  %v2189_v28 = vmul.f32 %v2157_v56, %v4931_v8 }
 0x56c   :  { %v3857_v15 = vpop.eup %3856  ;;  %v2129_v62 = vmul.f32 2.0, %v3855_v49  ;;  %v2145_v24 = vadd.f32 2.0, %v3855_v49  ;;  %v2182_v29 = vadd.f32 %v2174_v32, %v2158_v25  ;;  %v2132_v40 = vadd.f32 1.0, %v2124_v41 }
 0x56d   :  { %v2148_v60 = vmul.f32 %v3853_v42, %v2140_v44  ;;  %v3859_v36 = vpop.eup %3858  ;;  %v2164_v43 = vmul.f32 %v3853_v42, %v2124_v41  ;;  %v2127_v22 = vmul.f32 2.0, %v3857_v15  ;;  %v2143_v27 = vadd.f32 2.0, %v3857_v15 }
 0x56e   :  { %v2137_v59 = vadd.f32 1.0, %v2129_v62  ;;  %v2153_v14 = vmul.f32 %v3855_v49, %v2145_v24  ;;  %v2169_v12 = vmul.f32 %v3855_v49, %v2129_v62  ;;  %v3861_v30 = vpop.eup %3860  ;;  %3864 = vrcp.f32 %v2182_v29 }
 0x56f   :  { %v2156_v47 = vsel %vm2116_vm2, %v2132_v40, %v2148_v60  ;;  %3866 = vrcp.f32 %v2179_v54  ;;  %v2172_v13 = vsel %vm2116_vm2, %v2164_v43, 2.0  ;;  %v2135_v20 = vadd.f32 1.0, %v2127_v22 }
 0x570   :  { %v2180_v21 = vadd.f32 %v2172_v13, %v2156_v47  ;;  %v2161_v10 = vsel %vm2121_vm3, %v2137_v59, %v2153_v14  ;;  %v2177_v63 = vsel %vm2121_vm3, %v2169_v12, 2.0  ;;  %v2151_v45 = vmul.f32 %v3857_v15, %v2143_v27 }
 0x571   :  { %v2167_v46 = vmul.f32 %v3857_v15, %v2127_v22  ;;  %v2130_v37 = vmul.f32 2.0, %v3859_v36  ;;  %v2146_v53 = vadd.f32 2.0, %v3859_v36  ;;  %v2128_v35 = vmul.f32 2.0, %v3861_v30 }
 0x572   :  { %3868 = vrcp.f32 %v2180_v21  ;;  %v2144_v17 = vadd.f32 2.0, %v3861_v30  ;;  %v2185_v5 = vadd.f32 %v2177_v63, %v2161_v10  ;;  %v2159_v0 = vsel %vm2119_vm4, %v2135_v20, %v2151_v45 }
 0x573   :  { %v2175_v7 = vsel %vm2119_vm4, %v2167_v46, 2.0  ;;  %v2138_v6 = vadd.f32 1.0, %v2130_v37  ;;  %v2154_v42 = vmul.f32 %v3859_v36, %v2146_v53  ;;  %v2170_v55 = vmul.f32 %v3859_v36, %v2130_v37 }
 0x574   :  { %v2183_v51 = vadd.f32 %v2175_v7, %v2159_v0  ;;  %v2136_v39 = vadd.f32 1.0, %v2128_v35  ;;  %v2152_v2 = vmul.f32 %v3861_v30, %v2144_v17  ;;  %v2168_v52 = vmul.f32 %v3861_v30, %v2128_v35 }
 0x575   :  { %v3863_v9 = vpop.eup %3862  ;;  %v2190_v32 = vmul.f32 %v2158_v25, %v4936_v16  ;;  %v2162_v49 = vsel %vm2122_vm5, %v2138_v6, %v2154_v42  ;;  %v2178_v41 = vsel %vm2122_vm5, %v2170_v55, 2.0  ;;  %3870 = vrcp.f32 %v2185_v5 }
 0x576   :  { %v2186_v44 = vadd.f32 %v2178_v41, %v2162_v49  ;;  %v2160_v15 = vsel %vm2120_vm7, %v2136_v39, %v2152_v2  ;;  %v2176_v54 = vsel %vm2120_vm7, %v2168_v52, 2.0  ;;  %3872 = vrcp.f32 %v2183_v51 }
 0x577   :  { %v2184_v24 = vadd.f32 %v2176_v54, %v2160_v15  ;;  %v2205_v40 = vmul.f32 %v3863_v9, %v2189_v28  ;;  %v2187_v36 = vmul.f32 %v4963_v34, %v4933_v31  ;;  %v2188_v16 = vmul.f32 %v2156_v47, %v4939_v38 }
 0x578   :  { %v3865_v62 = vpop.eup %3864  ;;  %3874 = vrcp.f32 %v2186_v44  ;;  %v2193_v30 = vmul.f32 %v2161_v10, %v4943_v4  ;;  %v2194_v22 = vmul.f32 %v2162_v49, %v4948_v23  ;;  %v2191_v31 = vmul.f32 %v2159_v0, %v4945_v50  ;;  %v3585_v4 = vld [vmem:[%s5182_s1 + $0x38] sm:$0xff]   ;;  %v3586_v50 = vld [vmem:[%s5182_s1 + $0x30] sm:$0xff]   ;;  %v89_v23 = vld [vmem:[%s5183_s2 + $0x48] sm:$0xff] }
 0x579   :  { %v3867_v29 = vpop.eup %3866  ;;  %v2206_v60 = vmul.f32 %v3865_v62, %v2190_v32  ;;  %3876 = vrcp.f32 %v2184_v24  ;;  %v2192_v34 = vmul.f32 %v2160_v15, %v4951_v26  ;;  %3483 = vmatpush3.bf16.msra.mxu0 %v3585_v4  ;;  %v2309_v26 = vrot.slane %v89_v23, %v4077_v33 }
 0x57a   :  { %v2203_v25 = vmul.f32 %v3867_v29, %v2187_v36  ;;  %3494 = vmatprep.subr.bf16.mxu0 %v3958_v1 }
 0x57b   :  { %v2212_v8 = vpack.c.bf16 %v2206_v60, %v2205_v40 }
 0x57c   :  { %v3869_v56 = vpop.eup %3868 }
 0x57d   :  { %v2204_v43 = vmul.f32 %v3869_v56, %v2188_v16 }
 0x57f   :  { %v2211_v59 = vpack.c.bf16 %v2204_v43, %v2203_v25  ;;  %v3871_v14 = vpop.eup %3870 }
 0x580   :  { %v3873_v12 = vpop.eup %3872  ;;  %v2209_v47 = vmul.f32 %v3871_v14, %v2193_v30 }
 0x581   :  { %3474 = vmatprep.mubr.msk.bf16.mxu1 %vm604_vm6, %v2211_v59  ;;  %v2207_v21 = vmul.f32 %v3873_v12, %v2191_v31 }
 0x582   :  { %3475 = vmatmul.mubr.msk.bf16.vlgmr.msra.gmra.mrb[72].mxu1 %vm604_vm6, %v2212_v8  ;;  %v3875_v27 = vpop.eup %3874 }
 0x583   :  { %v3877_v38 = vpop.eup %3876  ;;  %v2210_v13 = vmul.f32 %v3875_v27, %v2194_v22  ;;  %3489 = vmatpush3.bf16.msra.mxu1 %v3586_v50 }
 0x584   :  { %v2208_v63 = vmul.f32 %v3877_v38, %v2192_v34  ;;  %3500 = vmatprep.subr.bf16.mxu1 %v3958_v1 }
 0x585   :  { %v2214_v20 = vpack.c.bf16 %v2210_v13, %v2209_v47 }
 0x586   :  { %v2213_v45 = vpack.c.bf16 %v2208_v63, %v2207_v21 }
 0x588   :  { %3478 = vmatprep.mubr.msk.bf16.mxu1 %vm604_vm6, %v2213_v45 }
 0x58a   :  { %3479 = vmatmul.mubr.msk.bf16.gmra.mrb[76].mxu1 %vm604_vm6, %v2214_v20 }
 0x58b   :  { %3490 = vmatprep.mubr.msk.bf16.mxu1 %vm3959_vm0, %v3958_v1 }
 0x655   :  { %v3476_v10 = vpop.f32.mrb[72].mxu1 }
 0x656   :  { %v2300_v46 = vadd.f32 %v3476_v10, %v4899_v48  ;;  %v2267_v37 = vpop.f32.mrb[73].mxu1 }
 0x657   :  { %v2298_v53 = vadd.f32 %v2267_v37, %v4895_v18  ;;  %v3477_v35 = vpop.f32.mrb[74].mxu1 }
 0x658   :  { %v5007_v17 = vadd.f32 %v2309_v26, %v2300_v46  ;;  %v2301_v5 = vadd.f32 %v3477_v35, %v4893_v58  ;;  %v2270_v0 = vpop.f32.mrb[75].mxu1 }
 0x659   :  { %v5010_v7 = vadd.f32 %v2309_v26, %v2298_v53  ;;  %v2299_v6 = vadd.f32 %v2270_v0, %v4897_v3 }
 0x65a   :  { %v2320_v51 = vand.u32 2147483647, %v5007_v17  ;;  %v5014_v42 = vadd.f32 %v2309_v26, %v2301_v5  ;;  %vm2352_vm8 = vcmp.ge.f32.partialorder %v5007_v17, 0.0 }
 0x65b   :  { %v2318_v55 = vand.u32 2147483647, %v5010_v7  ;;  %v5017_v48 = vadd.f32 %v2309_v26, %v2299_v6  ;;  %vm2350_vm9 = vcmp.ge.f32.partialorder %v5010_v7, 0.0 }
 0x65c   :  { %v2328_v39 = vsub.f32 0.0, %v2320_v51  ;;  %v2321_v18 = vand.u32 2147483647, %v5014_v42  ;;  %vm2353_vm10 = vcmp.ge.f32.partialorder %v5014_v42, 0.0 }
 0x65d   :  { %v2326_v2 = vsub.f32 0.0, %v2318_v55  ;;  %v2319_v52 = vand.u32 2147483647, %v5017_v48  ;;  %v3480_v58 = vpop.f32.mrb[76].mxu1  ;;  %vm2351_vm11 = vcmp.ge.f32.partialorder %v5017_v48, 0.0 }
 0x65e   :  { %v2338_v9 = vmul.f32 1.442695, %v2328_v39  ;;  %v2329_v28 = vsub.f32 0.0, %v2321_v18  ;;  %v2304_v32 = vadd.f32 %v3480_v58, %v4917_v57  ;;  %v2283_v3 = vpop.f32.mrb[77].mxu1 }
 0x65f   :  { %v2334_v49 = vmul.f32 1.442695, %v2326_v2  ;;  %v2327_v41 = vsub.f32 0.0, %v2319_v52  ;;  %v2302_v44 = vadd.f32 %v2283_v3, %v4913_v19  ;;  %v3481_v15 = vpop.f32.mrb[78].mxu1 }
 0x660   :  { %3878 = vpow2.f32 %v2338_v9  ;;  %v2340_v54 = vmul.f32 1.442695, %v2329_v28  ;;  %v5023_v62 = vadd.f32 %v2309_v26, %v2304_v32  ;;  %v2305_v24 = vadd.f32 %v3481_v15, %v4911_v61  ;;  %v2286_v29 = vpop.f32.mrb[79].mxu1 }
 0x661   :  { %3880 = vpow2.f32 %v2334_v49  ;;  %v2336_v40 = vmul.f32 1.442695, %v2327_v41  ;;  %v5026_v60 = vadd.f32 %v2309_v26, %v2302_v44  ;;  %v2303_v36 = vadd.f32 %v2286_v29, %v4915_v11 }
 0x662   :  { %3882 = vpow2.f32 %v2340_v54  ;;  %v2324_v57 = vand.u32 2147483647, %v5023_v62  ;;  %v5030_v8 = vadd.f32 %v2309_v26, %v2305_v24  ;;  %vm2356_vm12 = vcmp.ge.f32.partialorder %v5023_v62, 0.0 }
 0x663   :  { %v2322_v19 = vand.u32 2147483647, %v5026_v60  ;;  %v5033_v16 = vadd.f32 %v2309_v26, %v2303_v36  ;;  %3884 = vpow2.f32 %v2336_v40  ;;  %vm2354_vm13 = vcmp.ge.f32.partialorder %v5026_v60, 0.0 }
 0x664   :  { %v2332_v56 = vsub.f32 0.0, %v2324_v57  ;;  %v2325_v25 = vand.u32 2147483647, %v5030_v8  ;;  %vm2357_vm14 = vcmp.ge.f32.partialorder %v5030_v8, 0.0 }
 0x665   :  { %v2330_v61 = vsub.f32 0.0, %v2322_v19  ;;  %v2323_v43 = vand.u32 2147483647, %v5033_v16  ;;  %vm2355_vm15 = vcmp.ge.f32.partialorder %v5033_v16, 0.0 }
 0x666   :  { %v2346_v59 = vmul.f32 1.442695, %v2332_v56  ;;  %v2333_v14 = vsub.f32 0.0, %v2325_v25 }
 0x667   :  { %v2342_v12 = vmul.f32 1.442695, %v2330_v61  ;;  %v2331_v11 = vsub.f32 0.0, %v2323_v43 }
 0x668   :  { %3886 = vpow2.f32 %v2346_v59  ;;  %v2348_v30 = vmul.f32 1.442695, %v2333_v14 }
 0x669   :  { %3888 = vpow2.f32 %v2342_v12  ;;  %v2344_v22 = vmul.f32 1.442695, %v2331_v11 }
 0x66a   :  { %v3879_v27 = vpop.eup %3878  ;;  %3890 = vpow2.f32 %v2348_v30 }
 0x66b   :  { %v3881_v31 = vpop.eup %3880  ;;  %v2360_v34 = vmul.f32 2.0, %v3879_v27  ;;  %v2376_v38 = vadd.f32 2.0, %v3879_v27  ;;  %3892 = vpow2.f32 %v2344_v22 }
 0x66c   :  { %v3883_v47 = vpop.eup %3882  ;;  %v2358_v13 = vmul.f32 2.0, %v3881_v31  ;;  %v2374_v21 = vadd.f32 2.0, %v3881_v31 }
 0x66d   :  { %v2368_v63 = vadd.f32 1.0, %v2360_v34  ;;  %v2384_v20 = vmul.f32 %v3879_v27, %v2376_v38  ;;  %v2400_v45 = vmul.f32 %v3879_v27, %v2360_v34  ;;  %v2361_v4 = vmul.f32 2.0, %v3883_v47  ;;  %v3885_v46 = vpop.eup %3884 }
 0x66e   :  { %v2366_v50 = vadd.f32 1.0, %v2358_v13  ;;  %v2382_v23 = vmul.f32 %v3881_v31, %v2374_v21  ;;  %v2398_v26 = vmul.f32 %v3881_v31, %v2358_v13  ;;  %v2377_v10 = vadd.f32 2.0, %v3883_v47 }
 0x66f   :  { %v2392_v37 = vsel %vm2352_vm8, %v2368_v63, %v2384_v20  ;;  %v2408_v53 = vsel %vm2352_vm8, %v2400_v45, 2.0  ;;  %v2369_v35 = vadd.f32 1.0, %v2361_v4  ;;  %v2401_v5 = vmul.f32 %v3883_v47, %v2361_v4 }
 0x670   :  { %v2416_v0 = vadd.f32 %v2408_v53, %v2392_v37  ;;  %v5045_v6 = vsel %vm2350_vm9, %v2366_v50, %v2382_v23  ;;  %v2406_v51 = vsel %vm2350_vm9, %v2398_v26, 2.0  ;;  %v2385_v55 = vmul.f32 %v3883_v47, %v2377_v10 }
 0x671   :  { %v2409_v39 = vsel %vm2353_vm10, %v2401_v5, 2.0  ;;  %v2359_v2 = vmul.f32 2.0, %v3885_v46  ;;  %v2375_v52 = vadd.f32 2.0, %v3885_v46  ;;  %v2414_v9 = vadd.f32 %v2406_v51, %v5045_v6 }
 0x672   :  { %v3887_v18 = vpop.eup %3886  ;;  %v2393_v28 = vsel %vm2353_vm10, %v2369_v35, %v2385_v55  ;;  %3894 = vrcp.f32 %v2416_v0  ;;  %v2424_v26 = vmul.f32 %v2392_v37, %v5007_v17  ;;  %v3587_v17 = vld [vmem:[%s5182_s1 + $0x40] sm:$0xff]  }
 0x673   :  { %v3889_v58 = vpop.eup %3888  ;;  %v2364_v32 = vmul.f32 2.0, %v3887_v18  ;;  %v2380_v3 = vadd.f32 2.0, %v3887_v18  ;;  %v2417_v49 = vadd.f32 %v2409_v39, %v2393_v28  ;;  %v2367_v41 = vadd.f32 1.0, %v2359_v2 }
 0x674   :  { %v2383_v44 = vmul.f32 %v3885_v46, %v2375_v52  ;;  %v3891_v15 = vpop.eup %3890  ;;  %v2399_v54 = vmul.f32 %v3885_v46, %v2359_v2  ;;  %v2362_v19 = vmul.f32 2.0, %v3889_v58  ;;  %v2378_v56 = vadd.f32 2.0, %v3889_v58 }
 0x675   :  { %v2372_v24 = vadd.f32 1.0, %v2364_v32  ;;  %v2388_v29 = vmul.f32 %v3887_v18, %v2380_v3  ;;  %v2404_v40 = vmul.f32 %v3887_v18, %v2364_v32  ;;  %v3893_v36 = vpop.eup %3892  ;;  %3896 = vrcp.f32 %v2417_v49  ;;  %v3588_v32 = vld [vmem:[%s5182_s1 + $0x48] sm:$0xff]  }
 0x676   :  { %v2391_v57 = vsel %vm2351_vm11, %v2367_v41, %v2383_v44  ;;  %3898 = vrcp.f32 %v2414_v9  ;;  %v2407_v25 = vsel %vm2351_vm11, %v2399_v54, 2.0  ;;  %v2370_v14 = vadd.f32 1.0, %v2362_v19 }
 0x677   :  { %v2415_v61 = vadd.f32 %v2407_v25, %v2391_v57  ;;  %v2396_v43 = vsel %vm2356_vm12, %v2372_v24, %v2388_v29  ;;  %v2412_v59 = vsel %vm2356_vm12, %v2404_v40, 2.0  ;;  %v2386_v12 = vmul.f32 %v3889_v58, %v2378_v56 }
 0x678   :  { %v2402_v11 = vmul.f32 %v3889_v58, %v2362_v19  ;;  %v2365_v30 = vmul.f32 2.0, %v3891_v15  ;;  %v2381_v22 = vadd.f32 2.0, %v3891_v15  ;;  %v2363_v27 = vmul.f32 2.0, %v3893_v36 }
 0x679   :  { %3900 = vrcp.f32 %v2415_v61  ;;  %v2379_v31 = vadd.f32 2.0, %v3893_v36  ;;  %v2420_v34 = vadd.f32 %v2412_v59, %v2396_v43  ;;  %v2394_v38 = vsel %vm2354_vm13, %v2370_v14, %v2386_v12 }
 0x67a   :  { %v2410_v47 = vsel %vm2354_vm13, %v2402_v11, 2.0  ;;  %v2373_v13 = vadd.f32 1.0, %v2365_v30  ;;  %v2389_v63 = vmul.f32 %v3891_v15, %v2381_v22  ;;  %v2405_v20 = vmul.f32 %v3891_v15, %v2365_v30  ;;  %v82_v11 = vld [vmem:[%s5183_s2 + $0x10] sm:$0xff] }
 0x67b   :  { %v2418_v21 = vadd.f32 %v2410_v47, %v2394_v38  ;;  %v2371_v45 = vadd.f32 1.0, %v2363_v27  ;;  %v2387_v4 = vmul.f32 %v3893_v36, %v2379_v31  ;;  %v2403_v50 = vmul.f32 %v3893_v36, %v2363_v27 }
 0x67c   :  { %v3895_v23 = vpop.eup %3894  ;;  %v2425_v10 = vmul.f32 %v2393_v28, %v5014_v42  ;;  %v2397_v46 = vsel %vm2357_vm14, %v2373_v13, %v2389_v63  ;;  %v2413_v53 = vsel %vm2357_vm14, %v2405_v20, 2.0  ;;  %3902 = vrcp.f32 %v2420_v34 }
 0x67d   :  { %v2421_v35 = vadd.f32 %v2413_v53, %v2397_v46  ;;  %v2395_v5 = vsel %vm2355_vm15, %v2371_v45, %v2387_v4  ;;  %v2411_v0 = vsel %vm2355_vm15, %v2403_v50, 2.0  ;;  %3904 = vrcp.f32 %v2418_v21 }
 0x67e   :  { %v2419_v55 = vadd.f32 %v2411_v0, %v2395_v5  ;;  %v2440_v18 = vmul.f32 %v3895_v23, %v2424_v26  ;;  %v2422_v42 = vmul.f32 %v5045_v6, %v5010_v7  ;;  %v2423_v52 = vmul.f32 %v2391_v57, %v5017_v48 }
 0x67f   :  { %v3897_v51 = vpop.eup %3896  ;;  %3906 = vrcp.f32 %v2421_v35  ;;  %v2428_v6 = vmul.f32 %v2396_v43, %v5023_v62  ;;  %v2429_v49 = vmul.f32 %v2397_v46, %v5030_v8  ;;  %v2426_v44 = vmul.f32 %v2394_v38, %v5026_v60  ;;  %v3589_v60 = vld [vmem:[%s5182_s1 + $0x60] sm:$0xff]  }
 0x680   :  { %v3899_v39 = vpop.eup %3898  ;;  %v2441_v2 = vmul.f32 %v3897_v51, %v2425_v10  ;;  %3908 = vrcp.f32 %v2419_v55  ;;  %v2427_v15 = vmul.f32 %v2395_v5, %v5033_v16  ;;  %v2657_v31 = vrot.slane %v82_v11, %v4077_v33 }
 0x681   :  { %v2438_v9 = vmul.f32 %v3899_v39, %v2422_v42 }
 0x682   :  { %v2447_v37 = vpack.c.bf16 %v2441_v2, %v2440_v18 }
 0x683   :  { %v3901_v58 = vpop.eup %3900 }
 0x684   :  { %v2439_v28 = vmul.f32 %v3901_v58, %v2423_v52  ;;  %3485 = vmatmul.mubr.msk.bf16.vlgmr.msra.gmra.mrb[52].mxu0 %vm604_vm6, %v2447_v37 }
 0x685   :  { %3495 = vmatpush3.bf16.msra.mxu0 %v3587_v17  ;;  %3496 = vmatprep.mubr.msk.bf16.mxu0 %vm3959_vm0, %v3958_v1 }
 0x686   :  { %v2446_v3 = vpack.c.bf16 %v2439_v28, %v2438_v9  ;;  %3506 = vmatprep.subr.bf16.mxu0 %v3958_v1  ;;  %v3903_v7 = vpop.eup %3902 }
 0x687   :  { %v3905_v48 = vpop.eup %3904  ;;  %v2444_v24 = vmul.f32 %v3903_v7, %v2428_v6 }
 0x688   :  { %3491 = vmatmul.mubr.msk.bf16.vlgmr.msra.gmra.mrb[80].mxu1 %vm604_vm6, %v2446_v3  ;;  %v2442_v40 = vmul.f32 %v3905_v48, %v2426_v44 }
 0x689   :  { %3501 = vmatpush3.bf16.msra.mxu1 %v3588_v32  ;;  %3502 = vmatprep.mubr.msk.bf16.mxu1 %vm3959_vm0, %v3958_v1  ;;  %v3907_v41 = vpop.eup %3906 }
 0x68a   :  { %3512 = vmatprep.subr.bf16.mxu1 %v3958_v1  ;;  %v3909_v54 = vpop.eup %3908  ;;  %v2445_v29 = vmul.f32 %v3907_v41, %v2429_v49 }
 0x68b   :  { %v2443_v36 = vmul.f32 %v3909_v54, %v2427_v15 }
 0x68c   :  { %v2601_v57 = vpack.c.bf16 %v2445_v29, %v2444_v24 }
 0x68d   :  { %v2548_v62 = vpack.c.bf16 %v2443_v36, %v2442_v40  ;;  %v3590_v40 = vld [vmem:[%s5182_s1 + $0x78] sm:$0xff]  }
 0x68e   :  { %v87_v36 = vld [vmem:[%s5183_s2 + $0x38] sm:$0xff] }
 0x68f   :  { %3497 = vmatmul.mubr.msk.bf16.vlgmr.msra.gmra.mrb[56].mxu0 %vm604_vm6, %v2548_v62 }
 0x690   :  { %3503 = vmatmul.mubr.msk.bf16.vlgmr.msra.gmra.mrb[84].mxu1 %vm604_vm6, %v2601_v57  ;;  %3508 = vmatprep.mubr.msk.bf16.mxu0 %vm3959_vm0, %v3958_v1  ;;  %v2696_v57 = vrot.slane %v87_v36, %v4077_v33 }
 0x691   :  { %3514 = vmatprep.mubr.msk.bf16.mxu1 %vm3959_vm0, %v3958_v1  ;;  %3507 = vmatpush3.bf16.msra.mxu0 %v3589_v60 }
 0x692   :  { %3518 = vmatprep.subr.bf16.mxu0 %v3958_v1  ;;  %3513 = vmatpush3.bf16.msra.mxu1 %v3590_v40 }
 0x693   :  { %3524 = vmatprep.subr.bf16.mxu1 %v3958_v1 }
 0x757   :  { %v2491_v8 = vpop.f32.mrb[52].mxu0 }
 0x758   :  { %v3486_v16 = vpop.f32.mrb[53].mxu0 }
 0x759   :  { %v2494_v19 = vpop.f32.mrb[54].mxu0 }
 0x75a   :  { %v3487_v56 = vpop.f32.mrb[55].mxu0 }
 0x75b   :  { %v2541_v25 = vpop.f32.mrb[80].mxu1 }
 0x75c   :  { %v2542_v61 = vadd.f32 %v2541_v25, %v2491_v8  ;;  %v3492_v43 = vpop.f32.mrb[81].mxu1 }
 0x75d   :  { %v2544_v59 = vpop.f32.mrb[82].mxu1 }
 0x75e   :  { %v2545_v14 = vadd.f32 %v2544_v59, %v2494_v19  ;;  %v3493_v12 = vpop.f32.mrb[83].mxu1 }
 0x762   :  { %v2592_v30 = vpop.f32.mrb[56].mxu0 }
 0x763   :  { %v2645_v22 = vpop.f32.mrb[84].mxu1  ;;  %v2599_v27 = vadd.f32 %v2592_v30, %v2542_v61  ;;  %v3498_v34 = vpop.f32.mrb[57].mxu0 }
 0x764   :  { %v3504_v38 = vpop.f32.mrb[85].mxu1  ;;  %v2595_v47 = vpop.f32.mrb[58].mxu0 }
 0x765   :  { %v2648_v13 = vpop.f32.mrb[86].mxu1  ;;  %v2652_v21 = vadd.f32 %v2645_v22, %v2599_v27  ;;  %v2600_v63 = vadd.f32 %v2595_v47, %v2545_v14  ;;  %v3499_v20 = vpop.f32.mrb[59].mxu0 }
 0x766   :  { %v3505_v45 = vpop.f32.mrb[87].mxu1 }
 0x767   :  { %v2658_v4 = vadd.f32 %v2657_v31, %v2652_v21  ;;  %v2653_v50 = vadd.f32 %v2648_v13, %v2600_v63 }
 0x769   :  { %v2660_v23 = vand.u32 2147483647, %v2658_v4  ;;  %v2659_v26 = vadd.f32 %v2657_v31, %v2653_v50  ;;  %vm2668_vm2 = vcmp.ge.f32.partialorder %v2658_v4, 0.0 }
 0x76b   :  { %v2662_v10 = vsub.f32 0.0, %v2660_v23  ;;  %v2661_v46 = vand.u32 2147483647, %v2659_v26  ;;  %vm2669_vm3 = vcmp.ge.f32.partialorder %v2659_v26, 0.0 }
 0x76d   :  { %v2664_v53 = vmul.f32 1.442695, %v2662_v10  ;;  %v2663_v35 = vsub.f32 0.0, %v2661_v46 }
 0x76f   :  { %3910 = vpow2.f32 %v2664_v53  ;;  %v2666_v5 = vmul.f32 1.442695, %v2663_v35 }
 0x771   :  { %3912 = vpow2.f32 %v2666_v5 }
 0x779   :  { %v3911_v0 = vpop.eup %3910 }
 0x77a   :  { %v2670_v51 = vmul.f32 2.0, %v3911_v0  ;;  %v2674_v55 = vadd.f32 2.0, %v3911_v0 }
 0x77b   :  { %v3913_v39 = vpop.eup %3912 }
 0x77c   :  { %v2672_v18 = vadd.f32 1.0, %v2670_v51  ;;  %v2676_v2 = vmul.f32 %v3911_v0, %v2674_v55  ;;  %v2680_v17 = vmul.f32 %v3911_v0, %v2670_v51  ;;  %v2671_v42 = vmul.f32 2.0, %v3913_v39 }
 0x77d   :  { %v2675_v37 = vadd.f32 2.0, %v3913_v39 }
 0x77e   :  { %v2678_v52 = vsel %vm2668_vm2, %v2672_v18, %v2676_v2  ;;  %v2682_v58 = vsel %vm2668_vm2, %v2680_v17, 2.0  ;;  %v2673_v9 = vadd.f32 1.0, %v2671_v42  ;;  %v2681_v28 = vmul.f32 %v3913_v39, %v2671_v42  ;;  %v90_v18 = vld [vmem:[%s5183_s2 + $0x50] sm:$0xff] }
 0x77f   :  { %v2684_v32 = vadd.f32 %v2682_v58, %v2678_v52  ;;  %v2677_v3 = vmul.f32 %v3913_v39, %v2675_v37  ;;  %v2686_v41 = vmul.f32 %v2678_v52, %v2658_v4  ;;  %v3591_v39 = vld [vmem:[%s5182_s1 + $0x80] sm:$0xff]   ;;  %v2835_v2 = vrot.slane %v90_v18, %v4077_v33 }
 0x780   :  { %v2683_v7 = vsel %vm2669_vm3, %v2681_v28, 2.0  ;;  %v3595_v18 = vld [vmem:[%s5182_s1 + $0xa0] sm:$0xff]  }
 0x781   :  { %v2679_v48 = vsel %vm2669_vm3, %v2673_v9, %v2677_v3  ;;  %3914 = vrcp.f32 %v2684_v32 }
 0x782   :  { %v2685_v6 = vadd.f32 %v2683_v7, %v2679_v48  ;;  %v2687_v44 = vmul.f32 %v2679_v48, %v2659_v26 }
 0x784   :  { %3916 = vrcp.f32 %v2685_v6 }
 0x78b   :  { %v3915_v49 = vpop.eup %3914 }
 0x78c   :  { %v2690_v54 = vmul.f32 %v3915_v49, %v2686_v41 }
 0x78e   :  { %v3917_v15 = vpop.eup %3916 }
 0x78f   :  { %v5097_v24 = vmul.f32 %v3917_v15, %v2687_v44 }
 0x791   :  { %v2692_v29 = vpack.c.bf16 %v5097_v24, %v2690_v54 }
 0x793   :  { %3509 = vmatmul.mubr.msk.bf16.vlgmr.msra.gmra.mrb[60].mxu0 %vm604_vm6, %v2692_v29 }
 0x794   :  { %3520 = vmatprep.mubr.msk.bf16.mxu0 %vm3959_vm0, %v3958_v1  ;;  %3519 = vmatpush3.bf16.msra.mxu0 %v3591_v39  ;;  %v3594_v39 = vld [vmem:[%s5182_s1 + $0x98] sm:$0xff]  }
 0x795   :  { %3532 = vmatprep.subr.bf16.mxu0 %v3958_v1 }
 0x866   :  { %v2740_v62 = vpop.f32.mrb[60].mxu0 }
 0x867   :  { %v2741_v60 = vadd.f32 %v2740_v62, %v2696_v57  ;;  %v3510_v8 = vpop.f32.mrb[61].mxu0 }
 0x868   :  { %v2743_v16 = vpop.f32.mrb[62].mxu0 }
 0x869   :  { %v2747_v19 = vand.u32 2147483647, %v2741_v60  ;;  %v2744_v56 = vadd.f32 %v2743_v16, %v2696_v57  ;;  %v3511_v25 = vpop.f32.mrb[63].mxu0  ;;  %vm2755_vm4 = vcmp.ge.f32.partialorder %v2741_v60, 0.0 }
 0x86b   :  { %v2749_v61 = vsub.f32 0.0, %v2747_v19  ;;  %v2748_v43 = vand.u32 2147483647, %v2744_v56  ;;  %vm2756_vm5 = vcmp.ge.f32.partialorder %v2744_v56, 0.0 }
 0x86d   :  { %v2751_v59 = vmul.f32 1.442695, %v2749_v61  ;;  %v2750_v14 = vsub.f32 0.0, %v2748_v43 }
 0x86f   :  { %3918 = vpow2.f32 %v2751_v59  ;;  %v2753_v12 = vmul.f32 1.442695, %v2750_v14 }
 0x871   :  { %3920 = vpow2.f32 %v2753_v12 }
 0x879   :  { %v3919_v11 = vpop.eup %3918 }
 0x87a   :  { %v2757_v30 = vmul.f32 2.0, %v3919_v11  ;;  %v2761_v22 = vadd.f32 2.0, %v3919_v11 }
 0x87b   :  { %v3921_v27 = vpop.eup %3920 }
 0x87c   :  { %v2759_v31 = vadd.f32 1.0, %v2757_v30  ;;  %v2763_v34 = vmul.f32 %v3919_v11, %v2761_v22  ;;  %v2767_v38 = vmul.f32 %v3919_v11, %v2757_v30  ;;  %v2758_v47 = vmul.f32 2.0, %v3921_v27 }
 0x87d   :  { %v2762_v13 = vadd.f32 2.0, %v3921_v27 }
 0x87e   :  { %v2765_v21 = vsel %vm2755_vm4, %v2759_v31, %v2763_v34  ;;  %v2769_v63 = vsel %vm2755_vm4, %v2767_v38, 2.0  ;;  %v2760_v20 = vadd.f32 1.0, %v2758_v47  ;;  %v2768_v45 = vmul.f32 %v3921_v27, %v2758_v47  ;;  %v3592_v34 = vld [vmem:[%s5182_s1 + $0x88] sm:$0xff]   ;;  %v3593_v38 = vld [vmem:[%s5182_s1 + $0x90] sm:$0xff]   ;;  %v91_v47 = vld [vmem:[%s5183_s2 + $0x58] sm:$0xff] }
 0x87f   :  { %v2771_v4 = vadd.f32 %v2769_v63, %v2765_v21  ;;  %v2764_v50 = vmul.f32 %v3921_v27, %v2762_v13  ;;  %v2773_v53 = vmul.f32 %v2765_v21, %v2741_v60  ;;  %v2874_v13 = vrot.slane %v91_v47, %v4077_v33 }
 0x880   :  { %v2770_v23 = vsel %vm2756_vm5, %v2768_v45, 2.0 }
 0x881   :  { %v2766_v26 = vsel %vm2756_vm5, %v2760_v20, %v2764_v50  ;;  %3922 = vrcp.f32 %v2771_v4 }
 0x882   :  { %v2772_v10 = vadd.f32 %v2770_v23, %v2766_v26  ;;  %v2774_v35 = vmul.f32 %v2766_v26, %v2744_v56 }
 0x884   :  { %3924 = vrcp.f32 %v2772_v10 }
 0x88b   :  { %v3923_v46 = vpop.eup %3922 }
 0x88c   :  { %v2777_v0 = vmul.f32 %v3923_v46, %v2773_v53 }
 0x88e   :  { %v3925_v5 = vpop.eup %3924 }
 0x88f   :  { %v2778_v51 = vmul.f32 %v3925_v5, %v2774_v35 }
 0x891   :  { %v2779_v55 = vpack.c.bf16 %v2778_v51, %v2777_v0 }
 0x893   :  { %3515 = vmatmul.mubr.msk.bf16.vlgmr.msra.gmra.mrb[88].mxu1 %vm604_vm6, %v2779_v55 }
 0x894   :  { %3528 = vmatprep.mubr.msk.bf16.mxu1 %vm3959_vm0, %v3958_v1  ;;  %3525 = vmatpush3.bf16.msra.mxu1 %v3592_v34 }
 0x895   :  { %3526 = vmatprep.subr.bf16.mxu1 %v3958_v1 }
 0x898   :  { %3527 = vmatpush3.bf16.msra.mxu1 %v3593_v38 }
 0x899   :  { %3540 = vmatprep.subr.bf16.mxu1 %v3958_v1 }
 0x966   :  { %v2823_v17 = vpop.f32.mrb[88].mxu1 }
 0x967   :  { %v2830_v42 = vadd.f32 %v2823_v17, %v2690_v54  ;;  %v3516_v37 = vpop.f32.mrb[89].mxu1 }
 0x968   :  { %v2826_v52 = vpop.f32.mrb[90].mxu1 }
 0x969   :  { %v2836_v58 = vadd.f32 %v2835_v2, %v2830_v42  ;;  %v2831_v9 = vadd.f32 %v2826_v52, %v5097_v24  ;;  %v3517_v28 = vpop.f32.mrb[91].mxu1 }
 0x96b   :  { %v2838_v32 = vand.u32 2147483647, %v2836_v58  ;;  %v2837_v3 = vadd.f32 %v2835_v2, %v2831_v9  ;;  %vm2846_vm7 = vcmp.ge.f32.partialorder %v2836_v58, 0.0  ;;  %v92_v2 = vld [vmem:[%s5183_s2 + $0x60] sm:$0xff] }
 0x96c   :  { %v2942_v17 = vrot.slane %v92_v2, %v4077_v33 }
 0x96d   :  { %v2840_v7 = vsub.f32 0.0, %v2838_v32  ;;  %v2839_v48 = vand.u32 2147483647, %v2837_v3  ;;  %vm2847_vm8 = vcmp.ge.f32.partialorder %v2837_v3, 0.0 }
 0x96f   :  { %v2842_v6 = vmul.f32 1.442695, %v2840_v7  ;;  %v2841_v49 = vsub.f32 0.0, %v2839_v48  ;;  %v3596_v7 = vld [vmem:[%s5182_s1 + $0xa8] sm:$0xff]   ;;  %v3597_v48 = vld [vmem:[%s5182_s1 + $0xb0] sm:$0xff]   ;;  %s3960_s1 = smov [#allocation2]  }
 0x970   :  { %s3130_s13 = sshll.u32 %s3960_s1, 4  ;;  %s3131_s13 = int_to_ptr.vmem [resolvable:$true] %s3130_s13 }
 0x971   :  { %3926 = vpow2.f32 %v2842_v6  ;;  %v2844_v41 = vmul.f32 1.442695, %v2841_v49  ;;  %v93_v6 = vld [vmem:[%s5183_s2 + $0x68] sm:$0xff]  ;;  %s3934_s14 = scalar_lea.vmem %s3131_s13, 32  ;;  %p3939_p1 = scmp.lt.s32.totalorder %s3131_s13, %s3131_s13 }
 0x972   :  { %v3004_v49 = vrot.slane %v93_v6, %v4077_v33  ;;  %p3935_p0 = scmp.ne.s32.totalorder %s3131_s13, %s3934_s14  ;;  %p3940_p2 = scmp.lt.s32.totalorder %s3934_s14, %s3934_s14 }
 0x973   :  { %3928 = vpow2.f32 %v2844_v41 }
 0x974   :  { %p3941_p3 = por %p3940_p2, %p3939_p1 }
 0x976   :  { %p3942_p4 = pnand %p3941_p3, %p3935_p0 }
 0x97b   :  { %v3927_v44 = vpop.eup %3926 }
 0x97c   :  { %v2848_v15 = vmul.f32 2.0, %v3927_v44  ;;  %v2852_v29 = vadd.f32 2.0, %v3927_v44 }
 0x97d   :  { %v3929_v40 = vpop.eup %3928 }
 0x97e   :  { %v2850_v54 = vadd.f32 1.0, %v2848_v15  ;;  %v2854_v36 = vmul.f32 %v3927_v44, %v2852_v29  ;;  %v2858_v57 = vmul.f32 %v3927_v44, %v2848_v15  ;;  %v2849_v62 = vmul.f32 2.0, %v3929_v40 }
 0x97f   :  { %v2853_v24 = vadd.f32 2.0, %v3929_v40 }
 0x980   :  { %v2856_v60 = vsel %vm2846_vm7, %v2850_v54, %v2854_v36  ;;  %v2860_v8 = vsel %vm2846_vm7, %v2858_v57, 2.0  ;;  %v2851_v16 = vadd.f32 1.0, %v2849_v62  ;;  %v2859_v19 = vmul.f32 %v3929_v40, %v2849_v62 }
 0x981   :  { %v2862_v56 = vadd.f32 %v2860_v8, %v2856_v60  ;;  %v2855_v25 = vmul.f32 %v3929_v40, %v2853_v24  ;;  %v2864_v12 = vmul.f32 %v2856_v60, %v2836_v58 }
 0x982   :  { %v2861_v61 = vsel %vm2847_vm8, %v2859_v19, 2.0 }
 0x983   :  { %v2857_v43 = vsel %vm2847_vm8, %v2851_v16, %v2855_v25  ;;  %3930 = vrcp.f32 %v2862_v56 }
 0x984   :  { %v2863_v59 = vadd.f32 %v2861_v61, %v2857_v43  ;;  %v2865_v11 = vmul.f32 %v2857_v43, %v2837_v3 }
 0x986   :  { %3932 = vrcp.f32 %v2863_v59 }
 0x98d   :  { %v3931_v14 = vpop.eup %3930 }
 0x98e   :  { %v2868_v22 = vmul.f32 %v3931_v14, %v2864_v12 }
 0x990   :  { %v3933_v30 = vpop.eup %3932 }
 0x991   :  { %v2869_v27 = vmul.f32 %v3933_v30, %v2865_v11 }
 0x993   :  { %v2870_v31 = vpack.c.bf16 %v2869_v27, %v2868_v22 }
 0x995   :  { %3521 = vmatmul.mubr.msk.bf16.vlgmr.msra.gmra.mrb[64].mxu0 %vm604_vm6, %v2870_v31 }
 0x996   :  { %3536 = vmatprep.mubr.msk.bf16.mxu0 %vm3959_vm0, %v3958_v1  ;;  %3533 = vmatpush3.bf16.msra.mxu0 %v3594_v39 }
 0x997   :  { %3534 = vmatprep.subr.bf16.mxu0 %v3958_v1 }
 0x99a   :  { %3535 = vmatpush3.bf16.msra.mxu0 %v3595_v18 }
 0xa68   :  { %v2918_v21 = vpop.f32.mrb[64].mxu0 }
 0xa69   :  { %v2919_v63 = vadd.f32 %v2918_v21, %v2874_v13  ;;  %v3522_v20 = vpop.f32.mrb[65].mxu0 }
 0xa6a   :  { %v2921_v45 = vpop.f32.mrb[66].mxu0 }
 0xa6b   :  { %v2925_v4 = vmax.f32 %v2919_v63, -1.0  ;;  %v2922_v50 = vadd.f32 %v2921_v45, %v2874_v13  ;;  %v3523_v23 = vpop.f32.mrb[67].mxu0 }
 0xa6d   :  { %v2926_v26 = vmax.f32 %v2922_v50, -1.0  ;;  %v2927_v10 = vmin.f32 %v2925_v4, 0.9921875 }
 0xa6f   :  { %v2928_v46 = vmin.f32 %v2926_v26, 0.9921875 }
 0xa71   :  { %v2929_v53 = vadd.f32 %v2928_v46, %v2927_v10 }
 0xa73   :  { %v2931_v35 = vrot.slane %v2929_v53, 4 }
 0xa75   :  { %v2933_v5 = vadd.f32 %v2931_v35, %v2929_v53 }
 0xa77   :  { %v2935_v0 = vrot.slane %v2933_v5, 2 }
 0xa79   :  { %v2937_v51 = vadd.f32 %v2935_v0, %v2933_v5 }
 0xa7b   :  { %v2938_v55 = vpack.c.bf16 %v2937_v51, %v2937_v51 }
 0xa7d   :  { %3529 = vmatmul.mubr.msk.bf16.vlgmr.msra.gmra.mrb[92].mxu1 %vm120_vm1, %v2938_v55 }
 0xa7e   :  { %3544 = vmatprep.mubr.msk.bf16.mxu1 %vm3959_vm0, %v3958_v1  ;;  %3541 = vmatpush3.bf16.msra.mxu1 %v3596_v7  ;;  %vm3122_vm0 = vcmask 17408  }
 0xa7f   :  { %3542 = vmatprep.subr.bf16.mxu1 %v3958_v1  ;;  %v94_v1 = vld [vmem:[%s5183_s2 + $0x70] sm:$0xff] }
 0xa80   :  { %v3066_v62 = vrot.slane %v94_v1, %v4077_v33 }
 0xa82   :  { %3543 = vmatpush3.bf16.msra.mxu1 %v3597_v48 }
 0xb50   :  { %v2992_v42 = vpop.f32.mrb[92].mxu1 }
 0xb51   :  { %v2993_v37 = vadd.f32 %v2992_v42, %v2942_v17  ;;  %v3530_v52 = vpop.f32.mrb[93].mxu1 }
 0xb52   :  { %v2995_v58 = vpop.f32.mrb[94].mxu1 }
 0xb53   :  { %v2998_v9 = vmax.f32 %v2993_v37, 0.0  ;;  %v3531_v28 = vpop.f32.mrb[95].mxu1 }
 0xb55   :  { %v2999_v32 = vmin.f32 %v2998_v9, 1.0 }
 0xb57   :  { %v3000_v3 = vpack.c.bf16 %v2999_v32, %v2999_v32 }
 0xb59   :  { %3537 = vmatmul.mubr.msk.bf16.vlgmr.msra.gmra.mrb[68].mxu0 %vm120_vm1, %v3000_v3 }
 0xc2c   :  { %v3054_v41 = vpop.f32.mrb[68].mxu0 }
 0xc2d   :  { %v3055_v44 = vadd.f32 %v3054_v41, %v3004_v49  ;;  %v3538_v15 = vpop.f32.mrb[69].mxu0 }
 0xc2e   :  { %v3057_v29 = vpop.f32.mrb[70].mxu0 }
 0xc2f   :  { %v3060_v40 = vmax.f32 %v3055_v44, 0.0  ;;  %v3539_v54 = vpop.f32.mrb[71].mxu0 }
 0xc31   :  { %v3061_v36 = vmin.f32 %v3060_v40, 1.0 }
 0xc33   :  { %v3062_v57 = vpack.c.bf16 %v3061_v36, %v3061_v36 }
 0xc35   :  { %3545 = vmatmul.mubr.msk.bf16.vlgmr.msra.gmra.mrb[96].mxu1 %vm120_vm1, %v3062_v57 }
 0xd08   :  { %v3116_v24 = vpop.f32.mrb[96].mxu1 }
 0xd09   :  { %v3117_v60 = vadd.f32 %v3116_v24, %v3066_v62  ;;  %v3546_v8 = vpop.f32.mrb[97].mxu1 }
 0xd0a   :  { %v3119_v16 = vpop.f32.mrb[98].mxu1 }
 0xd0b   :  { %v3547_v19 = vpop.f32.mrb[99].mxu1  ;;  %3123 = vst.msk [vmem:[#allocation2] sm:$0x3] %vm3122_vm0, %v3117_v60 }
 0xd0c   :  { %3945 = shalt.err (!%p3942_p4)
}
 0xd0d   :  { %s3946_s16 = scalar_lea.hbm %s5184_s3, 32 }
 0xd0e   :  { %p3947_p5 = scmp.ne.s32.totalorder %s5184_s3, %s3946_s16  ;;  %p3950_p6 = scmp.lt.u32.totalorder %s3946_s16, %s5184_s3 }
 0xd10   :  { %p3952_p7 = pnand %p3950_p6, %p3947_p5 }
 0xd12   :  { %3955 = shalt.err (!%p3952_p7)
}
 0xd13   :  { %3133 = dma.vmem_to_hbm [thread:$0]  %s3131_s13, 32, %s5184_s3, [#allocation3]  }
 0xd14   :  { %3956 = dma.done.wait [#allocation3], 32  }
 0xd15   :  { %3957 = vsyncadd [#allocation3], 4294967264 }
 0xd16   :  { %3137 = vsyncpa [#allocation3], 1 }

</bundles_post_ra>
